<compile_context>
chip_gen: v7x
topology: tpu7x:2x2x1
jax: 0.10.0
libtpu: 0.0.40
codegen_flags: <defaults>
</compile_context>

<pallas_src>
import functools

import jax
import jax.numpy as jnp
from jax.experimental import pallas as pl
from jax.experimental.pallas import tpu as pltpu


def _layernorm(x, g, b, eps):
    # One-pass moments: E[x], E[x^2] (cuts cross-lane XLU reductions vs two-pass).
    mu = jnp.mean(x, axis=-1, keepdims=True)
    mu2 = jnp.mean(x * x, axis=-1, keepdims=True)
    var = jnp.maximum(mu2 - mu * mu, 0.0)
    inv = jax.lax.rsqrt(var + eps)
    return (x - mu) * inv * g + b


def cross_attn_block_kernel(
    q_ref, kv_ref,
    lnq_g_ref, lnq_b_ref, lnkv_g_ref, lnkv_b_ref,
    wq_ref, wkv_ref, wo_ref, bo_ref,
    ln2_g_ref, ln2_b_ref,
    w1_ref, b1_ref, w2_ref, b2_ref,
    out_ref,
    *, num_heads, eps,
):
    Bt, Nq, C = q_ref.shape
    _, Nkv, _ = kv_ref.shape
    H = num_heads
    dh = C // H
    f32, bf16 = jnp.float32, jnp.bfloat16

    # bf16 blocks in -> f32 for LN / residual math.
    q = q_ref[...].astype(f32).reshape(Bt * Nq, C)
    kv = kv_ref[...].astype(f32).reshape(Bt * Nkv, C)

    # --- pre-LN (f32) ---
    qn = _layernorm(q, lnq_g_ref[...], lnq_b_ref[...], eps).astype(bf16)
    kvn = _layernorm(kv, lnkv_g_ref[...], lnkv_b_ref[...], eps).astype(bf16)

    # --- lane-dense 2-D projections (bf16 operands, f32 MXU accumulation) ---
    # 1/sqrt(dh) is folded into wq; K|V fused into one (C, 2C) weight.
    qp = jnp.dot(qn, wq_ref[...], preferred_element_type=f32).astype(bf16)   # (Bt*Nq, C)
    kvp = jnp.dot(kvn, wkv_ref[...], preferred_element_type=f32).astype(bf16)  # (Bt*Nkv, 2C)
    kp = kvp[:, :C]                                                          # (Bt*Nkv, C)
    vp = kvp[:, C:]                                                          # (Bt*Nkv, C)

    # --- attention: heads statically unrolled (small H); batch tile folded
    #     into the einsum batch dim (no per-batch loop / concat) ---
    ctx_heads = []
    for h in range(H):
        lo = h * dh
        qh = qp[:, lo:lo + dh].reshape(Bt, Nq, dh)
        kh = kp[:, lo:lo + dh].reshape(Bt, Nkv, dh)
        vh = vp[:, lo:lo + dh].reshape(Bt, Nkv, dh)
        sim = jnp.einsum('bqd,bkd->bqk', qh, kh,
                         preferred_element_type=f32)          # (Bt, Nq, Nkv), f32
        sim = sim - jnp.max(sim, axis=-1, keepdims=True)
        p = jnp.exp(sim)
        p = p * pl.reciprocal(jnp.sum(p, axis=-1, keepdims=True), approx=True)
        ctx_heads.append(
            jnp.einsum('bqk,bkd->bqd', p.astype(bf16), vh,
                       preferred_element_type=f32).astype(bf16))   # (Bt, Nq, dh)
    ctx = ctx_heads[0] if H == 1 else jnp.concatenate(ctx_heads, axis=-1)
    ctx = ctx.reshape(Bt * Nq, C)                                   # head-merged, bf16

    # --- single (C, C) output projection + first residual ---
    attn_out = jnp.dot(ctx, wo_ref[...], preferred_element_type=f32)
    fx = attn_out + bo_ref[...] + q

    # --- MLP branch (LN -> fc1 -> GELU -> fc2) + second residual ---
    fxn = _layernorm(fx, ln2_g_ref[...], ln2_b_ref[...], eps).astype(bf16)
    h1 = jnp.dot(fxn, w1_ref[...], preferred_element_type=f32) + b1_ref[...]
    # tanh GELU runs on the EUP; tiny numerics delta vs PyTorch's exact erf GELU.
    h1 = jax.nn.gelu(h1, approximate=True)
    h2 = jnp.dot(h1.astype(bf16), w2_ref[...], preferred_element_type=f32) + b2_ref[...]
    out = h2 + fx

    out_ref[...] = out.reshape(Bt, Nq, C).astype(out_ref.dtype)


def _is_multi_tensorcore_chip():
    # v4 / v5p / v7x expose 2 TensorCores per device: prefer an even grid.
    try:
        kind = jax.devices()[0].device_kind.lower()
        return ("v7" in kind) or ("7x" in kind) or ("v4" in kind) or ("v5p" in kind)
    except Exception:
        return False


def _weight_spec(arr, single_buffer):
    nd = arr.ndim
    idx = lambda b, _nd=nd: (0,) * _nd
    if single_buffer:
        # Constant index_map -> weights stay resident; single buffer halves
        # their VMEM footprint (matters at realistic C on v7x's 64 MiB VMEM).
        return pl.BlockSpec(arr.shape, idx, pipeline_mode=pl.Buffered(1))
    return pl.BlockSpec(arr.shape, idx)


def cross_attention_block(q, kv, params, *, num_heads, eps=1e-5, batch_tile=None):
    """q: (B, Nq, C), kv: (B, Nkv, C) -> (B, Nq, C)."""
    B, Nq, C = q.shape
    _, Nkv, _ = kv.shape
    assert C % num_heads == 0
    dh = C // num_heads
    scale = dh ** (-0.5)
    out_dtype = q.dtype
    f32, bf16 = jnp.float32, jnp.bfloat16

    # --- weight prep (outside the kernel) ---
    wq = (params["wq"] * scale).astype(bf16)                                   # (C, C)
    wkv = jnp.concatenate([params["wk"], params["wv"]], axis=-1).astype(bf16)  # (C, 2C)
    wo = params["wo"].astype(bf16)                                             # (C, C)
    w1 = params["w1"].astype(bf16)
    w2 = params["w2"].astype(bf16)
    weight_args = [
        params["lnq_g"].astype(f32), params["lnq_b"].astype(f32),
        params["lnkv_g"].astype(f32), params["lnkv_b"].astype(f32),
        wq, wkv, wo, params["bo"].astype(f32),
        params["ln2_g"].astype(f32), params["ln2_b"].astype(f32),
        w1, params["b1"].astype(f32), w2, params["b2"].astype(f32),
    ]
    Hm = params["w1"].shape[1]
    weight_bytes = sum(int(a.size) * a.dtype.itemsize for a in weight_args)

    try:
        vmem_cap = int(pltpu.get_tpu_info().vmem_capacity_bytes)
    except Exception:
        vmem_cap = 64 * 2 ** 20          # conservative (v7x-sized) fallback
    prefer_even_grid = _is_multi_tensorcore_chip()

    def tile_act_bytes(d):
        # Rough per-grid-step activation footprint (bf16 I/O blocks double-
        # buffered by the pipeline, f32 intermediates, per-head softmax tiles).
        M, Mk = d * Nq, d * Nkv
        io = 2 * 2 * 2 * (M + Mk) * C + 2 * 4 * M * C
        interm = 4 * (8 * M * C + 4 * Mk * C + 3 * M * Hm + M * Nkv)
        return io + interm

    if batch_tile is None:
        # Size the block from VMEM: big M per step (per-step overhead ~0.35us
        # and MXU M-utilization dominate at small tiles).  grid=(1,) is fine
        # on single-TC chips; prefer an even grid on 2-TC chips.
        row_cap = 1024 if prefer_even_grid else 2048
        budget = int(0.5 * vmem_cap)
        divisors = [d for d in range(1, B + 1) if B % d == 0]
        feasible = [d for d in divisors
                    if d * max(Nq, Nkv) <= row_cap
                    and weight_bytes + tile_act_bytes(d) <= budget] or [1]
        batch_tile = max(feasible)
        if prefer_even_grid:
            even = [d for d in feasible if (B // d) % 2 == 0]
            if even:
                batch_tile = max(even)
    assert B % batch_tile == 0, "batch must be divisible by batch_tile"

    est = weight_bytes + tile_act_bytes(batch_tile)
    vmem_limit = int(min(max(32 * 2 ** 20, 2 * est), vmem_cap - 8 * 2 ** 20))
    vmem_limit = max(vmem_limit, 16 * 2 ** 20)

    kernel = functools.partial(cross_attn_block_kernel,
                               num_heads=num_heads, eps=eps)

    # bf16 activation I/O (halves streamed HBM<->VMEM bytes); LN runs in f32
    # inside the kernel.  Output stays in the caller's dtype.
    q_in = q.astype(bf16)
    kv_in = kv.astype(bf16)

    def build(single_buffer_weights):
        in_specs = [
            pl.BlockSpec((batch_tile, Nq, C), lambda b: (b, 0, 0)),
            pl.BlockSpec((batch_tile, Nkv, C), lambda b: (b, 0, 0)),
        ] + [_weight_spec(a, single_buffer_weights) for a in weight_args]
        return pl.pallas_call(
            kernel,
            out_shape=jax.ShapeDtypeStruct((B, Nq, C), out_dtype),
            grid_spec=pltpu.PrefetchScalarGridSpec(
                num_scalar_prefetch=0,
                grid=(B // batch_tile,),
                in_specs=in_specs,
                out_specs=pl.BlockSpec((batch_tile, Nq, C), lambda b: (b, 0, 0)),
            ),
            compiler_params=pltpu.CompilerParams(
                dimension_semantics=("parallel",),
                vmem_limit_bytes=vmem_limit),
        )

    try:
        return build(True)(q_in, kv_in, *weight_args)
    except Exception:
        # Fallback for jax versions without pipeline_mode=pl.Buffered(1) support
        # on resident-weight BlockSpecs (default double-buffered weights).
        return build(False)(q_in, kv_in, *weight_args)


def make_params(key, hidden_dim, mlp_ratio):
    C = hidden_dim
    H = C * mlp_ratio
    ks = jax.random.split(key, 8)

    def lin(k, fan_in, fan_out):
        # Deterministic small-scale init (shapes match nn.Linear, stored transposed).
        return (jax.random.normal(k, (fan_in, fan_out), jnp.float32)
                * (1.0 / jnp.sqrt(fan_in)))

    return {
        # LayerNorms
        "lnq_g": jnp.ones((1, C), jnp.float32), "lnq_b": jnp.zeros((1, C), jnp.float32),
        "lnkv_g": jnp.ones((1, C), jnp.float32), "lnkv_b": jnp.zeros((1, C), jnp.float32),
        "ln2_g": jnp.ones((1, C), jnp.float32), "ln2_b": jnp.zeros((1, C), jnp.float32),
        # CrossAttention: to_q/to_k/to_v (no bias), to_out (bias); inner_dim == C
        "wq": lin(ks[0], C, C), "wk": lin(ks[1], C, C), "wv": lin(ks[2], C, C),
        "wo": lin(ks[3], C, C),
        "bo": jax.random.normal(ks[4], (1, C), jnp.float32) * 0.01,
        # MLP: fc1 (C -> C*ratio), GELU, fc2 (C*ratio -> C)
        "w1": lin(ks[5], C, H),
        "b1": jax.random.normal(ks[6], (1, H), jnp.float32) * 0.01,
        "w2": lin(ks[7], H, C),
        "b2": jnp.zeros((1, C), jnp.float32),
    }
    # TODO(synk): dropout layers are identity in eval mode (dropout=0.0), so omitted.


def reference(q, kv, p, num_heads, eps=1e-5):
    def ln(x, g, b):
        mu = x.mean(-1, keepdims=True)
        var = ((x - mu) ** 2).mean(-1, keepdims=True)
        return (x - mu) / jnp.sqrt(var + eps) * g + b

    B, Nq, C = q.shape
    dh = C // num_heads
    qn, kvn = ln(q, p["lnq_g"], p["lnq_b"]), ln(kv, p["lnkv_g"], p["lnkv_b"])
    qp, kp, vp = qn @ p["wq"], kvn @ p["wk"], kvn @ p["wv"]
    qh = qp.reshape(B, Nq, num_heads, dh).transpose(0, 2, 1, 3)
    kh = kp.reshape(B, -1, num_heads, dh).transpose(0, 2, 1, 3)
    vh = vp.reshape(B, -1, num_heads, dh).transpose(0, 2, 1, 3)
    sim = jnp.einsum("bhid,bhjd->bhij", qh, kh) * dh ** -0.5
    attn = jax.nn.softmax(sim, axis=-1)
    o = jnp.einsum("bhij,bhjd->bhid", attn, vh).transpose(0, 2, 1, 3).reshape(B, Nq, C)
    fx = o @ p["wo"] + p["bo"] + q
    m = jax.nn.gelu(ln(fx, p["ln2_g"], p["ln2_b"]) @ p["w1"] + p["b1"],
                    approximate=False) @ p["w2"] + p["b2"]
    return m + fx


if __name__ == "__main__":
    num_heads, mlp_ratio = 4, 4
    C = 64
    Nq, Nkv = 16, 8

    key = jax.random.PRNGKey(0)
    kq, kkv, kp = jax.random.split(key, 3)
    params = make_params(kp, C, mlp_ratio)

    for B in (2, 4):
        q = jax.random.normal(jax.random.fold_in(kq, B), (B, Nq, C), jnp.float32)
        kv = jax.random.normal(jax.random.fold_in(kkv, B), (B, Nkv, C), jnp.float32)

        out = cross_attention_block(q, kv, params, num_heads=num_heads)
        out = jax.block_until_ready(out)

        ref = reference(q, kv, params, num_heads)
        assert out.shape == (B, Nq, C)
        # bf16 I/O + bf16 matmul operands + tanh GELU + approx reciprocal
        # => looser tolerance vs. the f32 exact-GELU reference.
        assert jnp.allclose(out, ref, atol=5e-2, rtol=5e-2), f"mismatch vs ref (B={B})"

    print("KERNEL_OK")
</pallas_src>

<mosaic_0001>
module attributes {stable_mosaic.version = 11 : i64} {
  func.func @cross_attn_block_kernel(%arg0: i32, %arg1: memref<2x16x64xbf16, #tpu.memory_space<vmem>>, %arg2: memref<2x8x64xbf16, #tpu.memory_space<vmem>>, %arg3: memref<1x64xf32, #tpu.memory_space<vmem>>, %arg4: memref<1x64xf32, #tpu.memory_space<vmem>>, %arg5: memref<1x64xf32, #tpu.memory_space<vmem>>, %arg6: memref<1x64xf32, #tpu.memory_space<vmem>>, %arg7: memref<64x64xbf16, #tpu.memory_space<vmem>>, %arg8: memref<64x128xbf16, #tpu.memory_space<vmem>>, %arg9: memref<64x64xbf16, #tpu.memory_space<vmem>>, %arg10: memref<1x64xf32, #tpu.memory_space<vmem>>, %arg11: memref<1x64xf32, #tpu.memory_space<vmem>>, %arg12: memref<1x64xf32, #tpu.memory_space<vmem>>, %arg13: memref<64x256xbf16, #tpu.memory_space<vmem>>, %arg14: memref<1x256xf32, #tpu.memory_space<vmem>>, %arg15: memref<256x64xbf16, #tpu.memory_space<vmem>>, %arg16: memref<1x64xf32, #tpu.memory_space<vmem>>, %arg17: memref<2x16x64xf32, #tpu.memory_space<vmem>>) attributes {dimension_semantics = [#tpu.dimension_semantics<parallel>], iteration_bounds = array<i64: 1>, scalar_prefetch = 0 : i64, scratch_operands = 0 : i64, tpu.core_type = #tpu.core_type<tc>, window_params = [{transform_indices = @transform_0, window_bounds = array<i64: 2, 16, 64>}, {transform_indices = @transform_1, window_bounds = array<i64: 2, 8, 64>}, {pipeline_mode = #tpu.pipeline_mode<synchronous>, transform_indices = @transform_2, window_bounds = array<i64: 1, 64>}, {pipeline_mode = #tpu.pipeline_mode<synchronous>, transform_indices = @transform_3, window_bounds = array<i64: 1, 64>}, {pipeline_mode = #tpu.pipeline_mode<synchronous>, transform_indices = @transform_4, window_bounds = array<i64: 1, 64>}, {pipeline_mode = #tpu.pipeline_mode<synchronous>, transform_indices = @transform_5, window_bounds = array<i64: 1, 64>}, {pipeline_mode = #tpu.pipeline_mode<synchronous>, transform_indices = @transform_6, window_bounds = array<i64: 64, 64>}, {pipeline_mode = #tpu.pipeline_mode<synchronous>, transform_indices = @transform_7, window_bounds = array<i64: 64, 128>}, {pipeline_mode = #tpu.pipeline_mode<synchronous>, transform_indices = @transform_8, window_bounds = array<i64: 64, 64>}, {pipeline_mode = #tpu.pipeline_mode<synchronous>, transform_indices = @transform_9, window_bounds = array<i64: 1, 64>}, {pipeline_mode = #tpu.pipeline_mode<synchronous>, transform_indices = @transform_10, window_bounds = array<i64: 1, 64>}, {pipeline_mode = #tpu.pipeline_mode<synchronous>, transform_indices = @transform_11, window_bounds = array<i64: 1, 64>}, {pipeline_mode = #tpu.pipeline_mode<synchronous>, transform_indices = @transform_12, window_bounds = array<i64: 64, 256>}, {pipeline_mode = #tpu.pipeline_mode<synchronous>, transform_indices = @transform_13, window_bounds = array<i64: 1, 256>}, {pipeline_mode = #tpu.pipeline_mode<synchronous>, transform_indices = @transform_14, window_bounds = array<i64: 256, 64>}, {pipeline_mode = #tpu.pipeline_mode<synchronous>, transform_indices = @transform_15, window_bounds = array<i64: 1, 64>}, {transform_indices = @transform_16, window_bounds = array<i64: 2, 16, 64>}]} {
    %c0 = arith.constant 0 : index
    %c0_0 = arith.constant 0 : index
    %c0_1 = arith.constant 0 : index
    %0 = vector.load %arg1[%c0, %c0_0, %c0_1] : memref<2x16x64xbf16, #tpu.memory_space<vmem>>, vector<2x16x64xbf16>
    %1 = arith.extf %0 : vector<2x16x64xbf16> to vector<2x16x64xf32>
    %2 = vector.shape_cast %1 : vector<2x16x64xf32> to vector<32x64xf32>
    %c0_2 = arith.constant 0 : index
    %c0_3 = arith.constant 0 : index
    %c0_4 = arith.constant 0 : index
    %3 = vector.load %arg2[%c0_2, %c0_3, %c0_4] : memref<2x8x64xbf16, #tpu.memory_space<vmem>>, vector<2x8x64xbf16>
    %4 = arith.extf %3 : vector<2x8x64xbf16> to vector<2x8x64xf32>
    %5 = vector.shape_cast %4 : vector<2x8x64xf32> to vector<16x64xf32>
    %c0_5 = arith.constant 0 : index
    %c0_6 = arith.constant 0 : index
    %6 = vector.load %arg3[%c0_5, %c0_6] : memref<1x64xf32, #tpu.memory_space<vmem>>, vector<1x64xf32>
    %c0_7 = arith.constant 0 : index
    %c0_8 = arith.constant 0 : index
    %7 = vector.load %arg4[%c0_7, %c0_8] : memref<1x64xf32, #tpu.memory_space<vmem>>, vector<1x64xf32>
    %cst = arith.constant dense<0.000000e+00> : vector<32xf32>
    %8 = vector.multi_reduction <add>, %2, %cst [1] : vector<32x64xf32> to vector<32xf32>
    %9 = vector.shape_cast %8 : vector<32xf32> to vector<32x1xf32>
    %cst_9 = arith.constant 6.400000e+01 : f32
    %10 = vector.broadcast %cst_9 : f32 to vector<32x1xf32>
    %11 = arith.divf %9, %10 : vector<32x1xf32>
    %12 = arith.mulf %2, %2 : vector<32x64xf32>
    %cst_10 = arith.constant dense<0.000000e+00> : vector<32xf32>
    %13 = vector.multi_reduction <add>, %12, %cst_10 [1] : vector<32x64xf32> to vector<32xf32>
    %14 = vector.shape_cast %13 : vector<32xf32> to vector<32x1xf32>
    %cst_11 = arith.constant 6.400000e+01 : f32
    %15 = vector.broadcast %cst_11 : f32 to vector<32x1xf32>
    %16 = arith.divf %14, %15 : vector<32x1xf32>
    %17 = arith.mulf %11, %11 : vector<32x1xf32>
    %18 = arith.subf %16, %17 : vector<32x1xf32>
    %cst_12 = arith.constant 0.000000e+00 : f32
    %19 = vector.broadcast %cst_12 : f32 to vector<32x1xf32>
    %20 = arith.maximumf %18, %19 : vector<32x1xf32>
    %cst_13 = arith.constant 9.99999974E-6 : f32
    %21 = vector.broadcast %cst_13 : f32 to vector<32x1xf32>
    %22 = arith.addf %20, %21 : vector<32x1xf32>
    %23 = math.rsqrt %22 : vector<32x1xf32>
    %24 = vector.broadcast %11 : vector<32x1xf32> to vector<32x64xf32>
    %25 = arith.subf %2, %24 : vector<32x64xf32>
    %26 = vector.broadcast %23 : vector<32x1xf32> to vector<32x64xf32>
    %27 = arith.mulf %25, %26 : vector<32x64xf32>
    %28 = vector.broadcast %6 : vector<1x64xf32> to vector<32x64xf32>
    %29 = arith.mulf %27, %28 : vector<32x64xf32>
    %30 = vector.broadcast %7 : vector<1x64xf32> to vector<32x64xf32>
    %31 = arith.addf %29, %30 : vector<32x64xf32>
    %32 = arith.truncf %31 : vector<32x64xf32> to vector<32x64xbf16>
    %c0_14 = arith.constant 0 : index
    %c0_15 = arith.constant 0 : index
    %33 = vector.load %arg5[%c0_14, %c0_15] : memref<1x64xf32, #tpu.memory_space<vmem>>, vector<1x64xf32>
    %c0_16 = arith.constant 0 : index
    %c0_17 = arith.constant 0 : index
    %34 = vector.load %arg6[%c0_16, %c0_17] : memref<1x64xf32, #tpu.memory_space<vmem>>, vector<1x64xf32>
    %cst_18 = arith.constant dense<0.000000e+00> : vector<16xf32>
    %35 = vector.multi_reduction <add>, %5, %cst_18 [1] : vector<16x64xf32> to vector<16xf32>
    %36 = vector.shape_cast %35 : vector<16xf32> to vector<16x1xf32>
    %cst_19 = arith.constant 6.400000e+01 : f32
    %37 = vector.broadcast %cst_19 : f32 to vector<16x1xf32>
    %38 = arith.divf %36, %37 : vector<16x1xf32>
    %39 = arith.mulf %5, %5 : vector<16x64xf32>
    %cst_20 = arith.constant dense<0.000000e+00> : vector<16xf32>
    %40 = vector.multi_reduction <add>, %39, %cst_20 [1] : vector<16x64xf32> to vector<16xf32>
    %41 = vector.shape_cast %40 : vector<16xf32> to vector<16x1xf32>
    %cst_21 = arith.constant 6.400000e+01 : f32
    %42 = vector.broadcast %cst_21 : f32 to vector<16x1xf32>
    %43 = arith.divf %41, %42 : vector<16x1xf32>
    %44 = arith.mulf %38, %38 : vector<16x1xf32>
    %45 = arith.subf %43, %44 : vector<16x1xf32>
    %cst_22 = arith.constant 0.000000e+00 : f32
    %46 = vector.broadcast %cst_22 : f32 to vector<16x1xf32>
    %47 = arith.maximumf %45, %46 : vector<16x1xf32>
    %cst_23 = arith.constant 9.99999974E-6 : f32
    %48 = vector.broadcast %cst_23 : f32 to vector<16x1xf32>
    %49 = arith.addf %47, %48 : vector<16x1xf32>
    %50 = math.rsqrt %49 : vector<16x1xf32>
    %51 = vector.broadcast %38 : vector<16x1xf32> to vector<16x64xf32>
    %52 = arith.subf %5, %51 : vector<16x64xf32>
    %53 = vector.broadcast %50 : vector<16x1xf32> to vector<16x64xf32>
    %54 = arith.mulf %52, %53 : vector<16x64xf32>
    %55 = vector.broadcast %33 : vector<1x64xf32> to vector<16x64xf32>
    %56 = arith.mulf %54, %55 : vector<16x64xf32>
    %57 = vector.broadcast %34 : vector<1x64xf32> to vector<16x64xf32>
    %58 = arith.addf %56, %57 : vector<16x64xf32>
    %59 = arith.truncf %58 : vector<16x64xf32> to vector<16x64xbf16>
    %c0_24 = arith.constant 0 : index
    %c0_25 = arith.constant 0 : index
    %60 = vector.load %arg7[%c0_24, %c0_25] : memref<64x64xbf16, #tpu.memory_space<vmem>>, vector<64x64xbf16>
    %cst_26 = arith.constant dense<0.000000e+00> : vector<32x64xf32>
    %61 = tpu.matmul %32, %60, %cst_26 {dimension_numbers = #tpu.dot_dimension_numbers<[1], [0], [0], [1], [0, 0, 1, 1], [], []>} : vector<32x64xbf16>, vector<64x64xbf16>, vector<32x64xf32> -> vector<32x64xf32>
    %62 = arith.truncf %61 : vector<32x64xf32> to vector<32x64xbf16>
    %c0_27 = arith.constant 0 : index
    %c0_28 = arith.constant 0 : index
    %63 = vector.load %arg8[%c0_27, %c0_28] : memref<64x128xbf16, #tpu.memory_space<vmem>>, vector<64x128xbf16>
    %cst_29 = arith.constant dense<0.000000e+00> : vector<16x128xf32>
    %64 = tpu.matmul %59, %63, %cst_29 {dimension_numbers = #tpu.dot_dimension_numbers<[1], [0], [0], [1], [0, 0, 1, 1], [], []>} : vector<16x64xbf16>, vector<64x128xbf16>, vector<16x128xf32> -> vector<16x128xf32>
    %65 = arith.truncf %64 : vector<16x128xf32> to vector<16x128xbf16>
    %66 = vector.extract_strided_slice %65 {offsets = [0, 0], sizes = [16, 64], strides = [1, 1]} : vector<16x128xbf16> to vector<16x64xbf16>
    %67 = vector.extract_strided_slice %65 {offsets = [0, 64], sizes = [16, 64], strides = [1, 1]} : vector<16x128xbf16> to vector<16x64xbf16>
    %68 = vector.extract_strided_slice %62 {offsets = [0, 0], sizes = [32, 16], strides = [1, 1]} : vector<32x64xbf16> to vector<32x16xbf16>
    %69 = vector.shape_cast %68 : vector<32x16xbf16> to vector<2x16x16xbf16>
    %70 = vector.extract_strided_slice %66 {offsets = [0, 0], sizes = [16, 16], strides = [1, 1]} : vector<16x64xbf16> to vector<16x16xbf16>
    %71 = vector.shape_cast %70 : vector<16x16xbf16> to vector<2x8x16xbf16>
    %72 = vector.extract_strided_slice %67 {offsets = [0, 0], sizes = [16, 16], strides = [1, 1]} : vector<16x64xbf16> to vector<16x16xbf16>
    %73 = vector.shape_cast %72 : vector<16x16xbf16> to vector<2x8x16xbf16>
    "tpu.trace_start"() <{level = 10 : i32, message = "bqd,bkd->bqk"}> : () -> ()
    %cst_30 = arith.constant dense<0.000000e+00> : vector<2x16x8xf32>
    %74 = tpu.matmul %69, %71, %cst_30 {dimension_numbers = #tpu.dot_dimension_numbers<[2], [2], [1], [1], [0, 0, 0, 1, 1, 1], [0], [0]>} : vector<2x16x16xbf16>, vector<2x8x16xbf16>, vector<2x16x8xf32> -> vector<2x16x8xf32>
    "tpu.trace_stop"() : () -> ()
    %cst_31 = arith.constant dense<0xFF800000> : vector<2x16xf32>
    %75 = vector.multi_reduction <maximumf>, %74, %cst_31 [2] : vector<2x16x8xf32> to vector<2x16xf32>
    %76 = vector.shape_cast %75 : vector<2x16xf32> to vector<2x16x1xf32>
    %77 = vector.broadcast %76 : vector<2x16x1xf32> to vector<2x16x8xf32>
    %78 = arith.subf %74, %77 : vector<2x16x8xf32>
    %79 = math.exp %78 : vector<2x16x8xf32>
    %cst_32 = arith.constant dense<0.000000e+00> : vector<2x16xf32>
    %80 = vector.multi_reduction <add>, %79, %cst_32 [2] : vector<2x16x8xf32> to vector<2x16xf32>
    %81 = vector.shape_cast %80 : vector<2x16xf32> to vector<2x16x1xf32>
    %82 = tpu.reciprocal %81 {approx = true} : vector<2x16x1xf32> -> vector<2x16x1xf32>
    %83 = vector.broadcast %82 : vector<2x16x1xf32> to vector<2x16x8xf32>
    %84 = arith.mulf %79, %83 : vector<2x16x8xf32>
    %85 = arith.truncf %84 : vector<2x16x8xf32> to vector<2x16x8xbf16>
    "tpu.trace_start"() <{level = 10 : i32, message = "bqk,bkd->bqd"}> : () -> ()
    %cst_33 = arith.constant dense<0.000000e+00> : vector<2x16x16xf32>
    %86 = tpu.matmul %85, %73, %cst_33 {dimension_numbers = #tpu.dot_dimension_numbers<[2], [1], [1], [2], [0, 0, 0, 1, 1, 2], [0], [0]>} : vector<2x16x8xbf16>, vector<2x8x16xbf16>, vector<2x16x16xf32> -> vector<2x16x16xf32>
    "tpu.trace_stop"() : () -> ()
    %87 = arith.truncf %86 : vector<2x16x16xf32> to vector<2x16x16xbf16>
    %88 = vector.extract_strided_slice %62 {offsets = [0, 16], sizes = [32, 16], strides = [1, 1]} : vector<32x64xbf16> to vector<32x16xbf16>
    %89 = vector.shape_cast %88 : vector<32x16xbf16> to vector<2x16x16xbf16>
    %90 = vector.extract_strided_slice %66 {offsets = [0, 16], sizes = [16, 16], strides = [1, 1]} : vector<16x64xbf16> to vector<16x16xbf16>
    %91 = vector.shape_cast %90 : vector<16x16xbf16> to vector<2x8x16xbf16>
    %92 = vector.extract_strided_slice %67 {offsets = [0, 16], sizes = [16, 16], strides = [1, 1]} : vector<16x64xbf16> to vector<16x16xbf16>
    %93 = vector.shape_cast %92 : vector<16x16xbf16> to vector<2x8x16xbf16>
    "tpu.trace_start"() <{level = 10 : i32, message = "bqd,bkd->bqk"}> : () -> ()
    %cst_34 = arith.constant dense<0.000000e+00> : vector<2x16x8xf32>
    %94 = tpu.matmul %89, %91, %cst_34 {dimension_numbers = #tpu.dot_dimension_numbers<[2], [2], [1], [1], [0, 0, 0, 1, 1, 1], [0], [0]>} : vector<2x16x16xbf16>, vector<2x8x16xbf16>, vector<2x16x8xf32> -> vector<2x16x8xf32>
    "tpu.trace_stop"() : () -> ()
    %cst_35 = arith.constant dense<0xFF800000> : vector<2x16xf32>
    %95 = vector.multi_reduction <maximumf>, %94, %cst_35 [2] : vector<2x16x8xf32> to vector<2x16xf32>
    %96 = vector.shape_cast %95 : vector<2x16xf32> to vector<2x16x1xf32>
    %97 = vector.broadcast %96 : vector<2x16x1xf32> to vector<2x16x8xf32>
    %98 = arith.subf %94, %97 : vector<2x16x8xf32>
    %99 = math.exp %98 : vector<2x16x8xf32>
    %cst_36 = arith.constant dense<0.000000e+00> : vector<2x16xf32>
    %100 = vector.multi_reduction <add>, %99, %cst_36 [2] : vector<2x16x8xf32> to vector<2x16xf32>
    %101 = vector.shape_cast %100 : vector<2x16xf32> to vector<2x16x1xf32>
    %102 = tpu.reciprocal %101 {approx = true} : vector<2x16x1xf32> -> vector<2x16x1xf32>
    %103 = vector.broadcast %102 : vector<2x16x1xf32> to vector<2x16x8xf32>
    %104 = arith.mulf %99, %103 : vector<2x16x8xf32>
    %105 = arith.truncf %104 : vector<2x16x8xf32> to vector<2x16x8xbf16>
    "tpu.trace_start"() <{level = 10 : i32, message = "bqk,bkd->bqd"}> : () -> ()
    %cst_37 = arith.constant dense<0.000000e+00> : vector<2x16x16xf32>
    %106 = tpu.matmul %105, %93, %cst_37 {dimension_numbers = #tpu.dot_dimension_numbers<[2], [1], [1], [2], [0, 0, 0, 1, 1, 2], [0], [0]>} : vector<2x16x8xbf16>, vector<2x8x16xbf16>, vector<2x16x16xf32> -> vector<2x16x16xf32>
    "tpu.trace_stop"() : () -> ()
    %107 = arith.truncf %106 : vector<2x16x16xf32> to vector<2x16x16xbf16>
    %108 = vector.extract_strided_slice %62 {offsets = [0, 32], sizes = [32, 16], strides = [1, 1]} : vector<32x64xbf16> to vector<32x16xbf16>
    %109 = vector.shape_cast %108 : vector<32x16xbf16> to vector<2x16x16xbf16>
    %110 = vector.extract_strided_slice %66 {offsets = [0, 32], sizes = [16, 16], strides = [1, 1]} : vector<16x64xbf16> to vector<16x16xbf16>
    %111 = vector.shape_cast %110 : vector<16x16xbf16> to vector<2x8x16xbf16>
    %112 = vector.extract_strided_slice %67 {offsets = [0, 32], sizes = [16, 16], strides = [1, 1]} : vector<16x64xbf16> to vector<16x16xbf16>
    %113 = vector.shape_cast %112 : vector<16x16xbf16> to vector<2x8x16xbf16>
    "tpu.trace_start"() <{level = 10 : i32, message = "bqd,bkd->bqk"}> : () -> ()
    %cst_38 = arith.constant dense<0.000000e+00> : vector<2x16x8xf32>
    %114 = tpu.matmul %109, %111, %cst_38 {dimension_numbers = #tpu.dot_dimension_numbers<[2], [2], [1], [1], [0, 0, 0, 1, 1, 1], [0], [0]>} : vector<2x16x16xbf16>, vector<2x8x16xbf16>, vector<2x16x8xf32> -> vector<2x16x8xf32>
    "tpu.trace_stop"() : () -> ()
    %cst_39 = arith.constant dense<0xFF800000> : vector<2x16xf32>
    %115 = vector.multi_reduction <maximumf>, %114, %cst_39 [2] : vector<2x16x8xf32> to vector<2x16xf32>
    %116 = vector.shape_cast %115 : vector<2x16xf32> to vector<2x16x1xf32>
    %117 = vector.broadcast %116 : vector<2x16x1xf32> to vector<2x16x8xf32>
    %118 = arith.subf %114, %117 : vector<2x16x8xf32>
    %119 = math.exp %118 : vector<2x16x8xf32>
    %cst_40 = arith.constant dense<0.000000e+00> : vector<2x16xf32>
    %120 = vector.multi_reduction <add>, %119, %cst_40 [2] : vector<2x16x8xf32> to vector<2x16xf32>
    %121 = vector.shape_cast %120 : vector<2x16xf32> to vector<2x16x1xf32>
    %122 = tpu.reciprocal %121 {approx = true} : vector<2x16x1xf32> -> vector<2x16x1xf32>
    %123 = vector.broadcast %122 : vector<2x16x1xf32> to vector<2x16x8xf32>
    %124 = arith.mulf %119, %123 : vector<2x16x8xf32>
    %125 = arith.truncf %124 : vector<2x16x8xf32> to vector<2x16x8xbf16>
    "tpu.trace_start"() <{level = 10 : i32, message = "bqk,bkd->bqd"}> : () -> ()
    %cst_41 = arith.constant dense<0.000000e+00> : vector<2x16x16xf32>
    %126 = tpu.matmul %125, %113, %cst_41 {dimension_numbers = #tpu.dot_dimension_numbers<[2], [1], [1], [2], [0, 0, 0, 1, 1, 2], [0], [0]>} : vector<2x16x8xbf16>, vector<2x8x16xbf16>, vector<2x16x16xf32> -> vector<2x16x16xf32>
    "tpu.trace_stop"() : () -> ()
    %127 = arith.truncf %126 : vector<2x16x16xf32> to vector<2x16x16xbf16>
    %128 = vector.extract_strided_slice %62 {offsets = [0, 48], sizes = [32, 16], strides = [1, 1]} : vector<32x64xbf16> to vector<32x16xbf16>
    %129 = vector.shape_cast %128 : vector<32x16xbf16> to vector<2x16x16xbf16>
    %130 = vector.extract_strided_slice %66 {offsets = [0, 48], sizes = [16, 16], strides = [1, 1]} : vector<16x64xbf16> to vector<16x16xbf16>
    %131 = vector.shape_cast %130 : vector<16x16xbf16> to vector<2x8x16xbf16>
    %132 = vector.extract_strided_slice %67 {offsets = [0, 48], sizes = [16, 16], strides = [1, 1]} : vector<16x64xbf16> to vector<16x16xbf16>
    %133 = vector.shape_cast %132 : vector<16x16xbf16> to vector<2x8x16xbf16>
    "tpu.trace_start"() <{level = 10 : i32, message = "bqd,bkd->bqk"}> : () -> ()
    %cst_42 = arith.constant dense<0.000000e+00> : vector<2x16x8xf32>
    %134 = tpu.matmul %129, %131, %cst_42 {dimension_numbers = #tpu.dot_dimension_numbers<[2], [2], [1], [1], [0, 0, 0, 1, 1, 1], [0], [0]>} : vector<2x16x16xbf16>, vector<2x8x16xbf16>, vector<2x16x8xf32> -> vector<2x16x8xf32>
    "tpu.trace_stop"() : () -> ()
    %cst_43 = arith.constant dense<0xFF800000> : vector<2x16xf32>
    %135 = vector.multi_reduction <maximumf>, %134, %cst_43 [2] : vector<2x16x8xf32> to vector<2x16xf32>
    %136 = vector.shape_cast %135 : vector<2x16xf32> to vector<2x16x1xf32>
    %137 = vector.broadcast %136 : vector<2x16x1xf32> to vector<2x16x8xf32>
    %138 = arith.subf %134, %137 : vector<2x16x8xf32>
    %139 = math.exp %138 : vector<2x16x8xf32>
    %cst_44 = arith.constant dense<0.000000e+00> : vector<2x16xf32>
    %140 = vector.multi_reduction <add>, %139, %cst_44 [2] : vector<2x16x8xf32> to vector<2x16xf32>
    %141 = vector.shape_cast %140 : vector<2x16xf32> to vector<2x16x1xf32>
    %142 = tpu.reciprocal %141 {approx = true} : vector<2x16x1xf32> -> vector<2x16x1xf32>
    %143 = vector.broadcast %142 : vector<2x16x1xf32> to vector<2x16x8xf32>
    %144 = arith.mulf %139, %143 : vector<2x16x8xf32>
    %145 = arith.truncf %144 : vector<2x16x8xf32> to vector<2x16x8xbf16>
    "tpu.trace_start"() <{level = 10 : i32, message = "bqk,bkd->bqd"}> : () -> ()
    %cst_45 = arith.constant dense<0.000000e+00> : vector<2x16x16xf32>
    %146 = tpu.matmul %145, %133, %cst_45 {dimension_numbers = #tpu.dot_dimension_numbers<[2], [1], [1], [2], [0, 0, 0, 1, 1, 2], [0], [0]>} : vector<2x16x8xbf16>, vector<2x8x16xbf16>, vector<2x16x16xf32> -> vector<2x16x16xf32>
    "tpu.trace_stop"() : () -> ()
    %147 = arith.truncf %146 : vector<2x16x16xf32> to vector<2x16x16xbf16>
    %148 = tpu.concatenate %87, %107, %127, %147 in 2 : vector<2x16x16xbf16>, vector<2x16x16xbf16>, vector<2x16x16xbf16>, vector<2x16x16xbf16> -> vector<2x16x64xbf16>
    %149 = vector.shape_cast %148 : vector<2x16x64xbf16> to vector<32x64xbf16>
    %c0_46 = arith.constant 0 : index
    %c0_47 = arith.constant 0 : index
    %150 = vector.load %arg9[%c0_46, %c0_47] : memref<64x64xbf16, #tpu.memory_space<vmem>>, vector<64x64xbf16>
    %cst_48 = arith.constant dense<0.000000e+00> : vector<32x64xf32>
    %151 = tpu.matmul %149, %150, %cst_48 {dimension_numbers = #tpu.dot_dimension_numbers<[1], [0], [0], [1], [0, 0, 1, 1], [], []>} : vector<32x64xbf16>, vector<64x64xbf16>, vector<32x64xf32> -> vector<32x64xf32>
    %c0_49 = arith.constant 0 : index
    %c0_50 = arith.constant 0 : index
    %152 = vector.load %arg10[%c0_49, %c0_50] : memref<1x64xf32, #tpu.memory_space<vmem>>, vector<1x64xf32>
    %153 = vector.broadcast %152 : vector<1x64xf32> to vector<32x64xf32>
    %154 = arith.addf %151, %153 : vector<32x64xf32>
    %155 = arith.addf %154, %2 : vector<32x64xf32>
    %c0_51 = arith.constant 0 : index
    %c0_52 = arith.constant 0 : index
    %156 = vector.load %arg11[%c0_51, %c0_52] : memref<1x64xf32, #tpu.memory_space<vmem>>, vector<1x64xf32>
    %c0_53 = arith.constant 0 : index
    %c0_54 = arith.constant 0 : index
    %157 = vector.load %arg12[%c0_53, %c0_54] : memref<1x64xf32, #tpu.memory_space<vmem>>, vector<1x64xf32>
    %cst_55 = arith.constant dense<0.000000e+00> : vector<32xf32>
    %158 = vector.multi_reduction <add>, %155, %cst_55 [1] : vector<32x64xf32> to vector<32xf32>
    %159 = vector.shape_cast %158 : vector<32xf32> to vector<32x1xf32>
    %cst_56 = arith.constant 6.400000e+01 : f32
    %160 = vector.broadcast %cst_56 : f32 to vector<32x1xf32>
    %161 = arith.divf %159, %160 : vector<32x1xf32>
    %162 = arith.mulf %155, %155 : vector<32x64xf32>
    %cst_57 = arith.constant dense<0.000000e+00> : vector<32xf32>
    %163 = vector.multi_reduction <add>, %162, %cst_57 [1] : vector<32x64xf32> to vector<32xf32>
    %164 = vector.shape_cast %163 : vector<32xf32> to vector<32x1xf32>
    %cst_58 = arith.constant 6.400000e+01 : f32
    %165 = vector.broadcast %cst_58 : f32 to vector<32x1xf32>
    %166 = arith.divf %164, %165 : vector<32x1xf32>
    %167 = arith.mulf %161, %161 : vector<32x1xf32>
    %168 = arith.subf %166, %167 : vector<32x1xf32>
    %cst_59 = arith.constant 0.000000e+00 : f32
    %169 = vector.broadcast %cst_59 : f32 to vector<32x1xf32>
    %170 = arith.maximumf %168, %169 : vector<32x1xf32>
    %cst_60 = arith.constant 9.99999974E-6 : f32
    %171 = vector.broadcast %cst_60 : f32 to vector<32x1xf32>
    %172 = arith.addf %170, %171 : vector<32x1xf32>
    %173 = math.rsqrt %172 : vector<32x1xf32>
    %174 = vector.broadcast %161 : vector<32x1xf32> to vector<32x64xf32>
    %175 = arith.subf %155, %174 : vector<32x64xf32>
    %176 = vector.broadcast %173 : vector<32x1xf32> to vector<32x64xf32>
    %177 = arith.mulf %175, %176 : vector<32x64xf32>
    %178 = vector.broadcast %156 : vector<1x64xf32> to vector<32x64xf32>
    %179 = arith.mulf %177, %178 : vector<32x64xf32>
    %180 = vector.broadcast %157 : vector<1x64xf32> to vector<32x64xf32>
    %181 = arith.addf %179, %180 : vector<32x64xf32>
    %182 = arith.truncf %181 : vector<32x64xf32> to vector<32x64xbf16>
    %c0_61 = arith.constant 0 : index
    %c0_62 = arith.constant 0 : index
    %183 = vector.load %arg13[%c0_61, %c0_62] : memref<64x256xbf16, #tpu.memory_space<vmem>>, vector<64x256xbf16>
    %cst_63 = arith.constant dense<0.000000e+00> : vector<32x256xf32>
    %184 = tpu.matmul %182, %183, %cst_63 {dimension_numbers = #tpu.dot_dimension_numbers<[1], [0], [0], [1], [0, 0, 1, 1], [], []>} : vector<32x64xbf16>, vector<64x256xbf16>, vector<32x256xf32> -> vector<32x256xf32>
    %c0_64 = arith.constant 0 : index
    %c0_65 = arith.constant 0 : index
    %185 = vector.load %arg14[%c0_64, %c0_65] : memref<1x256xf32, #tpu.memory_space<vmem>>, vector<1x256xf32>
    %186 = vector.broadcast %185 : vector<1x256xf32> to vector<32x256xf32>
    %187 = arith.addf %184, %186 : vector<32x256xf32>
    %188 = arith.mulf %187, %187 : vector<32x256xf32>
    %189 = arith.mulf %187, %188 : vector<32x256xf32>
    %cst_66 = arith.constant 4.471500e-02 : f32
    %190 = vector.broadcast %cst_66 : f32 to vector<32x256xf32>
    %191 = arith.mulf %190, %189 : vector<32x256xf32>
    %192 = arith.addf %187, %191 : vector<32x256xf32>
    %cst_67 = arith.constant 0.797884583 : f32
    %193 = vector.broadcast %cst_67 : f32 to vector<32x256xf32>
    %194 = arith.mulf %193, %192 : vector<32x256xf32>
    %195 = math.tanh %194 : vector<32x256xf32>
    %cst_68 = arith.constant 1.000000e+00 : f32
    %196 = vector.broadcast %cst_68 : f32 to vector<32x256xf32>
    %197 = arith.addf %196, %195 : vector<32x256xf32>
    %cst_69 = arith.constant 5.000000e-01 : f32
    %198 = vector.broadcast %cst_69 : f32 to vector<32x256xf32>
    %199 = arith.mulf %198, %197 : vector<32x256xf32>
    %200 = arith.mulf %187, %199 : vector<32x256xf32>
    %201 = arith.truncf %200 : vector<32x256xf32> to vector<32x256xbf16>
    %c0_70 = arith.constant 0 : index
    %c0_71 = arith.constant 0 : index
    %202 = vector.load %arg15[%c0_70, %c0_71] : memref<256x64xbf16, #tpu.memory_space<vmem>>, vector<256x64xbf16>
    %cst_72 = arith.constant dense<0.000000e+00> : vector<32x64xf32>
    %203 = tpu.matmul %201, %202, %cst_72 {dimension_numbers = #tpu.dot_dimension_numbers<[1], [0], [0], [1], [0, 0, 1, 1], [], []>} : vector<32x256xbf16>, vector<256x64xbf16>, vector<32x64xf32> -> vector<32x64xf32>
    %c0_73 = arith.constant 0 : index
    %c0_74 = arith.constant 0 : index
    %204 = vector.load %arg16[%c0_73, %c0_74] : memref<1x64xf32, #tpu.memory_space<vmem>>, vector<1x64xf32>
    %205 = vector.broadcast %204 : vector<1x64xf32> to vector<32x64xf32>
    %206 = arith.addf %203, %205 : vector<32x64xf32>
    %207 = arith.addf %206, %155 : vector<32x64xf32>
    %208 = vector.shape_cast %207 : vector<32x64xf32> to vector<2x16x64xf32>
    %c0_75 = arith.constant 0 : index
    %c0_76 = arith.constant 0 : index
    %c0_77 = arith.constant 0 : index
    %209 = vector.load %arg17[%c0_75, %c0_76, %c0_77] : memref<2x16x64xf32, #tpu.memory_space<vmem>>, vector<2x16x64xf32>
    tpu.vector_store %arg17[%c0_75, %c0_76, %c0_77], %208 {strides = array<i32>} : memref<2x16x64xf32, #tpu.memory_space<vmem>>, vector<2x16x64xf32>,
    return
  }
  func.func @transform_0(%arg0: i32) -> (i32, i32, i32) {
    %c0_i32 = arith.constant 0 : i32
    %c0_i32_0 = arith.constant 0 : i32
    %c0_i32_1 = arith.constant 0 : i32
    return %arg0, %c0_i32, %c0_i32_0 : i32, i32, i32
  }
  func.func @transform_1(%arg0: i32) -> (i32, i32, i32) {
    %c0_i32 = arith.constant 0 : i32
    %c0_i32_0 = arith.constant 0 : i32
    %c0_i32_1 = arith.constant 0 : i32
    return %arg0, %c0_i32, %c0_i32_0 : i32, i32, i32
  }
  func.func @transform_2(%arg0: i32) -> (i32, i32) {
    %c0_i32 = arith.constant 0 : i32
    %c0_i32_0 = arith.constant 0 : i32
    %c0_i32_1 = arith.constant 0 : i32
    return %c0_i32, %c0_i32_0 : i32, i32
  }
  func.func @transform_3(%arg0: i32) -> (i32, i32) {
    %c0_i32 = arith.constant 0 : i32
    %c0_i32_0 = arith.constant 0 : i32
    %c0_i32_1 = arith.constant 0 : i32
    return %c0_i32, %c0_i32_0 : i32, i32
  }
  func.func @transform_4(%arg0: i32) -> (i32, i32) {
    %c0_i32 = arith.constant 0 : i32
    %c0_i32_0 = arith.constant 0 : i32
    %c0_i32_1 = arith.constant 0 : i32
    return %c0_i32, %c0_i32_0 : i32, i32
  }
  func.func @transform_5(%arg0: i32) -> (i32, i32) {
    %c0_i32 = arith.constant 0 : i32
    %c0_i32_0 = arith.constant 0 : i32
    %c0_i32_1 = arith.constant 0 : i32
    return %c0_i32, %c0_i32_0 : i32, i32
  }
  func.func @transform_6(%arg0: i32) -> (i32, i32) {
    %c0_i32 = arith.constant 0 : i32
    %c0_i32_0 = arith.constant 0 : i32
    %c0_i32_1 = arith.constant 0 : i32
    return %c0_i32, %c0_i32_0 : i32, i32
  }
  func.func @transform_7(%arg0: i32) -> (i32, i32) {
    %c0_i32 = arith.constant 0 : i32
    %c0_i32_0 = arith.constant 0 : i32
    %c0_i32_1 = arith.constant 0 : i32
    return %c0_i32, %c0_i32_0 : i32, i32
  }
  func.func @transform_8(%arg0: i32) -> (i32, i32) {
    %c0_i32 = arith.constant 0 : i32
    %c0_i32_0 = arith.constant 0 : i32
    %c0_i32_1 = arith.constant 0 : i32
    return %c0_i32, %c0_i32_0 : i32, i32
  }
  func.func @transform_9(%arg0: i32) -> (i32, i32) {
    %c0_i32 = arith.constant 0 : i32
    %c0_i32_0 = arith.constant 0 : i32
    %c0_i32_1 = arith.constant 0 : i32
    return %c0_i32, %c0_i32_0 : i32, i32
  }
  func.func @transform_10(%arg0: i32) -> (i32, i32) {
    %c0_i32 = arith.constant 0 : i32
    %c0_i32_0 = arith.constant 0 : i32
    %c0_i32_1 = arith.constant 0 : i32
    return %c0_i32, %c0_i32_0 : i32, i32
  }
  func.func @transform_11(%arg0: i32) -> (i32, i32) {
    %c0_i32 = arith.constant 0 : i32
    %c0_i32_0 = arith.constant 0 : i32
    %c0_i32_1 = arith.constant 0 : i32
    return %c0_i32, %c0_i32_0 : i32, i32
  }
  func.func @transform_12(%arg0: i32) -> (i32, i32) {
    %c0_i32 = arith.constant 0 : i32
    %c0_i32_0 = arith.constant 0 : i32
    %c0_i32_1 = arith.constant 0 : i32
    return %c0_i32, %c0_i32_0 : i32, i32
  }
  func.func @transform_13(%arg0: i32) -> (i32, i32) {
    %c0_i32 = arith.constant 0 : i32
    %c0_i32_0 = arith.constant 0 : i32
    %c0_i32_1 = arith.constant 0 : i32
    return %c0_i32, %c0_i32_0 : i32, i32
  }
  func.func @transform_14(%arg0: i32) -> (i32, i32) {
    %c0_i32 = arith.constant 0 : i32
    %c0_i32_0 = arith.constant 0 : i32
    %c0_i32_1 = arith.constant 0 : i32
    return %c0_i32, %c0_i32_0 : i32, i32
  }
  func.func @transform_15(%arg0: i32) -> (i32, i32) {
    %c0_i32 = arith.constant 0 : i32
    %c0_i32_0 = arith.constant 0 : i32
    %c0_i32_1 = arith.constant 0 : i32
    return %c0_i32, %c0_i32_0 : i32, i32
  }
  func.func @transform_16(%arg0: i32) -> (i32, i32, i32) {
    %c0_i32 = arith.constant 0 : i32
    %c0_i32_0 = arith.constant 0 : i32
    %c0_i32_1 = arith.constant 0 : i32
    return %arg0, %c0_i32, %c0_i32_0 : i32, i32, i32
  }
}

module attributes {stable_mosaic.version = 11 : i64} {
  func.func @cross_attn_block_kernel(%arg0: i32, %arg1: memref<2x16x64xbf16, #tpu.memory_space<vmem>>, %arg2: memref<2x8x64xbf16, #tpu.memory_space<vmem>>, %arg3: memref<1x64xf32, #tpu.memory_space<vmem>>, %arg4: memref<1x64xf32, #tpu.memory_space<vmem>>, %arg5: memref<1x64xf32, #tpu.memory_space<vmem>>, %arg6: memref<1x64xf32, #tpu.memory_space<vmem>>, %arg7: memref<64x64xbf16, #tpu.memory_space<vmem>>, %arg8: memref<64x128xbf16, #tpu.memory_space<vmem>>, %arg9: memref<64x64xbf16, #tpu.memory_space<vmem>>, %arg10: memref<1x64xf32, #tpu.memory_space<vmem>>, %arg11: memref<1x64xf32, #tpu.memory_space<vmem>>, %arg12: memref<1x64xf32, #tpu.memory_space<vmem>>, %arg13: memref<64x256xbf16, #tpu.memory_space<vmem>>, %arg14: memref<1x256xf32, #tpu.memory_space<vmem>>, %arg15: memref<256x64xbf16, #tpu.memory_space<vmem>>, %arg16: memref<1x64xf32, #tpu.memory_space<vmem>>, %arg17: memref<2x16x64xf32, #tpu.memory_space<vmem>>) attributes {dimension_semantics = [#tpu.dimension_semantics<parallel>], iteration_bounds = array<i64: 1>, scalar_prefetch = 0 : i64, scratch_operands = 0 : i64, tpu.core_type = #tpu.core_type<tc>, window_params = [{transform_indices = @transform_0, window_bounds = array<i64: 2, 16, 64>}, {transform_indices = @transform_1, window_bounds = array<i64: 2, 8, 64>}, {pipeline_mode = #tpu.pipeline_mode<synchronous>, transform_indices = @transform_2, window_bounds = array<i64: 1, 64>}, {pipeline_mode = #tpu.pipeline_mode<synchronous>, transform_indices = @transform_3, window_bounds = array<i64: 1, 64>}, {pipeline_mode = #tpu.pipeline_mode<synchronous>, transform_indices = @transform_4, window_bounds = array<i64: 1, 64>}, {pipeline_mode = #tpu.pipeline_mode<synchronous>, transform_indices = @transform_5, window_bounds = array<i64: 1, 64>}, {pipeline_mode = #tpu.pipeline_mode<synchronous>, transform_indices = @transform_6, window_bounds = array<i64: 64, 64>}, {pipeline_mode = #tpu.pipeline_mode<synchronous>, transform_indices = @transform_7, window_bounds = array<i64: 64, 128>}, {pipeline_mode = #tpu.pipeline_mode<synchronous>, transform_indices = @transform_8, window_bounds = array<i64: 64, 64>}, {pipeline_mode = #tpu.pipeline_mode<synchronous>, transform_indices = @transform_9, window_bounds = array<i64: 1, 64>}, {pipeline_mode = #tpu.pipeline_mode<synchronous>, transform_indices = @transform_10, window_bounds = array<i64: 1, 64>}, {pipeline_mode = #tpu.pipeline_mode<synchronous>, transform_indices = @transform_11, window_bounds = array<i64: 1, 64>}, {pipeline_mode = #tpu.pipeline_mode<synchronous>, transform_indices = @transform_12, window_bounds = array<i64: 64, 256>}, {pipeline_mode = #tpu.pipeline_mode<synchronous>, transform_indices = @transform_13, window_bounds = array<i64: 1, 256>}, {pipeline_mode = #tpu.pipeline_mode<synchronous>, transform_indices = @transform_14, window_bounds = array<i64: 256, 64>}, {pipeline_mode = #tpu.pipeline_mode<synchronous>, transform_indices = @transform_15, window_bounds = array<i64: 1, 64>}, {transform_indices = @transform_16, window_bounds = array<i64: 2, 16, 64>}]} {
    %c0 = arith.constant 0 : index
    %c0_0 = arith.constant 0 : index
    %c0_1 = arith.constant 0 : index
    %0 = vector.load %arg1[%c0, %c0_0, %c0_1] : memref<2x16x64xbf16, #tpu.memory_space<vmem>>, vector<2x16x64xbf16>
    %1 = arith.extf %0 : vector<2x16x64xbf16> to vector<2x16x64xf32>
    %2 = vector.shape_cast %1 : vector<2x16x64xf32> to vector<32x64xf32>
    %c0_2 = arith.constant 0 : index
    %c0_3 = arith.constant 0 : index
    %c0_4 = arith.constant 0 : index
    %3 = vector.load %arg2[%c0_2, %c0_3, %c0_4] : memref<2x8x64xbf16, #tpu.memory_space<vmem>>, vector<2x8x64xbf16>
    %4 = arith.extf %3 : vector<2x8x64xbf16> to vector<2x8x64xf32>
    %5 = vector.shape_cast %4 : vector<2x8x64xf32> to vector<16x64xf32>
    %c0_5 = arith.constant 0 : index
    %c0_6 = arith.constant 0 : index
    %6 = vector.load %arg3[%c0_5, %c0_6] : memref<1x64xf32, #tpu.memory_space<vmem>>, vector<1x64xf32>
    %c0_7 = arith.constant 0 : index
    %c0_8 = arith.constant 0 : index
    %7 = vector.load %arg4[%c0_7, %c0_8] : memref<1x64xf32, #tpu.memory_space<vmem>>, vector<1x64xf32>
    %cst = arith.constant dense<0.000000e+00> : vector<32xf32>
    %8 = vector.multi_reduction <add>, %2, %cst [1] : vector<32x64xf32> to vector<32xf32>
    %9 = vector.shape_cast %8 : vector<32xf32> to vector<32x1xf32>
    %cst_9 = arith.constant 6.400000e+01 : f32
    %10 = vector.broadcast %cst_9 : f32 to vector<32x1xf32>
    %11 = arith.divf %9, %10 : vector<32x1xf32>
    %12 = arith.mulf %2, %2 : vector<32x64xf32>
    %cst_10 = arith.constant dense<0.000000e+00> : vector<32xf32>
    %13 = vector.multi_reduction <add>, %12, %cst_10 [1] : vector<32x64xf32> to vector<32xf32>
    %14 = vector.shape_cast %13 : vector<32xf32> to vector<32x1xf32>
    %cst_11 = arith.constant 6.400000e+01 : f32
    %15 = vector.broadcast %cst_11 : f32 to vector<32x1xf32>
    %16 = arith.divf %14, %15 : vector<32x1xf32>
    %17 = arith.mulf %11, %11 : vector<32x1xf32>
    %18 = arith.subf %16, %17 : vector<32x1xf32>
    %cst_12 = arith.constant 0.000000e+00 : f32
    %19 = vector.broadcast %cst_12 : f32 to vector<32x1xf32>
    %20 = arith.maximumf %18, %19 : vector<32x1xf32>
    %cst_13 = arith.constant 9.99999974E-6 : f32
    %21 = vector.broadcast %cst_13 : f32 to vector<32x1xf32>
    %22 = arith.addf %20, %21 : vector<32x1xf32>
    %23 = math.rsqrt %22 : vector<32x1xf32>
    %24 = vector.broadcast %11 : vector<32x1xf32> to vector<32x64xf32>
    %25 = arith.subf %2, %24 : vector<32x64xf32>
    %26 = vector.broadcast %23 : vector<32x1xf32> to vector<32x64xf32>
    %27 = arith.mulf %25, %26 : vector<32x64xf32>
    %28 = vector.broadcast %6 : vector<1x64xf32> to vector<32x64xf32>
    %29 = arith.mulf %27, %28 : vector<32x64xf32>
    %30 = vector.broadcast %7 : vector<1x64xf32> to vector<32x64xf32>
    %31 = arith.addf %29, %30 : vector<32x64xf32>
    %32 = arith.truncf %31 : vector<32x64xf32> to vector<32x64xbf16>
    %c0_14 = arith.constant 0 : index
    %c0_15 = arith.constant 0 : index
    %33 = vector.load %arg5[%c0_14, %c0_15] : memref<1x64xf32, #tpu.memory_space<vmem>>, vector<1x64xf32>
    %c0_16 = arith.constant 0 : index
    %c0_17 = arith.constant 0 : index
    %34 = vector.load %arg6[%c0_16, %c0_17] : memref<1x64xf32, #tpu.memory_space<vmem>>, vector<1x64xf32>
    %cst_18 = arith.constant dense<0.000000e+00> : vector<16xf32>
    %35 = vector.multi_reduction <add>, %5, %cst_18 [1] : vector<16x64xf32> to vector<16xf32>
    %36 = vector.shape_cast %35 : vector<16xf32> to vector<16x1xf32>
    %cst_19 = arith.constant 6.400000e+01 : f32
    %37 = vector.broadcast %cst_19 : f32 to vector<16x1xf32>
    %38 = arith.divf %36, %37 : vector<16x1xf32>
    %39 = arith.mulf %5, %5 : vector<16x64xf32>
    %cst_20 = arith.constant dense<0.000000e+00> : vector<16xf32>
    %40 = vector.multi_reduction <add>, %39, %cst_20 [1] : vector<16x64xf32> to vector<16xf32>
    %41 = vector.shape_cast %40 : vector<16xf32> to vector<16x1xf32>
    %cst_21 = arith.constant 6.400000e+01 : f32
    %42 = vector.broadcast %cst_21 : f32 to vector<16x1xf32>
    %43 = arith.divf %41, %42 : vector<16x1xf32>
    %44 = arith.mulf %38, %38 : vector<16x1xf32>
    %45 = arith.subf %43, %44 : vector<16x1xf32>
    %cst_22 = arith.constant 0.000000e+00 : f32
    %46 = vector.broadcast %cst_22 : f32 to vector<16x1xf32>
    %47 = arith.maximumf %45, %46 : vector<16x1xf32>
    %cst_23 = arith.constant 9.99999974E-6 : f32
    %48 = vector.broadcast %cst_23 : f32 to vector<16x1xf32>
    %49 = arith.addf %47, %48 : vector<16x1xf32>
    %50 = math.rsqrt %49 : vector<16x1xf32>
    %51 = vector.broadcast %38 : vector<16x1xf32> to vector<16x64xf32>
    %52 = arith.subf %5, %51 : vector<16x64xf32>
    %53 = vector.broadcast %50 : vector<16x1xf32> to vector<16x64xf32>
    %54 = arith.mulf %52, %53 : vector<16x64xf32>
    %55 = vector.broadcast %33 : vector<1x64xf32> to vector<16x64xf32>
    %56 = arith.mulf %54, %55 : vector<16x64xf32>
    %57 = vector.broadcast %34 : vector<1x64xf32> to vector<16x64xf32>
    %58 = arith.addf %56, %57 : vector<16x64xf32>
    %59 = arith.truncf %58 : vector<16x64xf32> to vector<16x64xbf16>
    %c0_24 = arith.constant 0 : index
    %c0_25 = arith.constant 0 : index
    %60 = vector.load %arg7[%c0_24, %c0_25] : memref<64x64xbf16, #tpu.memory_space<vmem>>, vector<64x64xbf16>
    %cst_26 = arith.constant dense<0.000000e+00> : vector<32x64xf32>
    %61 = tpu.matmul %32, %60, %cst_26 {dimension_numbers = #tpu.dot_dimension_numbers<[1], [0], [0], [1], [0, 0, 1, 1], [], []>} : vector<32x64xbf16>, vector<64x64xbf16>, vector<32x64xf32> -> vector<32x64xf32>
    %62 = arith.truncf %61 : vector<32x64xf32> to vector<32x64xbf16>
    %c0_27 = arith.constant 0 : index
    %c0_28 = arith.constant 0 : index
    %63 = vector.load %arg8[%c0_27, %c0_28] : memref<64x128xbf16, #tpu.memory_space<vmem>>, vector<64x128xbf16>
    %cst_29 = arith.constant dense<0.000000e+00> : vector<16x128xf32>
    %64 = tpu.matmul %59, %63, %cst_29 {dimension_numbers = #tpu.dot_dimension_numbers<[1], [0], [0], [1], [0, 0, 1, 1], [], []>} : vector<16x64xbf16>, vector<64x128xbf16>, vector<16x128xf32> -> vector<16x128xf32>
    %65 = arith.truncf %64 : vector<16x128xf32> to vector<16x128xbf16>
    %66 = vector.extract_strided_slice %65 {offsets = [0, 0], sizes = [16, 64], strides = [1, 1]} : vector<16x128xbf16> to vector<16x64xbf16>
    %67 = vector.extract_strided_slice %65 {offsets = [0, 64], sizes = [16, 64], strides = [1, 1]} : vector<16x128xbf16> to vector<16x64xbf16>
    %68 = vector.extract_strided_slice %62 {offsets = [0, 0], sizes = [32, 16], strides = [1, 1]} : vector<32x64xbf16> to vector<32x16xbf16>
    %69 = vector.shape_cast %68 : vector<32x16xbf16> to vector<2x16x16xbf16>
    %70 = vector.extract_strided_slice %66 {offsets = [0, 0], sizes = [16, 16], strides = [1, 1]} : vector<16x64xbf16> to vector<16x16xbf16>
    %71 = vector.shape_cast %70 : vector<16x16xbf16> to vector<2x8x16xbf16>
    %72 = vector.extract_strided_slice %67 {offsets = [0, 0], sizes = [16, 16], strides = [1, 1]} : vector<16x64xbf16> to vector<16x16xbf16>
    %73 = vector.shape_cast %72 : vector<16x16xbf16> to vector<2x8x16xbf16>
    "tpu.trace_start"() <{level = 10 : i32, message = "bqd,bkd->bqk"}> : () -> ()
    %cst_30 = arith.constant dense<0.000000e+00> : vector<2x16x8xf32>
    %74 = tpu.matmul %69, %71, %cst_30 {dimension_numbers = #tpu.dot_dimension_numbers<[2], [2], [1], [1], [0, 0, 0, 1, 1, 1], [0], [0]>} : vector<2x16x16xbf16>, vector<2x8x16xbf16>, vector<2x16x8xf32> -> vector<2x16x8xf32>
    "tpu.trace_stop"() : () -> ()
    %cst_31 = arith.constant dense<0xFF800000> : vector<2x16xf32>
    %75 = vector.multi_reduction <maximumf>, %74, %cst_31 [2] : vector<2x16x8xf32> to vector<2x16xf32>
    %76 = vector.shape_cast %75 : vector<2x16xf32> to vector<2x16x1xf32>
    %77 = vector.broadcast %76 : vector<2x16x1xf32> to vector<2x16x8xf32>
    %78 = arith.subf %74, %77 : vector<2x16x8xf32>
    %79 = math.exp %78 : vector<2x16x8xf32>
    %cst_32 = arith.constant dense<0.000000e+00> : vector<2x16xf32>
    %80 = vector.multi_reduction <add>, %79, %cst_32 [2] : vector<2x16x8xf32> to vector<2x16xf32>
    %81 = vector.shape_cast %80 : vector<2x16xf32> to vector<2x16x1xf32>
    %82 = tpu.reciprocal %81 {approx = true} : vector<2x16x1xf32> -> vector<2x16x1xf32>
    %83 = vector.broadcast %82 : vector<2x16x1xf32> to vector<2x16x8xf32>
    %84 = arith.mulf %79, %83 : vector<2x16x8xf32>
    %85 = arith.truncf %84 : vector<2x16x8xf32> to vector<2x16x8xbf16>
    "tpu.trace_start"() <{level = 10 : i32, message = "bqk,bkd->bqd"}> : () -> ()
    %cst_33 = arith.constant dense<0.000000e+00> : vector<2x16x16xf32>
    %86 = tpu.matmul %85, %73, %cst_33 {dimension_numbers = #tpu.dot_dimension_numbers<[2], [1], [1], [2], [0, 0, 0, 1, 1, 2], [0], [0]>} : vector<2x16x8xbf16>, vector<2x8x16xbf16>, vector<2x16x16xf32> -> vector<2x16x16xf32>
    "tpu.trace_stop"() : () -> ()
    %87 = arith.truncf %86 : vector<2x16x16xf32> to vector<2x16x16xbf16>
    %88 = vector.extract_strided_slice %62 {offsets = [0, 16], sizes = [32, 16], strides = [1, 1]} : vector<32x64xbf16> to vector<32x16xbf16>
    %89 = vector.shape_cast %88 : vector<32x16xbf16> to vector<2x16x16xbf16>
    %90 = vector.extract_strided_slice %66 {offsets = [0, 16], sizes = [16, 16], strides = [1, 1]} : vector<16x64xbf16> to vector<16x16xbf16>
    %91 = vector.shape_cast %90 : vector<16x16xbf16> to vector<2x8x16xbf16>
    %92 = vector.extract_strided_slice %67 {offsets = [0, 16], sizes = [16, 16], strides = [1, 1]} : vector<16x64xbf16> to vector<16x16xbf16>
    %93 = vector.shape_cast %92 : vector<16x16xbf16> to vector<2x8x16xbf16>
    "tpu.trace_start"() <{level = 10 : i32, message = "bqd,bkd->bqk"}> : () -> ()
    %cst_34 = arith.constant dense<0.000000e+00> : vector<2x16x8xf32>
    %94 = tpu.matmul %89, %91, %cst_34 {dimension_numbers = #tpu.dot_dimension_numbers<[2], [2], [1], [1], [0, 0, 0, 1, 1, 1], [0], [0]>} : vector<2x16x16xbf16>, vector<2x8x16xbf16>, vector<2x16x8xf32> -> vector<2x16x8xf32>
    "tpu.trace_stop"() : () -> ()
    %cst_35 = arith.constant dense<0xFF800000> : vector<2x16xf32>
    %95 = vector.multi_reduction <maximumf>, %94, %cst_35 [2] : vector<2x16x8xf32> to vector<2x16xf32>
    %96 = vector.shape_cast %95 : vector<2x16xf32> to vector<2x16x1xf32>
    %97 = vector.broadcast %96 : vector<2x16x1xf32> to vector<2x16x8xf32>
    %98 = arith.subf %94, %97 : vector<2x16x8xf32>
    %99 = math.exp %98 : vector<2x16x8xf32>
    %cst_36 = arith.constant dense<0.000000e+00> : vector<2x16xf32>
    %100 = vector.multi_reduction <add>, %99, %cst_36 [2] : vector<2x16x8xf32> to vector<2x16xf32>
    %101 = vector.shape_cast %100 : vector<2x16xf32> to vector<2x16x1xf32>
    %102 = tpu.reciprocal %101 {approx = true} : vector<2x16x1xf32> -> vector<2x16x1xf32>
    %103 = vector.broadcast %102 : vector<2x16x1xf32> to vector<2x16x8xf32>
    %104 = arith.mulf %99, %103 : vector<2x16x8xf32>
    %105 = arith.truncf %104 : vector<2x16x8xf32> to vector<2x16x8xbf16>
    "tpu.trace_start"() <{level = 10 : i32, message = "bqk,bkd->bqd"}> : () -> ()
    %cst_37 = arith.constant dense<0.000000e+00> : vector<2x16x16xf32>
    %106 = tpu.matmul %105, %93, %cst_37 {dimension_numbers = #tpu.dot_dimension_numbers<[2], [1], [1], [2], [0, 0, 0, 1, 1, 2], [0], [0]>} : vector<2x16x8xbf16>, vector<2x8x16xbf16>, vector<2x16x16xf32> -> vector<2x16x16xf32>
    "tpu.trace_stop"() : () -> ()
    %107 = arith.truncf %106 : vector<2x16x16xf32> to vector<2x16x16xbf16>
    %108 = vector.extract_strided_slice %62 {offsets = [0, 32], sizes = [32, 16], strides = [1, 1]} : vector<32x64xbf16> to vector<32x16xbf16>
    %109 = vector.shape_cast %108 : vector<32x16xbf16> to vector<2x16x16xbf16>
    %110 = vector.extract_strided_slice %66 {offsets = [0, 32], sizes = [16, 16], strides = [1, 1]} : vector<16x64xbf16> to vector<16x16xbf16>
    %111 = vector.shape_cast %110 : vector<16x16xbf16> to vector<2x8x16xbf16>
    %112 = vector.extract_strided_slice %67 {offsets = [0, 32], sizes = [16, 16], strides = [1, 1]} : vector<16x64xbf16> to vector<16x16xbf16>
    %113 = vector.shape_cast %112 : vector<16x16xbf16> to vector<2x8x16xbf16>
    "tpu.trace_start"() <{level = 10 : i32, message = "bqd,bkd->bqk"}> : () -> ()
    %cst_38 = arith.constant dense<0.000000e+00> : vector<2x16x8xf32>
    %114 = tpu.matmul %109, %111, %cst_38 {dimension_numbers = #tpu.dot_dimension_numbers<[2], [2], [1], [1], [0, 0, 0, 1, 1, 1], [0], [0]>} : vector<2x16x16xbf16>, vector<2x8x16xbf16>, vector<2x16x8xf32> -> vector<2x16x8xf32>
    "tpu.trace_stop"() : () -> ()
    %cst_39 = arith.constant dense<0xFF800000> : vector<2x16xf32>
    %115 = vector.multi_reduction <maximumf>, %114, %cst_39 [2] : vector<2x16x8xf32> to vector<2x16xf32>
    %116 = vector.shape_cast %115 : vector<2x16xf32> to vector<2x16x1xf32>
    %117 = vector.broadcast %116 : vector<2x16x1xf32> to vector<2x16x8xf32>
    %118 = arith.subf %114, %117 : vector<2x16x8xf32>
    %119 = math.exp %118 : vector<2x16x8xf32>
    %cst_40 = arith.constant dense<0.000000e+00> : vector<2x16xf32>
    %120 = vector.multi_reduction <add>, %119, %cst_40 [2] : vector<2x16x8xf32> to vector<2x16xf32>
    %121 = vector.shape_cast %120 : vector<2x16xf32> to vector<2x16x1xf32>
    %122 = tpu.reciprocal %121 {approx = true} : vector<2x16x1xf32> -> vector<2x16x1xf32>
    %123 = vector.broadcast %122 : vector<2x16x1xf32> to vector<2x16x8xf32>
    %124 = arith.mulf %119, %123 : vector<2x16x8xf32>
    %125 = arith.truncf %124 : vector<2x16x8xf32> to vector<2x16x8xbf16>
    "tpu.trace_start"() <{level = 10 : i32, message = "bqk,bkd->bqd"}> : () -> ()
    %cst_41 = arith.constant dense<0.000000e+00> : vector<2x16x16xf32>
    %126 = tpu.matmul %125, %113, %cst_41 {dimension_numbers = #tpu.dot_dimension_numbers<[2], [1], [1], [2], [0, 0, 0, 1, 1, 2], [0], [0]>} : vector<2x16x8xbf16>, vector<2x8x16xbf16>, vector<2x16x16xf32> -> vector<2x16x16xf32>
    "tpu.trace_stop"() : () -> ()
    %127 = arith.truncf %126 : vector<2x16x16xf32> to vector<2x16x16xbf16>
    %128 = vector.extract_strided_slice %62 {offsets = [0, 48], sizes = [32, 16], strides = [1, 1]} : vector<32x64xbf16> to vector<32x16xbf16>
    %129 = vector.shape_cast %128 : vector<32x16xbf16> to vector<2x16x16xbf16>
    %130 = vector.extract_strided_slice %66 {offsets = [0, 48], sizes = [16, 16], strides = [1, 1]} : vector<16x64xbf16> to vector<16x16xbf16>
    %131 = vector.shape_cast %130 : vector<16x16xbf16> to vector<2x8x16xbf16>
    %132 = vector.extract_strided_slice %67 {offsets = [0, 48], sizes = [16, 16], strides = [1, 1]} : vector<16x64xbf16> to vector<16x16xbf16>
    %133 = vector.shape_cast %132 : vector<16x16xbf16> to vector<2x8x16xbf16>
    "tpu.trace_start"() <{level = 10 : i32, message = "bqd,bkd->bqk"}> : () -> ()
    %cst_42 = arith.constant dense<0.000000e+00> : vector<2x16x8xf32>
    %134 = tpu.matmul %129, %131, %cst_42 {dimension_numbers = #tpu.dot_dimension_numbers<[2], [2], [1], [1], [0, 0, 0, 1, 1, 1], [0], [0]>} : vector<2x16x16xbf16>, vector<2x8x16xbf16>, vector<2x16x8xf32> -> vector<2x16x8xf32>
    "tpu.trace_stop"() : () -> ()
    %cst_43 = arith.constant dense<0xFF800000> : vector<2x16xf32>
    %135 = vector.multi_reduction <maximumf>, %134, %cst_43 [2] : vector<2x16x8xf32> to vector<2x16xf32>
    %136 = vector.shape_cast %135 : vector<2x16xf32> to vector<2x16x1xf32>
    %137 = vector.broadcast %136 : vector<2x16x1xf32> to vector<2x16x8xf32>
    %138 = arith.subf %134, %137 : vector<2x16x8xf32>
    %139 = math.exp %138 : vector<2x16x8xf32>
    %cst_44 = arith.constant dense<0.000000e+00> : vector<2x16xf32>
    %140 = vector.multi_reduction <add>, %139, %cst_44 [2] : vector<2x16x8xf32> to vector<2x16xf32>
    %141 = vector.shape_cast %140 : vector<2x16xf32> to vector<2x16x1xf32>
    %142 = tpu.reciprocal %141 {approx = true} : vector<2x16x1xf32> -> vector<2x16x1xf32>
    %143 = vector.broadcast %142 : vector<2x16x1xf32> to vector<2x16x8xf32>
    %144 = arith.mulf %139, %143 : vector<2x16x8xf32>
    %145 = arith.truncf %144 : vector<2x16x8xf32> to vector<2x16x8xbf16>
    "tpu.trace_start"() <{level = 10 : i32, message = "bqk,bkd->bqd"}> : () -> ()
    %cst_45 = arith.constant dense<0.000000e+00> : vector<2x16x16xf32>
    %146 = tpu.matmul %145, %133, %cst_45 {dimension_numbers = #tpu.dot_dimension_numbers<[2], [1], [1], [2], [0, 0, 0, 1, 1, 2], [0], [0]>} : vector<2x16x8xbf16>, vector<2x8x16xbf16>, vector<2x16x16xf32> -> vector<2x16x16xf32>
    "tpu.trace_stop"() : () -> ()
    %147 = arith.truncf %146 : vector<2x16x16xf32> to vector<2x16x16xbf16>
    %148 = tpu.concatenate %87, %107, %127, %147 in 2 : vector<2x16x16xbf16>, vector<2x16x16xbf16>, vector<2x16x16xbf16>, vector<2x16x16xbf16> -> vector<2x16x64xbf16>
    %149 = vector.shape_cast %148 : vector<2x16x64xbf16> to vector<32x64xbf16>
    %c0_46 = arith.constant 0 : index
    %c0_47 = arith.constant 0 : index
    %150 = vector.load %arg9[%c0_46, %c0_47] : memref<64x64xbf16, #tpu.memory_space<vmem>>, vector<64x64xbf16>
    %cst_48 = arith.constant dense<0.000000e+00> : vector<32x64xf32>
    %151 = tpu.matmul %149, %150, %cst_48 {dimension_numbers = #tpu.dot_dimension_numbers<[1], [0], [0], [1], [0, 0, 1, 1], [], []>} : vector<32x64xbf16>, vector<64x64xbf16>, vector<32x64xf32> -> vector<32x64xf32>
    %c0_49 = arith.constant 0 : index
    %c0_50 = arith.constant 0 : index
    %152 = vector.load %arg10[%c0_49, %c0_50] : memref<1x64xf32, #tpu.memory_space<vmem>>, vector<1x64xf32>
    %153 = vector.broadcast %152 : vector<1x64xf32> to vector<32x64xf32>
    %154 = arith.addf %151, %153 : vector<32x64xf32>
    %155 = arith.addf %154, %2 : vector<32x64xf32>
    %c0_51 = arith.constant 0 : index
    %c0_52 = arith.constant 0 : index
    %156 = vector.load %arg11[%c0_51, %c0_52] : memref<1x64xf32, #tpu.memory_space<vmem>>, vector<1x64xf32>
    %c0_53 = arith.constant 0 : index
    %c0_54 = arith.constant 0 : index
    %157 = vector.load %arg12[%c0_53, %c0_54] : memref<1x64xf32, #tpu.memory_space<vmem>>, vector<1x64xf32>
    %cst_55 = arith.constant dense<0.000000e+00> : vector<32xf32>
    %158 = vector.multi_reduction <add>, %155, %cst_55 [1] : vector<32x64xf32> to vector<32xf32>
    %159 = vector.shape_cast %158 : vector<32xf32> to vector<32x1xf32>
    %cst_56 = arith.constant 6.400000e+01 : f32
    %160 = vector.broadcast %cst_56 : f32 to vector<32x1xf32>
    %161 = arith.divf %159, %160 : vector<32x1xf32>
    %162 = arith.mulf %155, %155 : vector<32x64xf32>
    %cst_57 = arith.constant dense<0.000000e+00> : vector<32xf32>
    %163 = vector.multi_reduction <add>, %162, %cst_57 [1] : vector<32x64xf32> to vector<32xf32>
    %164 = vector.shape_cast %163 : vector<32xf32> to vector<32x1xf32>
    %cst_58 = arith.constant 6.400000e+01 : f32
    %165 = vector.broadcast %cst_58 : f32 to vector<32x1xf32>
    %166 = arith.divf %164, %165 : vector<32x1xf32>
    %167 = arith.mulf %161, %161 : vector<32x1xf32>
    %168 = arith.subf %166, %167 : vector<32x1xf32>
    %cst_59 = arith.constant 0.000000e+00 : f32
    %169 = vector.broadcast %cst_59 : f32 to vector<32x1xf32>
    %170 = arith.maximumf %168, %169 : vector<32x1xf32>
    %cst_60 = arith.constant 9.99999974E-6 : f32
    %171 = vector.broadcast %cst_60 : f32 to vector<32x1xf32>
    %172 = arith.addf %170, %171 : vector<32x1xf32>
    %173 = math.rsqrt %172 : vector<32x1xf32>
    %174 = vector.broadcast %161 : vector<32x1xf32> to vector<32x64xf32>
    %175 = arith.subf %155, %174 : vector<32x64xf32>
    %176 = vector.broadcast %173 : vector<32x1xf32> to vector<32x64xf32>
    %177 = arith.mulf %175, %176 : vector<32x64xf32>
    %178 = vector.broadcast %156 : vector<1x64xf32> to vector<32x64xf32>
    %179 = arith.mulf %177, %178 : vector<32x64xf32>
    %180 = vector.broadcast %157 : vector<1x64xf32> to vector<32x64xf32>
    %181 = arith.addf %179, %180 : vector<32x64xf32>
    %182 = arith.truncf %181 : vector<32x64xf32> to vector<32x64xbf16>
    %c0_61 = arith.constant 0 : index
    %c0_62 = arith.constant 0 : index
    %183 = vector.load %arg13[%c0_61, %c0_62] : memref<64x256xbf16, #tpu.memory_space<vmem>>, vector<64x256xbf16>
    %cst_63 = arith.constant dense<0.000000e+00> : vector<32x256xf32>
    %184 = tpu.matmul %182, %183, %cst_63 {dimension_numbers = #tpu.dot_dimension_numbers<[1], [0], [0], [1], [0, 0, 1, 1], [], []>} : vector<32x64xbf16>, vector<64x256xbf16>, vector<32x256xf32> -> vector<32x256xf32>
    %c0_64 = arith.constant 0 : index
    %c0_65 = arith.constant 0 : index
    %185 = vector.load %arg14[%c0_64, %c0_65] : memref<1x256xf32, #tpu.memory_space<vmem>>, vector<1x256xf32>
    %186 = vector.broadcast %185 : vector<1x256xf32> to vector<32x256xf32>
    %187 = arith.addf %184, %186 : vector<32x256xf32>
    %188 = arith.mulf %187, %187 : vector<32x256xf32>
    %189 = arith.mulf %187, %188 : vector<32x256xf32>
    %cst_66 = arith.constant 4.471500e-02 : f32
    %190 = vector.broadcast %cst_66 : f32 to vector<32x256xf32>
    %191 = arith.mulf %190, %189 : vector<32x256xf32>
    %192 = arith.addf %187, %191 : vector<32x256xf32>
    %cst_67 = arith.constant 0.797884583 : f32
    %193 = vector.broadcast %cst_67 : f32 to vector<32x256xf32>
    %194 = arith.mulf %193, %192 : vector<32x256xf32>
    %195 = math.tanh %194 : vector<32x256xf32>
    %cst_68 = arith.constant 1.000000e+00 : f32
    %196 = vector.broadcast %cst_68 : f32 to vector<32x256xf32>
    %197 = arith.addf %196, %195 : vector<32x256xf32>
    %cst_69 = arith.constant 5.000000e-01 : f32
    %198 = vector.broadcast %cst_69 : f32 to vector<32x256xf32>
    %199 = arith.mulf %198, %197 : vector<32x256xf32>
    %200 = arith.mulf %187, %199 : vector<32x256xf32>
    %201 = arith.truncf %200 : vector<32x256xf32> to vector<32x256xbf16>
    %c0_70 = arith.constant 0 : index
    %c0_71 = arith.constant 0 : index
    %202 = vector.load %arg15[%c0_70, %c0_71] : memref<256x64xbf16, #tpu.memory_space<vmem>>, vector<256x64xbf16>
    %cst_72 = arith.constant dense<0.000000e+00> : vector<32x64xf32>
    %203 = tpu.matmul %201, %202, %cst_72 {dimension_numbers = #tpu.dot_dimension_numbers<[1], [0], [0], [1], [0, 0, 1, 1], [], []>} : vector<32x256xbf16>, vector<256x64xbf16>, vector<32x64xf32> -> vector<32x64xf32>
    %c0_73 = arith.constant 0 : index
    %c0_74 = arith.constant 0 : index
    %204 = vector.load %arg16[%c0_73, %c0_74] : memref<1x64xf32, #tpu.memory_space<vmem>>, vector<1x64xf32>
    %205 = vector.broadcast %204 : vector<1x64xf32> to vector<32x64xf32>
    %206 = arith.addf %203, %205 : vector<32x64xf32>
    %207 = arith.addf %206, %155 : vector<32x64xf32>
    %208 = vector.shape_cast %207 : vector<32x64xf32> to vector<2x16x64xf32>
    %c0_75 = arith.constant 0 : index
    %c0_76 = arith.constant 0 : index
    %c0_77 = arith.constant 0 : index
    %209 = vector.load %arg17[%c0_75, %c0_76, %c0_77] : memref<2x16x64xf32, #tpu.memory_space<vmem>>, vector<2x16x64xf32>
    tpu.vector_store %arg17[%c0_75, %c0_76, %c0_77], %208 {strides = array<i32>} : memref<2x16x64xf32, #tpu.memory_space<vmem>>, vector<2x16x64xf32>,
    return
  }
  func.func @transform_0(%arg0: i32) -> (i32, i32, i32) {
    %c0_i32 = arith.constant 0 : i32
    %c0_i32_0 = arith.constant 0 : i32
    %c0_i32_1 = arith.constant 0 : i32
    return %arg0, %c0_i32, %c0_i32_0 : i32, i32, i32
  }
  func.func @transform_1(%arg0: i32) -> (i32, i32, i32) {
    %c0_i32 = arith.constant 0 : i32
    %c0_i32_0 = arith.constant 0 : i32
    %c0_i32_1 = arith.constant 0 : i32
    return %arg0, %c0_i32, %c0_i32_0 : i32, i32, i32
  }
  func.func @transform_2(%arg0: i32) -> (i32, i32) {
    %c0_i32 = arith.constant 0 : i32
    %c0_i32_0 = arith.constant 0 : i32
    %c0_i32_1 = arith.constant 0 : i32
    return %c0_i32, %c0_i32_0 : i32, i32
  }
  func.func @transform_3(%arg0: i32) -> (i32, i32) {
    %c0_i32 = arith.constant 0 : i32
    %c0_i32_0 = arith.constant 0 : i32
    %c0_i32_1 = arith.constant 0 : i32
    return %c0_i32, %c0_i32_0 : i32, i32
  }
  func.func @transform_4(%arg0: i32) -> (i32, i32) {
    %c0_i32 = arith.constant 0 : i32
    %c0_i32_0 = arith.constant 0 : i32
    %c0_i32_1 = arith.constant 0 : i32
    return %c0_i32, %c0_i32_0 : i32, i32
  }
  func.func @transform_5(%arg0: i32) -> (i32, i32) {
    %c0_i32 = arith.constant 0 : i32
    %c0_i32_0 = arith.constant 0 : i32
    %c0_i32_1 = arith.constant 0 : i32
    return %c0_i32, %c0_i32_0 : i32, i32
  }
  func.func @transform_6(%arg0: i32) -> (i32, i32) {
    %c0_i32 = arith.constant 0 : i32
    %c0_i32_0 = arith.constant 0 : i32
    %c0_i32_1 = arith.constant 0 : i32
    return %c0_i32, %c0_i32_0 : i32, i32
  }
  func.func @transform_7(%arg0: i32) -> (i32, i32) {
    %c0_i32 = arith.constant 0 : i32
    %c0_i32_0 = arith.constant 0 : i32
    %c0_i32_1 = arith.constant 0 : i32
    return %c0_i32, %c0_i32_0 : i32, i32
  }
  func.func @transform_8(%arg0: i32) -> (i32, i32) {
    %c0_i32 = arith.constant 0 : i32
    %c0_i32_0 = arith.constant 0 : i32
    %c0_i32_1 = arith.constant 0 : i32
    return %c0_i32, %c0_i32_0 : i32, i32
  }
  func.func @transform_9(%arg0: i32) -> (i32, i32) {
    %c0_i32 = arith.constant 0 : i32
    %c0_i32_0 = arith.constant 0 : i32
    %c0_i32_1 = arith.constant 0 : i32
    return %c0_i32, %c0_i32_0 : i32, i32
  }
  func.func @transform_10(%arg0: i32) -> (i32, i32) {
    %c0_i32 = arith.constant 0 : i32
    %c0_i32_0 = arith.constant 0 : i32
    %c0_i32_1 = arith.constant 0 : i32
    return %c0_i32, %c0_i32_0 : i32, i32
  }
  func.func @transform_11(%arg0: i32) -> (i32, i32) {
    %c0_i32 = arith.constant 0 : i32
    %c0_i32_0 = arith.constant 0 : i32
    %c0_i32_1 = arith.constant 0 : i32
    return %c0_i32, %c0_i32_0 : i32, i32
  }
  func.func @transform_12(%arg0: i32) -> (i32, i32) {
    %c0_i32 = arith.constant 0 : i32
    %c0_i32_0 = arith.constant 0 : i32
    %c0_i32_1 = arith.constant 0 : i32
    return %c0_i32, %c0_i32_0 : i32, i32
  }
  func.func @transform_13(%arg0: i32) -> (i32, i32) {
    %c0_i32 = arith.constant 0 : i32
    %c0_i32_0 = arith.constant 0 : i32
    %c0_i32_1 = arith.constant 0 : i32
    return %c0_i32, %c0_i32_0 : i32, i32
  }
  func.func @transform_14(%arg0: i32) -> (i32, i32) {
    %c0_i32 = arith.constant 0 : i32
    %c0_i32_0 = arith.constant 0 : i32
    %c0_i32_1 = arith.constant 0 : i32
    return %c0_i32, %c0_i32_0 : i32, i32
  }
  func.func @transform_15(%arg0: i32) -> (i32, i32) {
    %c0_i32 = arith.constant 0 : i32
    %c0_i32_0 = arith.constant 0 : i32
    %c0_i32_1 = arith.constant 0 : i32
    return %c0_i32, %c0_i32_0 : i32, i32
  }
  func.func @transform_16(%arg0: i32) -> (i32, i32, i32) {
    %c0_i32 = arith.constant 0 : i32
    %c0_i32_0 = arith.constant 0 : i32
    %c0_i32_1 = arith.constant 0 : i32
    return %arg0, %c0_i32, %c0_i32_0 : i32, i32, i32
  }
}

</mosaic_0001>

<bundles_post_ra>
// kernel: tpu_custom_call.1
= control target key start
LH: loop header
LB: loop body
LE: loop exit
PB: predicated region body
PF: predicated region fallthrough
CT: control target
= control target key end

     0   :  { %s3074_s0 = inlined_call_operand.vmem [shape: bf16[2,16,64], index: 0, kind: input, shape index: {}]   ;;  %s3075_s1 = inlined_call_operand.vmem [shape: bf16[2,8,64], index: 1, kind: input, shape index: {}]   ;;  %s3076_s2 = inlined_call_operand.vmem [shape: f32[1,64], index: 2, kind: input, shape index: {}]   ;;  %s3077_s3 = inlined_call_operand.vmem [shape: f32[1,64], index: 3, kind: input, shape index: {}]   ;;  %s3078_s4 = inlined_call_operand.vmem [shape: f32[1,64], index: 4, kind: input, shape index: {}]   ;;  %s3079_s5 = inlined_call_operand.vmem [shape: f32[1,64], index: 5, kind: input, shape index: {}]   ;;  %s3080_s6 = inlined_call_operand.vmem [shape: bf16[64,64], index: 6, kind: input, shape index: {}]   ;;  %s3081_s7 = inlined_call_operand.vmem [shape: bf16[64,128], index: 7, kind: input, shape index: {}]   ;;  %s3082_s8 = inlined_call_operand.vmem [shape: bf16[64,64], index: 8, kind: input, shape index: {}]   ;;  %s3083_s9 = inlined_call_operand.vmem [shape: f32[1,64], index: 9, kind: input, shape index: {}]   ;;  %s3084_s10 = inlined_call_operand.vmem [shape: f32[1,64], index: 10, kind: input, shape index: {}]   ;;  %s3085_s11 = inlined_call_operand.vmem [shape: f32[1,64], index: 11, kind: input, shape index: {}]   ;;  %s3086_s12 = inlined_call_operand.vmem [shape: bf16[64,256], index: 12, kind: input, shape index: {}]   ;;  %s3087_s13 = inlined_call_operand.vmem [shape: f32[1,256], index: 13, kind: input, shape index: {}]   ;;  %s3088_s14 = inlined_call_operand.vmem [shape: bf16[256,64], index: 14, kind: input, shape index: {}]   ;;  %s3089_s15 = inlined_call_operand.vmem [shape: f32[1,64], index: 15, kind: input, shape index: {}]   ;;  %s3090_s16 = inlined_call_operand.hbm [shape: f32[2,16,64], index: 16, kind: output, shape index: {}]  }
   0x1   :  { %3092 = sst [smem:[#allocation5_spill]] %s3074_s0 }
   0x2   :  { %s3093_s23 = sld [smem:[#allocation5_spill]]  ;;  %vm69_vm0 = vcmask 523264   ;;  %v2069_v2 = vld [vmem:[%s3075_s1] sm:$0xff]  }
   0x3   :  { %v2574_v7 = vunpack.c.h.bf16 %v2069_v2  ;;  %v2580_v10 = vunpack.c.l.bf16 %v2069_v2 }
   0x5   :  { %v162_v15 = vsel %vm69_vm0, %v2574_v7, 0.0  ;;  %v159_v19 = vsel %vm69_vm0, %v2580_v10, 0.0  ;;  %v168_v21 = vmul.f32 %v2574_v7, %v2574_v7  ;;  %v167_v22 = vmul.f32 %v2580_v10, %v2580_v10 }
   0x7   :  { %v172_v25 = vsel %vm69_vm0, %v168_v21, 0.0  ;;  %v169_v26 = vsel %vm69_vm0, %v167_v22, 0.0 }
   0x8   :  { %v2072_v0 = vld [vmem:[%s3093_s23 + $0x8] sm:$0xff]   ;;  %v2061_v1 = vld [vmem:[%s3093_s23] sm:$0xff]  }
   0x9   :  { %v2566_v3 = vunpack.c.l.bf16 %v2072_v0  ;;  %v2568_v4 = vunpack.c.l.bf16 %v2061_v1  ;;  %v2570_v5 = vunpack.c.h.bf16 %v2072_v0  ;;  %v2572_v6 = vunpack.c.h.bf16 %v2061_v1 }
   0xb   :  { %v76_v8 = vsel %vm69_vm0, %v2566_v3, 0.0  ;;  %v70_v9 = vsel %vm69_vm0, %v2568_v4, 0.0  ;;  %v79_v11 = vsel %vm69_vm0, %v2570_v5, 0.0  ;;  %v88_v12 = vmul.f32 %v2572_v6, %v2572_v6 }
   0xc   :  { %77 = vadd.xlane.f32.xlu1 %v76_v8  ;;  %71 = vadd.xlane.f32.xlu0 %v70_v9  ;;  %v87_v13 = vmul.f32 %v2568_v4, %v2568_v4  ;;  %v73_v14 = vsel %vm69_vm0, %v2572_v6, 0.0  ;;  %v90_v18 = vmul.f32 %v2570_v5, %v2570_v5  ;;  %v89_v20 = vmul.f32 %v2566_v3, %v2566_v3 }
   0xd   :  { %v94_v16 = vsel %vm69_vm0, %v88_v12, 0.0 }
   0xe   :  { %v91_v17 = vsel %vm69_vm0, %v87_v13, 0.0  ;;  %v100_v23 = vsel %vm69_vm0, %v90_v18, 0.0  ;;  %v97_v24 = vsel %vm69_vm0, %v89_v20, 0.0 }
  0x10   :  { %80 = vadd.xlane.f32.xlu1 %v79_v11  ;;  %74 = vadd.xlane.f32.xlu0 %v73_v14 }
  0x14   :  { %95 = vadd.xlane.f32.xlu1 %v94_v16  ;;  %92 = vadd.xlane.f32.xlu0 %v91_v17 }
  0x18   :  { %101 = vadd.xlane.f32.xlu1 %v100_v23  ;;  %98 = vadd.xlane.f32.xlu0 %v97_v24 }
  0x1c   :  { %163 = vadd.xlane.f32.xlu1 %v162_v15  ;;  %160 = vadd.xlane.f32.xlu0 %v159_v19 }
  0x1d   :  { %21 = vsyncpa [#allocation3], 0  ;;  %v2295_v27 = vld [vmem:[%s3080_s6] sm:$0xff]   ;;  %v2296_v28 = vld [vmem:[%s3080_s6 + $0x8] sm:$0xff]   ;;  %v2459_v31 = vmov 0.0   ;;  %vm2460_vm1 = vmmov 0  }
  0x1e   :  { %2150 = vmatprep.subr.bf16.mxu1 %v2295_v27  ;;  %v2297_v29 = vld [vmem:[%s3080_s6 + $0x10] sm:$0xff]   ;;  %v2298_v30 = vld [vmem:[%s3080_s6 + $0x18] sm:$0xff]   ;;  %2174 = vmatprep.subr.bf16.mxu0 %v2459_v31  ;;  %vm379_vm2 = vcmask 130048   ;;  %vm474_vm3 = vcmask 64512   ;;  %vm526_vm4 = vcmask 1043456   ;;  %s2464_s17 = smov 96  }
  0x1f   :  { %2151 = vmatpush3.bf16.msra.mxu1 %v2295_v27  ;;  %2176 = vmatprep.mubr.msk.bf16.mxu0 %vm2460_vm1, %v2459_v31  ;;  %s2465_s18 = smov 32   ;;  %s2466_s19 = smov 80   ;;  %vm1392_vm5 = vcmask 261120   ;;  %vm1397_vm6 = vcmask 392192  }
  0x20   :  { %173 = vadd.xlane.f32.xlu1 %v172_v25  ;;  %170 = vadd.xlane.f32.xlu0 %v169_v26  ;;  %v1989_v25 = vld [vmem:[%s3076_s2] ss:$0 sm:$0xff]  ;;  %s2467_s6 = smov 16  }
  0x21   :  { %2152 = vmatprep.subr.bf16.mxu1 %v2296_v28 }
  0x23   :  { %2153 = vmatpush3.bf16.msra.mxu1 %v2296_v28  ;;  %v1990_v28 = vld [vmem:[%s3077_s3] ss:$0 sm:$0xff] }
  0x24   :  { %2154 = vmatprep.subr.bf16.mxu1 %v2297_v29 }
  0x27   :  { %2155 = vmatpush3.bf16.msra.mxu1 %v2297_v29 }
  0x28   :  { %2156 = vmatprep.subr.bf16.mxu1 %v2298_v30 }
  0x2b   :  { %2157 = vmatpush3.bf16.msra.mxu1 %v2298_v30 }
  0x2c   :  { %2162 = vmatprep.subr.bf16.mxu1 %v2459_v31 }
  0x99   :  { %v78_v32 = vpop.xlane.xlu1 %77  ;;  %v72_v33 = vpop.xlane.xlu0 %71 }
  0x9a   :  { %v83_v36 = vmul.f32 0.015625, %v72_v33  ;;  %v2624_v38 = vmul.f32 0.015625, %v78_v32 }
  0x9c   :  { %v107_v42 = vmul.f32 %v83_v36, %v83_v36  ;;  %v109_v48 = vmul.f32 %v2624_v38, %v2624_v38  ;;  %v127_v22 = vsub.f32 %v2568_v4, %v83_v36 }
  0x9d   :  { %v81_v34 = vpop.xlane.xlu1 %80  ;;  %v75_v35 = vpop.xlane.xlu0 %74 }
  0x9e   :  { %v84_v37 = vmul.f32 0.015625, %v75_v35  ;;  %v2626_v39 = vmul.f32 0.015625, %v81_v34  ;;  %v129_v34 = vsub.f32 %v2566_v3, %v2624_v38 }
  0xa0   :  { %v108_v43 = vmul.f32 %v84_v37, %v84_v37  ;;  %v110_v49 = vmul.f32 %v2626_v39, %v2626_v39  ;;  %v128_v20 = vsub.f32 %v2572_v6, %v84_v37  ;;  %v130_v30 = vsub.f32 %v2570_v5, %v2626_v39  ;;  %v2299_v39 = vld [vmem:[%s3081_s7] sm:$0xff]  }
  0xa1   :  { %v96_v40 = vpop.xlane.xlu1 %95  ;;  %v93_v41 = vpop.xlane.xlu0 %92 }
  0xa2   :  { %v104_v44 = vmul.f32 0.015625, %v96_v40  ;;  %v103_v45 = vmul.f32 0.015625, %v93_v41 }
  0xa4   :  { %v112_v46 = vsub.f32 %v104_v44, %v108_v43  ;;  %v111_v47 = vsub.f32 %v103_v45, %v107_v42 }
  0xa5   :  { %v102_v50 = vpop.xlane.xlu1 %101  ;;  %v99_v51 = vpop.xlane.xlu0 %98 }
  0xa6   :  { %v116_v52 = vmax.f32 %v112_v46, 0.0  ;;  %v115_v53 = vmax.f32 %v111_v47, 0.0  ;;  %v106_v54 = vmul.f32 0.015625, %v102_v50  ;;  %v105_v55 = vmul.f32 0.015625, %v99_v51 }
  0xa8   :  { %v120_v56 = vadd.f32 1e-05, %v116_v52  ;;  %v119_v57 = vadd.f32 1e-05, %v115_v53  ;;  %v114_v58 = vsub.f32 %v106_v54, %v110_v49  ;;  %v113_v59 = vsub.f32 %v105_v55, %v109_v48  ;;  %v2300_v52 = vld [vmem:[%s3081_s7 + $0x8] sm:$0xff]  }
  0xa9   :  { %v164_v60 = vpop.xlane.xlu1 %163  ;;  %v161_v61 = vpop.xlane.xlu0 %160 }
  0xaa   :  { %2335 = vrsqrt.f32 %v120_v56  ;;  %v118_v62 = vmax.f32 %v114_v58, 0.0  ;;  %v117_v63 = vmax.f32 %v113_v59, 0.0  ;;  %v166_v0 = vmul.f32 0.015625, %v164_v60  ;;  %v2302_v58 = vld [vmem:[%s3081_s7 + $0x18] sm:$0xff]  }
  0xab   :  { %2337 = vrsqrt.f32 %v119_v57  ;;  %v165_v1 = vmul.f32 0.015625, %v161_v61  ;;  %v1992_v57 = vld [vmem:[%s3079_s5] ss:$0 sm:$0xff]  ;;  %s2462_s5 = smov 112  }
  0xac   :  { %v122_v2 = vadd.f32 1e-05, %v118_v62  ;;  %v121_v8 = vadd.f32 1e-05, %v117_v63  ;;  %v178_v9 = vmul.f32 %v166_v0, %v166_v0  ;;  %v188_v50 = vsub.f32 %v2574_v7, %v166_v0  ;;  %v1991_v7 = vld [vmem:[%s3078_s4] ss:$0 sm:$0xff] }
  0xad   :  { %v177_v11 = vmul.f32 %v165_v1, %v165_v1  ;;  %v174_v12 = vpop.xlane.xlu1 %173  ;;  %v171_v13 = vpop.xlane.xlu0 %170  ;;  %v187_v51 = vsub.f32 %v2580_v10, %v165_v1  ;;  %v2301_v10 = vld [vmem:[%s3081_s7 + $0x10] sm:$0xff]   ;;  %s2461_s4 = smov 64   ;;  %s2463_s7 = smov 48  }
  0xae   :  { %2339 = vrsqrt.f32 %v122_v2  ;;  %v176_v14 = vmul.f32 0.015625, %v174_v12  ;;  %v175_v15 = vmul.f32 0.015625, %v171_v13 }
  0xaf   :  { %2341 = vrsqrt.f32 %v121_v8 }
  0xb0   :  { %v180_v16 = vsub.f32 %v176_v14, %v178_v9  ;;  %v179_v17 = vsub.f32 %v175_v15, %v177_v11 }
  0xb2   :  { %v182_v18 = vmax.f32 %v180_v16, 0.0  ;;  %v181_v19 = vmax.f32 %v179_v17, 0.0 }
  0xb4   :  { %v2336_v21 = vpop.eup %2335  ;;  %v184_v23 = vadd.f32 1e-05, %v182_v18  ;;  %v183_v24 = vadd.f32 1e-05, %v181_v19 }
  0xb5   :  { %v2338_v26 = vpop.eup %2337  ;;  %v132_v27 = vmul.f32 %v2336_v21, %v128_v20 }
  0xb6   :  { %2343 = vrsqrt.f32 %v184_v23  ;;  %v131_v29 = vmul.f32 %v2338_v26, %v127_v22 }
  0xb7   :  { %2345 = vrsqrt.f32 %v183_v24  ;;  %v142_v32 = vmul.f32 %v1989_v25, %v132_v27 }
  0xb8   :  { %v2340_v33 = vpop.eup %2339  ;;  %v141_v35 = vmul.f32 %v1989_v25, %v131_v29 }
  0xb9   :  { %v2342_v36 = vpop.eup %2341  ;;  %v152_v37 = vadd.f32 %v1990_v28, %v142_v32  ;;  %v134_v40 = vmul.f32 %v2340_v33, %v130_v30 }
  0xba   :  { %v151_v41 = vadd.f32 %v1990_v28, %v141_v35  ;;  %v133_v42 = vmul.f32 %v2342_v36, %v129_v34 }
  0xbb   :  { %v144_v43 = vmul.f32 %v1989_v25, %v134_v40 }
  0xbc   :  { %v155_v44 = vpack.c.bf16 %v152_v37, %v151_v41  ;;  %v143_v45 = vmul.f32 %v1989_v25, %v133_v42 }
  0xbd   :  { %v154_v46 = vadd.f32 %v1990_v28, %v144_v43 }
  0xbe   :  { %2158 = vmatprep.mubr.msk.bf16.mxu1 %vm69_vm0, %v155_v44  ;;  %v153_v47 = vadd.f32 %v1990_v28, %v143_v45 }
  0xc0   :  { %v2344_v48 = vpop.eup %2343  ;;  %v156_v49 = vpack.c.bf16 %v154_v46, %v153_v47 }
  0xc1   :  { %v2346_v38 = vpop.eup %2345  ;;  %v190_v53 = vmul.f32 %v2344_v48, %v188_v50 }
  0xc2   :  { %2159 = vmatmul.mubr.msk.bf16.vlgmr.msra.gmra.mrb[0].mxu1 %vm69_vm0, %v156_v49  ;;  %v189_v54 = vmul.f32 %v2346_v38, %v187_v51 }
  0xc3   :  { %2163 = vmatpush3.bf16.msra.mxu1 %v2299_v39  ;;  %2170 = vmatprep.mubr.msk.bf16.mxu1 %vm2460_vm1, %v2459_v31  ;;  %v198_v56 = vmul.f32 %v1991_v7, %v190_v53 }
  0xc4   :  { %2164 = vmatprep.subr.bf16.mxu1 %v2459_v31  ;;  %v197_v55 = vmul.f32 %v1991_v7, %v189_v54 }
  0xc5   :  { %v206_v60 = vadd.f32 %v1992_v57, %v198_v56 }
  0xc6   :  { %v205_v59 = vadd.f32 %v1992_v57, %v197_v55 }
  0xc7   :  { %2165 = vmatpush3.bf16.msra.mxu1 %v2300_v52 }
  0xc8   :  { %2166 = vmatprep.subr.bf16.mxu1 %v2459_v31  ;;  %v207_v61 = vpack.c.bf16 %v206_v60, %v205_v59 }
  0xcb   :  { %2167 = vmatpush3.bf16.msra.mxu1 %v2301_v10 }
  0xcc   :  { %2168 = vmatprep.subr.bf16.mxu1 %v2459_v31 }
  0xcf   :  { %2169 = vmatpush3.bf16.msra.mxu1 %v2302_v58 }
  0xd0   :  { %2180 = vmatprep.subr.bf16.mxu1 %v2459_v31 }
  0xd2   :  { %2171 = vmatmul.mubr.msk.bf16.vlgmr.msra.gmra.mrb[4].mxu1 %vm69_vm0, %v207_v61 }
  0xd3   :  { %2182 = vmatprep.mubr.msk.bf16.mxu1 %vm2460_vm1, %v2459_v31 }
 0x195   :  { %v2160_v62 = vpop.f32.mrb[0].mxu1 }
 0x196   :  { %v280_v63 = vpop.f32.mrb[1].mxu1 }
 0x197   :  { %v2161_v0 = vpop.f32.mrb[2].mxu1 }
 0x198   :  { %v2675_v1 = vpack.c.bf16 %v2161_v0, %v2160_v62  ;;  %v283_v2 = vpop.f32.mrb[3].mxu1 }
 0x199   :  { %v2677_v8 = vpack.c.bf16 %v283_v2, %v280_v63 }
 0x1a5   :  { %v366_v9 = vpop.f32.mrb[4].mxu1 }
 0x1a6   :  { %v2679_v11 = vpack.c.bf16 %v366_v9, %v366_v9  ;;  %v2172_v12 = vpop.f32.mrb[5].mxu1 }
 0x1a7   :  { %v369_v13 = vpop.f32.mrb[6].mxu1 }
 0x1a8   :  { %v2681_v14 = vpack.c.bf16 %v369_v13, %v369_v13  ;;  %v2173_v15 = vpop.f32.mrb[7].mxu1  ;;  %v384_v16 = vsel %vm379_vm2, %v2679_v11, 0 }
 0x1a9   :  { %2175 = vmatpush3.bf16.xpose.msra.mxu0 %v384_v16 }
 0x1aa   :  { %v431_v17 = vsel %vm379_vm2, %v2681_v14, 0  ;;  %2186 = vmatprep.subr.bf16.mxu0 %v2459_v31 }
 0x1ab   :  { %2181 = vmatpush3.bf16.xpose.msra.mxu1 %v431_v17 }
 0x1ac   :  { %2192 = vmatprep.subr.bf16.mxu1 %v2459_v31 }
 0x1b0   :  { %2177 = vmatmul.mubr.msk.bf16.vlgmr.msra.gmra.mrb[0].mxu0 %vm379_vm2, %v2677_v8 }
 0x1b1   :  { %2188 = vmatprep.mubr.msk.bf16.mxu0 %vm2460_vm1, %v2459_v31 }
 0x1b2   :  { %2183 = vmatmul.mubr.msk.bf16.vlgmr.msra.gmra.mrb[8].mxu1 %vm379_vm2, %v2675_v1 }
 0x1b3   :  { %2194 = vmatprep.mubr.msk.bf16.mxu1 %vm2460_vm1, %v2459_v31 }
 0x283   :  { %v420_v18 = vpop.f32.mrb[0].mxu0 }
 0x284   :  { %v2178_v19 = vpop.f32.mrb[1].mxu0  ;;  %v475_v20 = vsel %vm474_vm3, %v420_v18, -inf }
 0x285   :  { %476 = vmax.xlane.f32.xlu0 %v475_v20  ;;  %v423_v21 = vpop.f32.mrb[2].mxu0  ;;  %v467_v22 = vpop.f32.mrb[8].mxu1 }
 0x286   :  { %v2179_v23 = vpop.f32.mrb[3].mxu0  ;;  %v2184_v24 = vpop.f32.mrb[9].mxu1  ;;  %v478_v25 = vsel %vm474_vm3, %v423_v21, -inf  ;;  %v481_v28 = vsel %vm474_vm3, %v467_v22, -inf }
 0x287   :  { %479 = vmax.xlane.f32.xlu1 %v478_v25  ;;  %v470_v26 = vpop.f32.mrb[10].mxu1 }
 0x288   :  { %v2185_v27 = vpop.f32.mrb[11].mxu1  ;;  %v484_v29 = vsel %vm474_vm3, %v470_v26, -inf }
 0x289   :  { %482 = vmax.xlane.f32.xlu0 %v481_v28 }
 0x28b   :  { %485 = vmax.xlane.f32.xlu1 %v484_v29 }
 0x312   :  { %v477_v30 = vpop.xlane.xlu0 %476 }
 0x313   :  { %v487_v32 = vsub.f32 %v420_v18, %v477_v30 }
 0x314   :  { %v480_v33 = vpop.xlane.xlu1 %479 }
 0x315   :  { %v491_v34 = vmul.f32 1.442695, %v487_v32  ;;  %v488_v35 = vsub.f32 %v423_v21, %v480_v33 }
 0x316   :  { %v483_v36 = vpop.xlane.xlu0 %482 }
 0x317   :  { %2347 = vpow2.f32 %v491_v34  ;;  %v493_v37 = vmul.f32 1.442695, %v488_v35  ;;  %v489_v40 = vsub.f32 %v467_v22, %v483_v36 }
 0x318   :  { %v486_v39 = vpop.xlane.xlu1 %485 }
 0x319   :  { %2349 = vpow2.f32 %v493_v37  ;;  %v495_v41 = vmul.f32 1.442695, %v489_v40  ;;  %v490_v48 = vsub.f32 %v470_v26, %v486_v39 }
 0x31b   :  { %2351 = vpow2.f32 %v495_v41  ;;  %v497_v49 = vmul.f32 1.442695, %v490_v48 }
 0x31d   :  { %2353 = vpow2.f32 %v497_v49 }
 0x321   :  { %v2348_v42 = vpop.eup %2347 }
 0x322   :  { %v499_v43 = vsel %vm474_vm3, %v2348_v42, 0.0 }
 0x323   :  { %v2350_v44 = vpop.eup %2349  ;;  %500 = vadd.xlane.f32.xlu0 %v499_v43 }
 0x324   :  { %v502_v45 = vsel %vm474_vm3, %v2350_v44, 0.0 }
 0x325   :  { %v2352_v46 = vpop.eup %2351  ;;  %503 = vadd.xlane.f32.xlu1 %v502_v45 }
 0x326   :  { %v505_v47 = vsel %vm474_vm3, %v2352_v46, 0.0 }
 0x327   :  { %506 = vadd.xlane.f32.xlu0 %v505_v47  ;;  %v2354_v38 = vpop.eup %2353 }
 0x328   :  { %v508_v50 = vsel %vm474_vm3, %v2354_v38, 0.0 }
 0x336   :  { %571 = vrot.lane.b32.xlu1 %v2681_v14, %s2461_s4 }
 0x33a   :  { %625 = vrot.lane.b32.xlu1 %v2679_v11, %s2462_s5 }
 0x33d   :  { %521 = vrot.lane.b32.xlu0 %v2679_v11, %s2461_s4 }
 0x341   :  { %623 = vrot.lane.b32.xlu0 %v2677_v8, %s2462_s5 }
 0x35e   :  { %509 = vadd.xlane.f32.xlu1 %v508_v50 }
 0x36f   :  { %677 = vrot.lane.b32.xlu1 %v2681_v14, %s2462_s5 }
 0x373   :  { %675 = vrot.lane.b32.xlu1 %v2675_v1, %s2462_s5 }
 0x3b0   :  { %v501_v51 = vpop.xlane.xlu0 %500 }
 0x3b1   :  { %2355 = vrcp.f32 %v501_v51 }
 0x3b2   :  { %v504_v52 = vpop.xlane.xlu1 %503 }
 0x3b3   :  { %2357 = vrcp.f32 %v504_v52 }
 0x3b4   :  { %v507_v53 = vpop.xlane.xlu0 %506 }
 0x3b5   :  { %2359 = vrcp.f32 %v507_v53 }
 0x3b6   :  { %v572_v54 = vpop.permute.xlu1 %571 }
 0x3b7   :  { %v577_v7 = vsel %vm526_vm4, %v572_v54, 0 }
 0x3b8   :  { %v522_v10 = vpop.permute.xlu0 %521  ;;  %2193 = vmatpush3.bf16.msra.mxu1 %v577_v7 }
 0x3b9   :  { %v528_v55 = vsel %vm526_vm4, %v522_v10, 0  ;;  %2204 = vmatprep.subr.bf16.mxu1 %v2459_v31 }
 0x3ba   :  { %2187 = vmatpush3.bf16.msra.mxu0 %v528_v55  ;;  %v626_v60 = vpop.permute.xlu1 %625 }
 0x3bb   :  { %v2356_v56 = vpop.eup %2355  ;;  %2198 = vmatprep.subr.bf16.mxu0 %v2459_v31  ;;  %v631_v62 = vsel %vm379_vm2, %v626_v60, 0 }
 0x3bc   :  { %v515_v58 = vmul.f32 %v2356_v56, %v2348_v42  ;;  %v624_v63 = vpop.permute.xlu0 %623 }
 0x3bd   :  { %v2358_v57 = vpop.eup %2357 }
 0x3be   :  { %v516_v59 = vmul.f32 %v2358_v57, %v2350_v44 }
 0x3bf   :  { %v2360_v2 = vpop.eup %2359 }
 0x3c0   :  { %v519_v61 = vpack.c.bf16 %v516_v59, %v515_v58  ;;  %v517_v12 = vmul.f32 %v2360_v2, %v2352_v46 }
 0x3c2   :  { %2189 = vmatmul.mubr.msk.bf16.vlgmr.msra.gmra.mrb[4].mxu0 %vm474_vm3, %v519_v61 }
 0x3c3   :  { %2199 = vmatpush3.bf16.xpose.msra.mxu0 %v631_v62  ;;  %2200 = vmatprep.mubr.msk.bf16.mxu0 %vm2460_vm1, %v2459_v31 }
 0x3c4   :  { %2210 = vmatprep.subr.bf16.mxu0 %v2459_v31 }
 0x3ca   :  { %2201 = vmatmul.mubr.msk.bf16.vlgmr.msra.gmra.mrb[8].mxu0 %vm379_vm2, %v624_v63 }
 0x3cb   :  { %2212 = vmatprep.mubr.msk.bf16.mxu0 %vm2460_vm1, %v2459_v31 }
 0x3eb   :  { %v510_v0 = vpop.xlane.xlu1 %509 }
 0x3ec   :  { %2361 = vrcp.f32 %v510_v0 }
 0x3ef   :  { %v678_v15 = vpop.permute.xlu1 %677 }
 0x3f0   :  { %v683_v17 = vsel %vm379_vm2, %v678_v15, 0 }
 0x3f3   :  { %v676_v18 = vpop.permute.xlu1 %675 }
 0x3f6   :  { %v2362_v9 = vpop.eup %2361 }
 0x3f7   :  { %v518_v13 = vmul.f32 %v2362_v9, %v2354_v38 }
 0x3f9   :  { %v520_v16 = vpack.c.bf16 %v518_v13, %v517_v12 }
 0x3fb   :  { %2195 = vmatmul.mubr.msk.bf16.vlgmr.msra.gmra.mrb[12].mxu1 %vm474_vm3, %v520_v16 }
 0x3fc   :  { %2205 = vmatpush3.bf16.xpose.msra.mxu1 %v683_v17  ;;  %2206 = vmatprep.mubr.msk.bf16.mxu1 %vm2460_vm1, %v2459_v31 }
 0x3fd   :  { %2216 = vmatprep.subr.bf16.mxu1 %v2459_v31 }
 0x403   :  { %2207 = vmatmul.mubr.msk.bf16.vlgmr.msra.gmra.mrb[16].mxu1 %vm379_vm2, %v676_v18 }
 0x404   :  { %2218 = vmatprep.mubr.msk.bf16.mxu1 %vm2460_vm1, %v2459_v31 }
 0x495   :  { %v2731_v19 = vpop.f32.mrb[4].mxu0 }
 0x496   :  { %v2190_v20 = vpop.f32.mrb[5].mxu0 }
 0x497   :  { %v2733_v21 = vpop.f32.mrb[6].mxu0 }
 0x498   :  { %v620_v22 = vpack.c.bf16 %v2733_v21, %v2731_v19  ;;  %v2191_v23 = vpop.f32.mrb[7].mxu0  ;;  %v2022_v19 = vld [vmem:[%s3083_s9] ss:$0 sm:$0xff] }
 0x49d   :  { %v667_v24 = vpop.f32.mrb[8].mxu0 }
 0x49e   :  { %v2202_v25 = vpop.f32.mrb[9].mxu0  ;;  %v726_v26 = vsel %vm474_vm3, %v667_v24, -inf }
 0x49f   :  { %727 = vmax.xlane.f32.xlu0 %v726_v26  ;;  %v670_v27 = vpop.f32.mrb[10].mxu0 }
 0x4a0   :  { %v2203_v28 = vpop.f32.mrb[11].mxu0  ;;  %v729_v29 = vsel %vm474_vm3, %v670_v27, -inf }
 0x4a1   :  { %730 = vmax.xlane.f32.xlu1 %v729_v29 }
 0x4ce   :  { %v2739_v30 = vpop.f32.mrb[12].mxu1 }
 0x4cf   :  { %v2196_v32 = vpop.f32.mrb[13].mxu1 }
 0x4d0   :  { %v2741_v33 = vpop.f32.mrb[14].mxu1 }
 0x4d1   :  { %v621_v34 = vpack.c.bf16 %v2741_v33, %v2739_v30  ;;  %v2197_v35 = vpop.f32.mrb[15].mxu1 }
 0x4d6   :  { %v719_v36 = vpop.f32.mrb[16].mxu1 }
 0x4d7   :  { %v2208_v37 = vpop.f32.mrb[17].mxu1  ;;  %v732_v40 = vsel %vm474_vm3, %v719_v36, -inf }
 0x4d8   :  { %733 = vmax.xlane.f32.xlu0 %v732_v40  ;;  %v722_v41 = vpop.f32.mrb[18].mxu1 }
 0x4d9   :  { %v2209_v42 = vpop.f32.mrb[19].mxu1  ;;  %v735_v43 = vsel %vm474_vm3, %v722_v41, -inf }
 0x4dc   :  { %736 = vmax.xlane.f32.xlu0 %v735_v43 }
 0x52c   :  { %v728_v44 = vpop.xlane.xlu0 %727 }
 0x52d   :  { %v738_v45 = vsub.f32 %v667_v24, %v728_v44 }
 0x52e   :  { %v731_v46 = vpop.xlane.xlu1 %730 }
 0x52f   :  { %v742_v47 = vmul.f32 1.442695, %v738_v45  ;;  %v739_v39 = vsub.f32 %v670_v27, %v731_v46 }
 0x531   :  { %2363 = vpow2.f32 %v742_v47  ;;  %v744_v48 = vmul.f32 1.442695, %v739_v39 }
 0x533   :  { %2365 = vpow2.f32 %v744_v48 }
 0x53b   :  { %v2364_v49 = vpop.eup %2363 }
 0x53c   :  { %v750_v38 = vsel %vm474_vm3, %v2364_v49, 0.0 }
 0x53d   :  { %v2366_v50 = vpop.eup %2365  ;;  %751 = vadd.xlane.f32.xlu0 %v750_v38 }
 0x53e   :  { %v753_v51 = vsel %vm474_vm3, %v2366_v50, 0.0 }
 0x53f   :  { %754 = vadd.xlane.f32.xlu1 %v753_v51 }
 0x550   :  { %821 = vrot.lane.b32.xlu1 %v2681_v14, %s2463_s7 }
 0x554   :  { %874 = vrot.lane.b32.xlu1 %v2679_v11, %s2464_s17 }
 0x565   :  { %v734_v52 = vpop.xlane.xlu0 %733 }
 0x566   :  { %v740_v53 = vsub.f32 %v719_v36, %v734_v52 }
 0x568   :  { %v746_v54 = vmul.f32 1.442695, %v740_v53 }
 0x569   :  { %v737_v7 = vpop.xlane.xlu0 %736 }
 0x56a   :  { %2367 = vpow2.f32 %v746_v54  ;;  %v741_v10 = vsub.f32 %v722_v41, %v737_v7 }
 0x56c   :  { %v748_v55 = vmul.f32 1.442695, %v741_v10 }
 0x56e   :  { %2369 = vpow2.f32 %v748_v55 }
 0x574   :  { %v2368_v56 = vpop.eup %2367 }
 0x575   :  { %v756_v57 = vsel %vm474_vm3, %v2368_v56, 0.0 }
 0x576   :  { %757 = vadd.xlane.f32.xlu0 %v756_v57 }
 0x578   :  { %v2370_v58 = vpop.eup %2369 }
 0x579   :  { %v759_v59 = vsel %vm474_vm3, %v2370_v58, 0.0 }
 0x57a   :  { %760 = vadd.xlane.f32.xlu1 %v759_v59 }
 0x58b   :  { %925 = vrot.lane.b32.xlu1 %v2681_v14, %s2464_s17 }
 0x58c   :  { %772 = vrot.lane.b32.xlu0 %v2679_v11, %s2463_s7 }
 0x58f   :  { %923 = vrot.lane.b32.xlu1 %v2675_v1, %s2464_s17 }
 0x590   :  { %872 = vrot.lane.b32.xlu0 %v2677_v8, %s2464_s17 }
 0x5ca   :  { %v752_v63 = vpop.xlane.xlu0 %751 }
 0x5cc   :  { %v755_v60 = vpop.xlane.xlu1 %754 }
 0x5cd   :  { %2371 = vrcp.f32 %v755_v60 }
 0x5ce   :  { %2373 = vrcp.f32 %v752_v63 }
 0x5d0   :  { %v822_v61 = vpop.permute.xlu1 %821 }
 0x5d1   :  { %v827_v62 = vsel %vm526_vm4, %v822_v61, 0 }
 0x5d2   :  { %2217 = vmatpush3.bf16.msra.mxu1 %v827_v62 }
 0x5d3   :  { %2228 = vmatprep.subr.bf16.mxu1 %v2459_v31 }
 0x5d4   :  { %v875_v2 = vpop.permute.xlu1 %874 }
 0x5d5   :  { %v880_v24 = vsel %vm379_vm2, %v875_v2, 0 }
 0x5d7   :  { %v2372_v0 = vpop.eup %2371 }
 0x5d8   :  { %v2374_v12 = vpop.eup %2373  ;;  %v767_v13 = vmul.f32 %v2372_v0, %v2366_v50 }
 0x5d9   :  { %v766_v17 = vmul.f32 %v2374_v12, %v2364_v49 }
 0x5db   :  { %v770_v20 = vpack.c.bf16 %v767_v13, %v766_v17 }
 0x603   :  { %v758_v9 = vpop.xlane.xlu0 %757 }
 0x604   :  { %2375 = vrcp.f32 %v758_v9 }
 0x607   :  { %v761_v15 = vpop.xlane.xlu1 %760  ;;  %v773_v16 = vpop.permute.xlu0 %772 }
 0x608   :  { %2377 = vrcp.f32 %v761_v15  ;;  %v778_v18 = vsel %vm526_vm4, %v773_v16, 0 }
 0x609   :  { %2211 = vmatpush3.bf16.msra.mxu0 %v778_v18 }
 0x60a   :  { %2222 = vmatprep.subr.bf16.mxu0 %v2459_v31 }
 0x60b   :  { %v926_v28 = vpop.permute.xlu1 %925  ;;  %v873_v35 = vpop.permute.xlu0 %872 }
 0x60c   :  { %2213 = vmatmul.mubr.msk.bf16.vlgmr.msra.gmra.mrb[12].mxu0 %vm474_vm3, %v770_v20  ;;  %v931_v32 = vsel %vm379_vm2, %v926_v28, 0 }
 0x60d   :  { %2224 = vmatprep.mubr.msk.bf16.mxu0 %vm2460_vm1, %v2459_v31 }
 0x60e   :  { %v2376_v23 = vpop.eup %2375 }
 0x60f   :  { %v768_v26 = vmul.f32 %v2376_v23, %v2368_v56  ;;  %v924_v36 = vpop.permute.xlu1 %923 }
 0x612   :  { %v2378_v25 = vpop.eup %2377  ;;  %2223 = vmatpush3.bf16.xpose.msra.mxu0 %v880_v24 }
 0x613   :  { %v769_v27 = vmul.f32 %v2378_v25, %v2370_v58  ;;  %2234 = vmatprep.subr.bf16.mxu0 %v2459_v31 }
 0x615   :  { %v771_v29 = vpack.c.bf16 %v769_v27, %v768_v26 }
 0x617   :  { %2219 = vmatmul.mubr.msk.bf16.vlgmr.msra.gmra.mrb[20].mxu1 %vm474_vm3, %v771_v29 }
 0x618   :  { %2229 = vmatpush3.bf16.xpose.msra.mxu1 %v931_v32  ;;  %2230 = vmatprep.mubr.msk.bf16.mxu1 %vm2460_vm1, %v2459_v31 }
 0x619   :  { %2225 = vmatmul.mubr.msk.bf16.vlgmr.msra.gmra.mrb[16].mxu0 %vm379_vm2, %v873_v35  ;;  %2240 = vmatprep.subr.bf16.mxu1 %v2459_v31 }
 0x61a   :  { %2236 = vmatprep.mubr.msk.bf16.mxu0 %vm2460_vm1, %v2459_v31 }
 0x61f   :  { %2231 = vmatmul.mubr.msk.bf16.vlgmr.msra.gmra.mrb[24].mxu1 %vm379_vm2, %v924_v36 }
 0x620   :  { %2242 = vmatprep.mubr.msk.bf16.mxu1 %vm2460_vm1, %v2459_v31 }
 0x6df   :  { %v2779_v37 = vpop.f32.mrb[12].mxu0 }
 0x6e0   :  { %v2214_v40 = vpop.f32.mrb[13].mxu0 }
 0x6e1   :  { %v2781_v41 = vpop.f32.mrb[14].mxu0 }
 0x6e2   :  { %v870_v42 = vpack.c.bf16 %v2781_v41, %v2779_v37  ;;  %v2215_v43 = vpop.f32.mrb[15].mxu0 }
 0x6ea   :  { %v2785_v44 = vpop.f32.mrb[20].mxu1 }
 0x6eb   :  { %v2220_v45 = vpop.f32.mrb[21].mxu1 }
 0x6ec   :  { %v2787_v46 = vpop.f32.mrb[22].mxu1  ;;  %v916_v47 = vpop.f32.mrb[16].mxu0 }
 0x6ed   :  { %v871_v39 = vpack.c.bf16 %v2787_v46, %v2785_v44  ;;  %v2221_v48 = vpop.f32.mrb[23].mxu1  ;;  %v2226_v49 = vpop.f32.mrb[17].mxu0  ;;  %v974_v38 = vsel %vm474_vm3, %v916_v47, -inf }
 0x6ee   :  { %975 = vmax.xlane.f32.xlu0 %v974_v38  ;;  %v919_v50 = vpop.f32.mrb[18].mxu0 }
 0x6ef   :  { %v2227_v51 = vpop.f32.mrb[19].mxu0  ;;  %v977_v52 = vsel %vm474_vm3, %v919_v50, -inf }
 0x6f0   :  { %978 = vmax.xlane.f32.xlu1 %v977_v52 }
 0x6f2   :  { %v967_v53 = vpop.f32.mrb[24].mxu1 }
 0x6f3   :  { %v2232_v54 = vpop.f32.mrb[25].mxu1  ;;  %v980_v7 = vsel %vm474_vm3, %v967_v53, -inf }
 0x6f4   :  { %981 = vmax.xlane.f32.xlu0 %v980_v7  ;;  %v970_v10 = vpop.f32.mrb[26].mxu1 }
 0x6f5   :  { %v2233_v55 = vpop.f32.mrb[27].mxu1  ;;  %v983_v56 = vsel %vm474_vm3, %v970_v10, -inf }
 0x6f8   :  { %984 = vmax.xlane.f32.xlu0 %v983_v56 }
 0x77b   :  { %v976_v57 = vpop.xlane.xlu0 %975 }
 0x77c   :  { %v986_v58 = vsub.f32 %v916_v47, %v976_v57 }
 0x77d   :  { %v979_v59 = vpop.xlane.xlu1 %978 }
 0x77e   :  { %v990_v60 = vmul.f32 1.442695, %v986_v58  ;;  %v987_v61 = vsub.f32 %v919_v50, %v979_v59 }
 0x780   :  { %2379 = vpow2.f32 %v990_v60  ;;  %v992_v62 = vmul.f32 1.442695, %v987_v61 }
 0x781   :  { %v982_v63 = vpop.xlane.xlu0 %981 }
 0x782   :  { %2381 = vpow2.f32 %v992_v62  ;;  %v988_v0 = vsub.f32 %v967_v53, %v982_v63 }
 0x784   :  { %v994_v2 = vmul.f32 1.442695, %v988_v0 }
 0x785   :  { %v985_v18 = vpop.xlane.xlu0 %984 }
 0x786   :  { %2383 = vpow2.f32 %v994_v2  ;;  %v989_v20 = vsub.f32 %v970_v10, %v985_v18 }
 0x788   :  { %v996_v23 = vmul.f32 1.442695, %v989_v20 }
 0x78a   :  { %v2380_v9 = vpop.eup %2379  ;;  %2385 = vpow2.f32 %v996_v23 }
 0x78b   :  { %v998_v12 = vsel %vm474_vm3, %v2380_v9, 0.0 }
 0x78c   :  { %v2382_v13 = vpop.eup %2381  ;;  %999 = vadd.xlane.f32.xlu0 %v998_v12 }
 0x78d   :  { %v1001_v15 = vsel %vm474_vm3, %v2382_v13, 0.0 }
 0x78e   :  { %1002 = vadd.xlane.f32.xlu1 %v1001_v15 }
 0x790   :  { %v2384_v16 = vpop.eup %2383 }
 0x791   :  { %v1004_v17 = vsel %vm474_vm3, %v2384_v16, 0.0 }
 0x792   :  { %1005 = vadd.xlane.f32.xlu0 %v1004_v17 }
 0x794   :  { %v2386_v24 = vpop.eup %2385 }
 0x795   :  { %v1007_v25 = vsel %vm474_vm3, %v2386_v24, 0.0 }
 0x79f   :  { %1069 = vrot.lane.b32.xlu1 %v2681_v14, %s2465_s18 }
 0x7a3   :  { %1122 = vrot.lane.b32.xlu1 %v2679_v11, %s2466_s19 }
 0x7a8   :  { %1020 = vrot.lane.b32.xlu0 %v2679_v11, %s2465_s18 }
 0x7ac   :  { %1120 = vrot.lane.b32.xlu0 %v2677_v8, %s2466_s19 }
 0x7c7   :  { %1008 = vadd.xlane.f32.xlu1 %v1007_v25 }
 0x7d8   :  { %1173 = vrot.lane.b32.xlu1 %v2681_v14, %s2466_s19 }
 0x7dc   :  { %1171 = vrot.lane.b32.xlu1 %v2675_v1, %s2466_s19 }
 0x819   :  { %v1000_v26 = vpop.xlane.xlu0 %999 }
 0x81a   :  { %2387 = vrcp.f32 %v1000_v26 }
 0x81b   :  { %v1003_v27 = vpop.xlane.xlu1 %1002 }
 0x81c   :  { %2389 = vrcp.f32 %v1003_v27 }
 0x81f   :  { %v1070_v28 = vpop.permute.xlu1 %1069  ;;  %v1006_v29 = vpop.xlane.xlu0 %1005 }
 0x820   :  { %v1075_v8 = vsel %vm526_vm4, %v1070_v28, 0  ;;  %2391 = vrcp.f32 %v1006_v29 }
 0x821   :  { %2241 = vmatpush3.bf16.msra.mxu1 %v1075_v8 }
 0x822   :  { %2252 = vmatprep.subr.bf16.mxu1 %v2459_v31 }
 0x823   :  { %v1021_v32 = vpop.permute.xlu0 %1020  ;;  %v1123_v47 = vpop.permute.xlu1 %1122 }
 0x824   :  { %v2388_v35 = vpop.eup %2387  ;;  %v1026_v36 = vsel %vm526_vm4, %v1021_v32, 0  ;;  %v1128_v48 = vsel %vm379_vm2, %v1123_v47, 0 }
 0x825   :  { %2235 = vmatpush3.bf16.msra.mxu0 %v1026_v36  ;;  %v1014_v1 = vmul.f32 %v2388_v35, %v2380_v9 }
 0x826   :  { %v2390_v40 = vpop.eup %2389  ;;  %2246 = vmatprep.subr.bf16.mxu0 %v2459_v31 }
 0x827   :  { %v1015_v43 = vmul.f32 %v2390_v40, %v2382_v13  ;;  %v1121_v49 = vpop.permute.xlu0 %1120 }
 0x829   :  { %v1018_v45 = vpack.c.bf16 %v1015_v43, %v1014_v1 }
 0x82a   :  { %v2392_v50 = vpop.eup %2391 }
 0x82b   :  { %2237 = vmatmul.mubr.msk.bf16.vlgmr.msra.gmra.mrb[20].mxu0 %vm474_vm3, %v1018_v45  ;;  %v1016_v52 = vmul.f32 %v2392_v50, %v2384_v16 }
 0x82c   :  { %2248 = vmatprep.mubr.msk.bf16.mxu0 %vm2460_vm1, %v2459_v31 }
 0x82e   :  { %2247 = vmatpush3.bf16.xpose.msra.mxu0 %v1128_v48 }
 0x82f   :  { %2258 = vmatprep.subr.bf16.mxu0 %v2459_v31 }
 0x835   :  { %2249 = vmatmul.mubr.msk.bf16.vlgmr.msra.gmra.mrb[24].mxu0 %vm379_vm2, %v1121_v49 }
 0x836   :  { %2260 = vmatprep.mubr.msk.bf16.mxu0 %vm2460_vm1, %v2459_v31 }
 0x854   :  { %v1009_v38 = vpop.xlane.xlu1 %1008 }
 0x855   :  { %2393 = vrcp.f32 %v1009_v38 }
 0x858   :  { %v1174_v54 = vpop.permute.xlu1 %1173 }
 0x859   :  { %v1179_v10 = vsel %vm379_vm2, %v1174_v54, 0 }
 0x85c   :  { %v1172_v55 = vpop.permute.xlu1 %1171 }
 0x85f   :  { %v2394_v51 = vpop.eup %2393 }
 0x860   :  { %v1017_v53 = vmul.f32 %v2394_v51, %v2386_v24 }
 0x862   :  { %v1019_v7 = vpack.c.bf16 %v1017_v53, %v1016_v52 }
 0x864   :  { %2243 = vmatmul.mubr.msk.bf16.vlgmr.msra.gmra.mrb[28].mxu1 %vm474_vm3, %v1019_v7 }
 0x865   :  { %2253 = vmatpush3.bf16.xpose.msra.mxu1 %v1179_v10  ;;  %2254 = vmatprep.mubr.msk.bf16.mxu1 %vm2460_vm1, %v2459_v31 }
 0x866   :  { %2264 = vmatprep.subr.bf16.mxu1 %v2459_v31 }
 0x86c   :  { %2255 = vmatmul.mubr.msk.bf16.vlgmr.msra.gmra.mrb[32].mxu1 %vm379_vm2, %v1172_v55 }
 0x86d   :  { %2266 = vmatprep.mubr.msk.bf16.mxu1 %vm2460_vm1, %v2459_v31 }
 0x8fe   :  { %v1062_v56 = vpop.f32.mrb[20].mxu0 }
 0x8ff   :  { %v2238_v57 = vpop.f32.mrb[21].mxu0 }
 0x900   :  { %v1065_v58 = vpop.f32.mrb[22].mxu0 }
 0x901   :  { %v1118_v59 = vpack.c.bf16 %v1065_v58, %v1062_v56  ;;  %v2239_v60 = vpop.f32.mrb[23].mxu0 }
 0x908   :  { %v1164_v61 = vpop.f32.mrb[24].mxu0 }
 0x909   :  { %v2250_v62 = vpop.f32.mrb[25].mxu0  ;;  %v1222_v63 = vsel %vm474_vm3, %v1164_v61, -inf }
 0x90a   :  { %1223 = vmax.xlane.f32.xlu0 %v1222_v63  ;;  %v1167_v0 = vpop.f32.mrb[26].mxu0  ;;  %v2303_v62 = vld [vmem:[%s3082_s8] sm:$0xff]   ;;  %v2304_v63 = vld [vmem:[%s3082_s8 + $0x8] sm:$0xff]  }
 0x90b   :  { %v2251_v2 = vpop.f32.mrb[27].mxu0  ;;  %v1225_v9 = vsel %vm474_vm3, %v1167_v0, -inf }
 0x90c   :  { %1226 = vmax.xlane.f32.xlu1 %v1225_v9  ;;  %v2306_v2 = vld [vmem:[%s3082_s8 + $0x18] sm:$0xff]  }
 0x937   :  { %v1111_v12 = vpop.f32.mrb[28].mxu1 }
 0x938   :  { %v2244_v13 = vpop.f32.mrb[29].mxu1 }
 0x939   :  { %v1114_v15 = vpop.f32.mrb[30].mxu1 }
 0x93a   :  { %v1119_v16 = vpack.c.bf16 %v1114_v15, %v1111_v12  ;;  %v2245_v31 = vpop.f32.mrb[31].mxu1 }
 0x93f   :  { %v1215_v17 = vpop.f32.mrb[32].mxu1 }
 0x940   :  { %v2256_v18 = vpop.f32.mrb[33].mxu1  ;;  %v1228_v20 = vsel %vm474_vm3, %v1215_v17, -inf }
 0x941   :  { %1229 = vmax.xlane.f32.xlu0 %v1228_v20  ;;  %v1218_v23 = vpop.f32.mrb[34].mxu1 }
 0x942   :  { %v2257_v24 = vpop.f32.mrb[35].mxu1  ;;  %v1231_v25 = vsel %vm474_vm3, %v1218_v23, -inf }
 0x945   :  { %1232 = vmax.xlane.f32.xlu0 %v1231_v25 }
 0x997   :  { %v1224_v26 = vpop.xlane.xlu0 %1223 }
 0x998   :  { %v1234_v27 = vsub.f32 %v1164_v61, %v1224_v26 }
 0x999   :  { %v1227_v28 = vpop.xlane.xlu1 %1226 }
 0x99a   :  { %v1238_v29 = vmul.f32 1.442695, %v1234_v27  ;;  %v1235_v8 = vsub.f32 %v1167_v0, %v1227_v28  ;;  %v2305_v0 = vld [vmem:[%s3082_s8 + $0x10] sm:$0xff]  }
 0x99c   :  { %2395 = vpow2.f32 %v1238_v29  ;;  %v1240_v32 = vmul.f32 1.442695, %v1235_v8 }
 0x99e   :  { %2397 = vpow2.f32 %v1240_v32 }
 0x9a6   :  { %v2396_v35 = vpop.eup %2395 }
 0x9a7   :  { %v1246_v36 = vsel %vm474_vm3, %v2396_v35, 0.0 }
 0x9a8   :  { %v2398_v40 = vpop.eup %2397  ;;  %1247 = vadd.xlane.f32.xlu0 %v1246_v36 }
 0x9a9   :  { %v1249_v1 = vsel %vm474_vm3, %v2398_v40, 0.0 }
 0x9aa   :  { %1250 = vadd.xlane.f32.xlu1 %v1249_v1 }
 0x9ce   :  { %v1230_v43 = vpop.xlane.xlu0 %1229 }
 0x9cf   :  { %v1236_v45 = vsub.f32 %v1215_v17, %v1230_v43 }
 0x9d1   :  { %v1242_v47 = vmul.f32 1.442695, %v1236_v45 }
 0x9d2   :  { %v1233_v48 = vpop.xlane.xlu0 %1232 }
 0x9d3   :  { %2399 = vpow2.f32 %v1242_v47  ;;  %v1237_v49 = vsub.f32 %v1218_v23, %v1233_v48 }
 0x9d5   :  { %v1244_v38 = vmul.f32 1.442695, %v1237_v49 }
 0x9d7   :  { %2401 = vpow2.f32 %v1244_v38 }
 0x9dd   :  { %v2400_v50 = vpop.eup %2399 }
 0x9de   :  { %v1252_v51 = vsel %vm474_vm3, %v2400_v50, 0.0 }
 0x9df   :  { %1253 = vadd.xlane.f32.xlu0 %v1252_v51 }
 0x9e1   :  { %v2402_v52 = vpop.eup %2401 }
 0x9e2   :  { %v1255_v53 = vsel %vm474_vm3, %v2402_v52, 0.0 }
 0x9e3   :  { %1256 = vadd.xlane.f32.xlu1 %v1255_v53 }
 0x9f4   :  { %1317 = vrot.lane.b32.xlu1 %v2681_v14, %s2467_s6 }
 0x9f5   :  { %1268 = vrot.lane.b32.xlu0 %v2679_v11, %s2467_s6 }
 0x9f8   :  { %1370 = vrot.lane.b32.xlu1 %v870_v42, %s2467_s6 }
 0x9f9   :  { %1376 = vrot.lane.b32.xlu0 %v1118_v59, %s2465_s18 }
 0x9fc   :  { %1372 = vrot.lane.b32.xlu1 %v871_v39, %s2467_s6 }
 0xa00   :  { %1378 = vrot.lane.b32.xlu1 %v1119_v16, %s2465_s18 }
 0xa35   :  { %v1248_v7 = vpop.xlane.xlu0 %1247 }
 0xa37   :  { %v1251_v54 = vpop.xlane.xlu1 %1250 }
 0xa38   :  { %2403 = vrcp.f32 %v1251_v54 }
 0xa39   :  { %2405 = vrcp.f32 %v1248_v7 }
 0xa42   :  { %v2404_v10 = vpop.eup %2403 }
 0xa43   :  { %v2406_v55 = vpop.eup %2405  ;;  %v1263_v11 = vmul.f32 %v2404_v10, %v2398_v40 }
 0xa44   :  { %v1262_v41 = vmul.f32 %v2406_v55, %v2396_v35 }
 0xa46   :  { %v1266_v44 = vpack.c.bf16 %v1263_v11, %v1262_v41  ;;  %v2310_v41 = vld [vmem:[%s3086_s12 + $0x10] ss:$8 sps:$4 sm:$0xff]  }
 0xa6c   :  { %v1254_v14 = vpop.xlane.xlu0 %1253 }
 0xa6d   :  { %2407 = vrcp.f32 %v1254_v14 }
 0xa70   :  { %v1257_v56 = vpop.xlane.xlu1 %1256  ;;  %v1269_v37 = vpop.permute.xlu0 %1268 }
 0xa71   :  { %2409 = vrcp.f32 %v1257_v56  ;;  %v1274_v42 = vsel %vm526_vm4, %v1269_v37, 0  ;;  %v2307_v56 = vld [vmem:[%s3086_s12] ss:$8 sps:$4 sm:$0xff]   ;;  %v2312_v37 = vld [vmem:[%s3086_s12 + $0x14] ss:$8 sps:$4 sm:$0xff]  }
 0xa72   :  { %2259 = vmatpush3.bf16.msra.mxu0 %v1274_v42  ;;  %v2315_v42 = vld [vmem:[%s3086_s12 + $0x24] ss:$8 sps:$4 sm:$0xff]  }
 0xa73   :  { %2270 = vmatprep.subr.bf16.mxu0 %v2303_v62 }
 0xa74   :  { %v1318_v46 = vpop.permute.xlu1 %1317  ;;  %v1377_v25 = vpop.permute.xlu0 %1376 }
 0xa75   :  { %v1323_v39 = vsel %vm526_vm4, %v1318_v46, 0  ;;  %2261 = vmatmul.mubr.msk.bf16.vlgmr.msra.gmra.mrb[28].mxu0 %vm474_vm3, %v1266_v44  ;;  %v2313_v44 = vld [vmem:[%s3086_s12 + $0x20] ss:$8 sps:$4 sm:$0xff]   ;;  %v2318_v46 = vld [vmem:[%s3086_s12 + $0x34] ss:$8 sps:$4 sm:$0xff]  }
 0xa76   :  { %2265 = vmatpush3.bf16.msra.mxu1 %v1323_v39  ;;  %2271 = vmatpush3.bf16.msra.mxu0 %v2303_v62  ;;  %v2316_v39 = vld [vmem:[%s3086_s12 + $0x30] ss:$8 sps:$4 sm:$0xff]  }
 0xa77   :  { %v2408_v57 = vpop.eup %2407  ;;  %2272 = vmatprep.subr.bf16.mxu0 %v2304_v63 }
 0xa78   :  { %v1264_v59 = vmul.f32 %v2408_v57, %v2400_v50  ;;  %v1371_v24 = vpop.permute.xlu1 %1370  ;;  %v2468_v57 = vmov 0  }
 0xa79   :  { %v1388_v26 = vsel %vm379_vm2, %v620_v22, %v1371_v24 }
 0xa7a   :  { %2273 = vmatpush3.bf16.msra.mxu0 %v2304_v63  ;;  %v1394_v27 = vsel %vm1392_vm5, %v1388_v26, %v1377_v25 }
 0xa7b   :  { %v2410_v58 = vpop.eup %2409  ;;  %2274 = vmatprep.subr.bf16.mxu0 %v2305_v0 }
 0xa7c   :  { %v1265_v60 = vmul.f32 %v2410_v58, %v2402_v52  ;;  %v1373_v29 = vpop.permute.xlu1 %1372 }
 0xa7d   :  { %v1391_v35 = vsel %vm379_vm2, %v621_v34, %v1373_v29 }
 0xa7e   :  { %v1267_v61 = vpack.c.bf16 %v1265_v60, %v1264_v59  ;;  %2275 = vmatpush3.bf16.msra.mxu0 %v2305_v0 }
 0xa7f   :  { %2276 = vmatprep.subr.bf16.mxu0 %v2306_v2 }
 0xa80   :  { %2267 = vmatmul.mubr.msk.bf16.vlgmr.msra.gmra.mrb[36].mxu1 %vm474_vm3, %v1267_v61  ;;  %v1379_v32 = vpop.permute.xlu1 %1378 }
 0xa81   :  { %v1396_v36 = vsel %vm1392_vm5, %v1391_v35, %v1379_v32  ;;  %1684 = vmatprep.mubr.bf16.mxu1 %v2468_v57 }
 0xa82   :  { %2277 = vmatpush3.bf16.msra.mxu0 %v2306_v2 }
 0xb48   :  { %v1310_v9 = vpop.f32.mrb[28].mxu0 }
 0xb49   :  { %v2262_v12 = vpop.f32.mrb[29].mxu0 }
 0xb4a   :  { %v1313_v13 = vpop.f32.mrb[30].mxu0 }
 0xb4b   :  { %v1366_v15 = vpack.c.bf16 %v1313_v13, %v1310_v9  ;;  %v2263_v16 = vpop.f32.mrb[31].mxu0 }
 0xb4d   :  { %1382 = vrot.lane.b32.xlu0 %v1366_v15, %s2463_s7 }
 0xb53   :  { %v1359_v31 = vpop.f32.mrb[36].mxu1 }
 0xb54   :  { %v2268_v17 = vpop.f32.mrb[37].mxu1 }
 0xb55   :  { %v1362_v18 = vpop.f32.mrb[38].mxu1 }
 0xb56   :  { %v1367_v20 = vpack.c.bf16 %v1362_v18, %v1359_v31  ;;  %v2269_v23 = vpop.f32.mrb[39].mxu1 }
 0xb58   :  { %1384 = vrot.lane.b32.xlu1 %v1367_v20, %s2463_s7 }
 0xbbf   :  { %v1383_v28 = vpop.permute.xlu0 %1382 }
 0xbc0   :  { %v1399_v8 = vsel %vm1397_vm6, %v1394_v27, %v1383_v28 }
 0xbc1   :  { %2278 = vmatprep.mubr.msk.bf16.mxu0 %vm69_vm0, %v1399_v8 }
 0xbca   :  { %v1385_v40 = vpop.permute.xlu1 %1384 }
 0xbcb   :  { %v1401_v1 = vsel %vm1397_vm6, %v1396_v36, %v1385_v40 }
 0xbcc   :  { %2279 = vmatmul.mubr.msk.bf16.vlgmr.msra.gmra.mrb[32].mxu0 %vm69_vm0, %v1401_v1 }
 0xc9f   :  { %v2280_v21 = vpop.f32.mrb[32].mxu0 }
 0xca0   :  { %v1479_v22 = vpop.f32.mrb[33].mxu0 }
 0xca1   :  { %v1480_v43 = vadd.f32 %v2022_v19, %v1479_v22  ;;  %v2281_v45 = vpop.f32.mrb[34].mxu0 }
 0xca2   :  { %v1482_v47 = vpop.f32.mrb[35].mxu0  ;;  %v1491_v30 = vadd.f32 %v2281_v45, %v2022_v19 }
 0xca3   :  { %v2877_v48 = vadd.f32 %v2568_v4, %v1480_v43  ;;  %v1483_v33 = vadd.f32 %v2022_v19, %v1482_v47  ;;  %v1488_v4 = vadd.f32 %v2280_v21, %v2022_v19  ;;  %v2029_v47 = vld [vmem:[%s3084_s10] ss:$0 sm:$0xff] }
 0xca4   :  { %v2887_v50 = vadd.f32 %v2570_v5, %v1491_v30 }
 0xca5   :  { %v2880_v34 = vadd.f32 %v2572_v6, %v1483_v33  ;;  %v1500_v49 = vsel %vm69_vm0, %v2877_v48, 0.0  ;;  %v1516_v38 = vmul.f32 %v2877_v48, %v2877_v48  ;;  %v2899_v5 = vadd.f32 %v2566_v3, %v1488_v4  ;;  %v2309_v3 = vld [vmem:[%s3086_s12 + $0x4] ss:$8 sps:$4 sm:$0xff]   ;;  %v2030_v4 = vld [vmem:[%s3085_s11] ss:$0 sm:$0xff] }
 0xca6   :  { %1501 = vadd.xlane.f32.xlu0 %v1500_v49  ;;  %v1509_v53 = vsel %vm69_vm0, %v2887_v50, 0.0  ;;  %v1519_v54 = vmul.f32 %v2887_v50, %v2887_v50  ;;  %1652 = vmatprep.subr.bf16.mxu1 %v2309_v3 }
 0xca7   :  { %v1503_v51 = vsel %vm69_vm0, %v2880_v34, 0.0  ;;  %v1520_v52 = vsel %vm69_vm0, %v1516_v38, 0.0  ;;  %v1517_v6 = vmul.f32 %v2880_v34, %v2880_v34  ;;  %v1506_v14 = vsel %vm69_vm0, %v2899_v5, 0.0  ;;  %1653 = vmatpush1.bf16.msra.mxu1 %v2307_v56 }
 0xca8   :  { %1504 = vadd.xlane.f32.xlu1 %v1503_v51  ;;  %v1529_v10 = vsel %vm69_vm0, %v1519_v54, 0.0  ;;  %v1518_v55 = vmul.f32 %v2899_v5, %v2899_v5  ;;  %1654 = vmatprep.subr.bf16.mxu1 %v2312_v37 }
 0xca9   :  { %v1523_v7 = vsel %vm69_vm0, %v1517_v6, 0.0 }
 0xcaa   :  { %1521 = vadd.xlane.f32.xlu0 %v1520_v52  ;;  %v1526_v11 = vsel %vm69_vm0, %v1518_v55, 0.0 }
 0xcab   :  { %1655 = vmatpush1.bf16.msra.mxu1 %v2310_v41 }
 0xcac   :  { %1510 = vadd.xlane.f32.xlu1 %v1509_v53  ;;  %1656 = vmatprep.subr.bf16.mxu1 %v2315_v42 }
 0xcae   :  { %1524 = vadd.xlane.f32.xlu0 %v1523_v7 }
 0xcaf   :  { %1657 = vmatpush1.bf16.msra.mxu1 %v2313_v44  ;;  %v2319_v44 = vld [vmem:[%s3088_s14 + $0x40] sm:$0xff]  }
 0xcb0   :  { %1530 = vadd.xlane.f32.xlu1 %v1529_v10  ;;  %1658 = vmatprep.subr.bf16.mxu1 %v2318_v46  ;;  %v2320_v46 = vld [vmem:[%s3088_s14] sm:$0xff]  }
 0xcb1   :  { %2122 = vmatprep.subr.bf16.mxu0 %v2319_v44 }
 0xcb2   :  { %1507 = vadd.xlane.f32.xlu0 %v1506_v14  ;;  %2123 = vmatpush3.bf16.msra.mxu0 %v2320_v46 }
 0xcb3   :  { %1659 = vmatpush1.bf16.msra.mxu1 %v2316_v39  ;;  %v2321_v39 = vld [vmem:[%s3088_s14 + $0x48] sm:$0xff]  }
 0xcb4   :  { %2124 = vmatprep.subr.bf16.mxu0 %v2321_v39 }
 0xcb6   :  { %1527 = vadd.xlane.f32.xlu0 %v1526_v11 }
 0xd33   :  { %v1502_v58 = vpop.xlane.xlu0 %1501 }
 0xd34   :  { %v1512_v59 = vmul.f32 0.015625, %v1502_v58  ;;  %v2323_v58 = vld [vmem:[%s3088_s14 + $0x50] sm:$0xff]  }
 0xd35   :  { %v1505_v60 = vpop.xlane.xlu1 %1504 }
 0xd36   :  { %v1536_v62 = vmul.f32 %v1512_v59, %v1512_v59  ;;  %v1513_v63 = vmul.f32 0.015625, %v1505_v60  ;;  %v1556_v21 = vsub.f32 %v2877_v48, %v1512_v59  ;;  %v2324_v59 = vld [vmem:[%s3088_s14 + $0x10] sm:$0xff]   ;;  %v2325_v60 = vld [vmem:[%s3088_s14 + $0x58] sm:$0xff]  }
 0xd37   :  { %v1522_v61 = vpop.xlane.xlu0 %1521 }
 0xd38   :  { %v1532_v0 = vmul.f32 0.015625, %v1522_v61  ;;  %v1537_v15 = vmul.f32 %v1513_v63, %v1513_v63  ;;  %v1557_v30 = vsub.f32 %v2880_v34, %v1513_v63  ;;  %v2326_v61 = vld [vmem:[%s3088_s14 + $0x18] sm:$0xff]   ;;  %v2328_v63 = vld [vmem:[%s3088_s14 + $0x20] sm:$0xff]  }
 0xd39   :  { %v1511_v2 = vpop.xlane.xlu1 %1510 }
 0xd3a   :  { %v1540_v9 = vsub.f32 %v1532_v0, %v1536_v62  ;;  %v1515_v12 = vmul.f32 0.015625, %v1511_v2  ;;  %v2327_v62 = vld [vmem:[%s3088_s14 + $0x60] sm:$0xff]   ;;  %v2329_v0 = vld [vmem:[%s3088_s14 + $0x68] sm:$0xff]  }
 0xd3b   :  { %v1525_v13 = vpop.xlane.xlu0 %1524  ;;  %v2330_v2 = vld [vmem:[%s3088_s14 + $0x28] sm:$0xff]  }
 0xd3c   :  { %v1544_v16 = vmax.f32 %v1540_v9, 0.0  ;;  %v1533_v31 = vmul.f32 0.015625, %v1525_v13  ;;  %v1539_v20 = vmul.f32 %v1515_v12, %v1515_v12  ;;  %v1559_v52 = vsub.f32 %v2887_v50, %v1515_v12  ;;  %v2331_v9 = vld [vmem:[%s3088_s14 + $0x70] sm:$0xff]   ;;  %v2333_v13 = vld [vmem:[%s3088_s14 + $0x78] sm:$0xff]  }
 0xd3d   :  { %v1531_v17 = vpop.xlane.xlu1 %1530  ;;  %v2332_v12 = vld [vmem:[%s3088_s14 + $0x30] sm:$0xff]  }
 0xd3e   :  { %v1548_v18 = vadd.f32 1e-05, %v1544_v16  ;;  %v1541_v23 = vsub.f32 %v1533_v31, %v1537_v15  ;;  %v1535_v24 = vmul.f32 0.015625, %v1531_v17  ;;  %v2334_v15 = vld [vmem:[%s3088_s14 + $0x38] sm:$0xff]   ;;  %v1596_v16 = vlaneseq }
 0xd3f   :  { %v1508_v25 = vpop.xlane.xlu0 %1507 }
 0xd40   :  { %2411 = vrsqrt.f32 %v1548_v18  ;;  %v1545_v26 = vmax.f32 %v1541_v23, 0.0  ;;  %v1543_v27 = vsub.f32 %v1535_v24, %v1539_v20  ;;  %v1514_v28 = vmul.f32 0.015625, %v1508_v25  ;;  %v1594_v18 = vld [vmem:[%s3087_s13] sm:$0x3] }
 0xd41   :  { %v1597_v31 = vshrl.u32 %v1596_v16, 7 }
 0xd42   :  { %v1549_v29 = vadd.f32 1e-05, %v1545_v26  ;;  %v1547_v8 = vmax.f32 %v1543_v27, 0.0  ;;  %v1538_v36 = vmul.f32 %v1514_v28, %v1514_v28  ;;  %v1558_v10 = vsub.f32 %v2899_v5, %v1514_v28 }
 0xd43   :  { %v1528_v32 = vpop.xlane.xlu0 %1527  ;;  %v1598_v17 = vsub.s32 0, %v1597_v31  ;;  %v1602_v20 = vsub.s32 1, %v1597_v31 }
 0xd44   :  { %2413 = vrsqrt.f32 %v1549_v29  ;;  %v1551_v35 = vadd.f32 1e-05, %v1547_v8  ;;  %v1534_v40 = vmul.f32 0.015625, %v1528_v32 }
 0xd45   :  { %v1599_v23 = vrot.slane %v1594_v18, %v1598_v17  ;;  %v1603_v24 = vrot.slane %v1594_v18, %v1602_v20 }
 0xd46   :  { %2415 = vrsqrt.f32 %v1551_v35  ;;  %v1542_v1 = vsub.f32 %v1534_v40, %v1538_v36 }
 0xd48   :  { %v1546_v19 = vmax.f32 %v1542_v1, 0.0 }
 0xd4a   :  { %v2412_v22 = vpop.eup %2411  ;;  %v1550_v43 = vadd.f32 1e-05, %v1546_v19 }
 0xd4b   :  { %v1560_v45 = vmul.f32 %v2412_v22, %v1556_v21 }
 0xd4c   :  { %2417 = vrsqrt.f32 %v1550_v43 }
 0xd4d   :  { %v1570_v38 = vmul.f32 %v2029_v47, %v1560_v45 }
 0xd4e   :  { %v2414_v33 = vpop.eup %2413 }
 0xd4f   :  { %v1561_v49 = vmul.f32 %v2414_v33, %v1557_v30  ;;  %v1580_v53 = vadd.f32 %v2030_v4, %v1570_v38 }
 0xd50   :  { %v2416_v51 = vpop.eup %2415 }
 0xd51   :  { %v1571_v6 = vmul.f32 %v2029_v47, %v1561_v49  ;;  %v1563_v7 = vmul.f32 %v2416_v51, %v1559_v52 }
 0xd53   :  { %v1581_v54 = vadd.f32 %v2030_v4, %v1571_v6  ;;  %v1573_v3 = vmul.f32 %v2029_v47, %v1563_v7 }
 0xd55   :  { %v1584_v14 = vpack.c.bf16 %v1581_v54, %v1580_v53  ;;  %v1583_v41 = vadd.f32 %v2030_v4, %v1573_v3 }
 0xd56   :  { %v2418_v55 = vpop.eup %2417 }
 0xd57   :  { %2039 = vmatmul.mubr.msk.bf16.vlgmr.msra.gmra.mrb[40].mxu1 %vm69_vm0, %v1584_v14  ;;  %v1562_v11 = vmul.f32 %v2418_v55, %v1558_v10 }
 0xd58   :  { %1694 = vmatprep.mubr.bf16.mxu1 %v2468_v57  ;;  %v2322_v57 = vld [vmem:[%s3088_s14 + $0x8] sm:$0xff]  }
 0xd59   :  { %v1572_v56 = vmul.f32 %v2029_v47, %v1562_v11  ;;  %2125 = vmatpush3.bf16.msra.mxu0 %v2322_v57 }
 0xd5a   :  { %2126 = vmatprep.subr.bf16.mxu0 %v2323_v58 }
 0xd5b   :  { %v1582_v37 = vadd.f32 %v2030_v4, %v1572_v56 }
 0xd5d   :  { %v1585_v42 = vpack.c.bf16 %v1583_v41, %v1582_v37  ;;  %2127 = vmatpush3.bf16.msra.mxu0 %v2324_v59 }
 0xd5e   :  { %2128 = vmatprep.subr.bf16.mxu0 %v2325_v60 }
 0xd5f   :  { %2040 = vmatmul.mubr.msk.bf16.gmra.mrb[44].mxu1 %vm69_vm0, %v1585_v42 }
 0xd61   :  { %2129 = vmatpush3.bf16.msra.mxu0 %v2326_v61 }
 0xd62   :  { %2130 = vmatprep.subr.bf16.mxu0 %v2327_v62 }
 0xd65   :  { %2131 = vmatpush3.bf16.msra.mxu0 %v2328_v63 }
 0xd66   :  { %2132 = vmatprep.subr.bf16.mxu0 %v2329_v0 }
 0xd69   :  { %2133 = vmatpush3.bf16.msra.mxu0 %v2330_v2 }
 0xd6a   :  { %2134 = vmatprep.subr.bf16.mxu0 %v2331_v9 }
 0xd6d   :  { %2135 = vmatpush3.bf16.msra.mxu0 %v2332_v12 }
 0xd6e   :  { %2136 = vmatprep.subr.bf16.mxu0 %v2333_v13 }
 0xd71   :  { %2137 = vmatpush3.bf16.msra.mxu0 %v2334_v15 }
 0xe2a   :  { %v1686_v25 = vpop.f32.mrb[40].mxu1 }
 0xe2b   :  { %v2995_v26 = vadd.f32 %v1686_v25, %v1599_v23  ;;  %v1688_v27 = vpop.f32.mrb[41].mxu1 }
 0xe2c   :  { %v2997_v28 = vadd.f32 %v1688_v27, %v1603_v24  ;;  %v1690_v29 = vpop.f32.mrb[42].mxu1 }
 0xe2d   :  { %v1705_v8 = vmul.f32 %v2995_v26, %v2995_v26  ;;  %v3001_v32 = vadd.f32 %v1690_v29, %v1599_v23  ;;  %v1692_v35 = vpop.f32.mrb[43].mxu1 }
 0xe2e   :  { %v1706_v36 = vmul.f32 %v2997_v28, %v2997_v28  ;;  %v3005_v40 = vadd.f32 %v1692_v35, %v1603_v24 }
 0xe2f   :  { %v1713_v1 = vmul.f32 %v1705_v8, %v2995_v26  ;;  %v1707_v19 = vmul.f32 %v3001_v32, %v3001_v32 }
 0xe30   :  { %v1714_v21 = vmul.f32 %v1706_v36, %v2997_v28  ;;  %v1708_v22 = vmul.f32 %v3005_v40, %v3005_v40 }
 0xe31   :  { %v1721_v43 = vmul.f32 0.044715, %v1713_v1  ;;  %v1715_v45 = vmul.f32 %v1707_v19, %v3001_v32 }
 0xe32   :  { %v1722_v47 = vmul.f32 0.044715, %v1714_v21  ;;  %v1716_v30 = vmul.f32 %v1708_v22, %v3005_v40  ;;  %v1696_v33 = vpop.f32.mrb[44].mxu1 }
 0xe33   :  { %v1729_v49 = vadd.f32 %v1721_v43, %v2995_v26  ;;  %v1723_v38 = vmul.f32 0.044715, %v1715_v45  ;;  %v3016_v51 = vadd.f32 %v1696_v33, %v1599_v23  ;;  %v1698_v4 = vpop.f32.mrb[45].mxu1 }
 0xe34   :  { %v1730_v52 = vadd.f32 %v1722_v47, %v2997_v28  ;;  %v1724_v6 = vmul.f32 0.044715, %v1716_v30  ;;  %v3019_v53 = vadd.f32 %v1698_v4, %v1603_v24  ;;  %v1700_v54 = vpop.f32.mrb[46].mxu1 }
 0xe35   :  { %v1737_v7 = vmul.f32 0.7978846, %v1729_v49  ;;  %v1731_v10 = vadd.f32 %v1723_v38, %v3001_v32  ;;  %v1709_v14 = vmul.f32 %v3016_v51, %v3016_v51  ;;  %v3024_v55 = vadd.f32 %v1700_v54, %v1599_v23  ;;  %v1702_v11 = vpop.f32.mrb[47].mxu1 }
 0xe36   :  { %v1738_v3 = vmul.f32 0.7978846, %v1730_v52  ;;  %v1732_v56 = vadd.f32 %v1724_v6, %v3005_v40  ;;  %v1710_v37 = vmul.f32 %v3019_v53, %v3019_v53  ;;  %v3029_v41 = vadd.f32 %v1702_v11, %v1603_v24 }
 0xe37   :  { %2419 = vtanh.f32 %v1737_v7  ;;  %v1739_v42 = vmul.f32 0.7978846, %v1731_v10  ;;  %v1717_v44 = vmul.f32 %v1709_v14, %v3016_v51  ;;  %v1711_v46 = vmul.f32 %v3024_v55, %v3024_v55 }
 0xe38   :  { %2421 = vtanh.f32 %v1738_v3  ;;  %v1740_v39 = vmul.f32 0.7978846, %v1732_v56  ;;  %v1718_v57 = vmul.f32 %v1710_v37, %v3019_v53  ;;  %v1712_v58 = vmul.f32 %v3029_v41, %v3029_v41 }
 0xe39   :  { %2423 = vtanh.f32 %v1739_v42  ;;  %v1725_v59 = vmul.f32 0.044715, %v1717_v44  ;;  %v1719_v60 = vmul.f32 %v1711_v46, %v3024_v55  ;;  %v2041_v44 = vld [vmem:[%s3089_s15] ss:$0 sm:$0xff]  ;;  %s2469_s15 = smov [#allocation2]  }
 0xe3a   :  { %2425 = vtanh.f32 %v1740_v39  ;;  %v1726_v61 = vmul.f32 0.044715, %v1718_v57  ;;  %v1720_v62 = vmul.f32 %v1712_v58, %v3029_v41  ;;  %s1978_s9 = sshll.u32 %s2469_s15, 4  ;;  %s1979_s9 = int_to_ptr.vmem [resolvable:$true] %s1978_s9 }
 0xe3b   :  { %v1733_v63 = vadd.f32 %v1725_v59, %v3016_v51  ;;  %v1727_v0 = vmul.f32 0.044715, %v1719_v60  ;;  %s2435_s27 = scalar_lea.vmem %s1979_s9, 512  ;;  %p2440_p1 = scmp.lt.s32.totalorder %s1979_s9, %s1979_s9 }
 0xe3c   :  { %v1734_v2 = vadd.f32 %v1726_v61, %v3019_v53  ;;  %v1728_v9 = vmul.f32 0.044715, %v1720_v62  ;;  %p2436_p0 = scmp.ne.s32.totalorder %s1979_s9, %s2435_s27  ;;  %p2441_p2 = scmp.lt.s32.totalorder %s2435_s27, %s2435_s27 }
 0xe3d   :  { %v1741_v12 = vmul.f32 0.7978846, %v1733_v63  ;;  %v1735_v13 = vadd.f32 %v1727_v0, %v3024_v55 }
 0xe3e   :  { %v1742_v15 = vmul.f32 0.7978846, %v1734_v2  ;;  %v1736_v16 = vadd.f32 %v1728_v9, %v3029_v41  ;;  %p2442_p3 = por %p2441_p2, %p2440_p1 }
 0xe3f   :  { %2427 = vtanh.f32 %v1741_v12  ;;  %v1743_v31 = vmul.f32 0.7978846, %v1735_v13 }
 0xe40   :  { %2429 = vtanh.f32 %v1742_v15  ;;  %v1744_v17 = vmul.f32 0.7978846, %v1736_v16  ;;  %p2443_p4 = pnand %p2442_p3, %p2436_p0 }
 0xe41   :  { %v2420_v18 = vpop.eup %2419  ;;  %2431 = vtanh.f32 %v1743_v31 }
 0xe42   :  { %v2422_v20 = vpop.eup %2421  ;;  %v1753_v23 = vadd.f32 1.0, %v2420_v18  ;;  %2433 = vtanh.f32 %v1744_v17 }
 0xe43   :  { %v2424_v24 = vpop.eup %2423  ;;  %v1754_v25 = vadd.f32 1.0, %v2422_v20 }
 0xe44   :  { %v2426_v27 = vpop.eup %2425  ;;  %v1761_v29 = vmul.f32 0.5, %v1753_v23  ;;  %v1755_v8 = vadd.f32 1.0, %v2424_v24 }
 0xe45   :  { %v1756_v35 = vadd.f32 1.0, %v2426_v27  ;;  %v1762_v36 = vmul.f32 0.5, %v1754_v25 }
 0xe46   :  { %v1763_v1 = vmul.f32 0.5, %v1755_v8  ;;  %v1769_v21 = vmul.f32 %v1761_v29, %v2995_v26 }
 0xe47   :  { %v1764_v19 = vmul.f32 0.5, %v1756_v35  ;;  %v1770_v45 = vmul.f32 %v1762_v36, %v2997_v28 }
 0xe48   :  { %v1771_v22 = vmul.f32 %v1763_v1, %v3001_v32 }
 0xe49   :  { %v2428_v43 = vpop.eup %2427  ;;  %v1772_v47 = vmul.f32 %v1764_v19, %v3005_v40 }
 0xe4a   :  { %v2430_v30 = vpop.eup %2429  ;;  %v1777_v33 = vpack.c.bf16 %v1771_v22, %v1769_v21  ;;  %v1757_v49 = vadd.f32 1.0, %v2428_v43 }
 0xe4b   :  { %v2432_v38 = vpop.eup %2431  ;;  %v1778_v4 = vpack.c.bf16 %v1772_v47, %v1770_v45  ;;  %v1758_v52 = vadd.f32 1.0, %v2430_v30 }
 0xe4c   :  { %v2434_v6 = vpop.eup %2433  ;;  %v1759_v54 = vadd.f32 1.0, %v2432_v38  ;;  %v1765_v7 = vmul.f32 0.5, %v1757_v49 }
 0xe4d   :  { %1948 = vmatprep.mubr.bf16.mxu0 %v1778_v4  ;;  %v1760_v10 = vadd.f32 1.0, %v2434_v6  ;;  %v1766_v14 = vmul.f32 0.5, %v1758_v52 }
 0xe4e   :  { %1949 = vmatmul.mubr.bf16.vlgmr.msra.gmra.mrb[36].mxu0 %v1777_v33  ;;  %v1767_v26 = vmul.f32 0.5, %v1759_v54  ;;  %v1773_v11 = vmul.f32 %v1765_v7, %v3016_v51 }
 0xe4f   :  { %v1768_v32 = vmul.f32 0.5, %v1760_v10  ;;  %v1774_v40 = vmul.f32 %v1766_v14, %v3019_v53 }
 0xe50   :  { %v1775_v28 = vmul.f32 %v1767_v26, %v3024_v55 }
 0xe51   :  { %v1776_v3 = vmul.f32 %v1768_v32, %v3029_v41 }
 0xe52   :  { %v1779_v56 = vpack.c.bf16 %v1775_v28, %v1773_v11 }
 0xe53   :  { %v1780_v37 = vpack.c.bf16 %v1776_v3, %v1774_v40 }
 0xe55   :  { %1956 = vmatprep.mubr.bf16.mxu0 %v1780_v37 }
 0xe56   :  { %1957 = vmatmul.mubr.bf16.gmra.mrb[40].mxu0 %v1779_v56 }
 0xf21   :  { %v2138_v42 = vpop.f32.mrb[36].mxu0 }
 0xf22   :  { %v2139_v46 = vpop.f32.mrb[37].mxu0 }
 0xf23   :  { %v2140_v39 = vadd.f32 %v2139_v46, %v2138_v42  ;;  %v2141_v57 = vpop.f32.mrb[38].mxu0 }
 0xf24   :  { %v2142_v58 = vpop.f32.mrb[39].mxu0 }
 0xf25   :  { %v1951_v51 = vadd.f32 %v2140_v39, %v2041_v44  ;;  %v2143_v59 = vadd.f32 %v2142_v58, %v2141_v57 }
 0xf27   :  { %v1965_v55 = vadd.f32 %v1951_v51, %v2877_v48  ;;  %v1954_v53 = vadd.f32 %v2143_v59, %v2041_v44 }
 0xf29   :  { %1969 = vst.msk [vmem:[#allocation2] sm:$0xff] %vm69_vm0, %v1965_v55  ;;  %v1966_v41 = vadd.f32 %v1954_v53, %v2880_v34  ;;  %v2144_v60 = vpop.f32.mrb[40].mxu0 }
 0xf2a   :  { %v2145_v61 = vpop.f32.mrb[41].mxu0 }
 0xf2b   :  { %1970 = vst.msk [vmem:[#allocation2 + $0x8] sm:$0xff] %vm69_vm0, %v1966_v41  ;;  %v2146_v62 = vadd.f32 %v2145_v61, %v2144_v60  ;;  %v2147_v63 = vpop.f32.mrb[42].mxu0 }
 0xf2c   :  { %v2148_v0 = vpop.f32.mrb[43].mxu0 }
 0xf2d   :  { %v1959_v2 = vadd.f32 %v2146_v62, %v2041_v44  ;;  %v2149_v9 = vadd.f32 %v2148_v0, %v2147_v63 }
 0xf2f   :  { %v1967_v12 = vadd.f32 %v1959_v2, %v2899_v5  ;;  %v1962_v13 = vadd.f32 %v2149_v9, %v2041_v44 }
 0xf31   :  { %1971 = vst.msk [vmem:[#allocation2 + $0x10] sm:$0xff] %vm69_vm0, %v1967_v12  ;;  %v1968_v48 = vadd.f32 %v1962_v13, %v2887_v50 }
 0xf33   :  { %1972 = vst.msk [vmem:[#allocation2 + $0x18] sm:$0xff] %vm69_vm0, %v1968_v48 }
 0xf34   :  { %2446 = shalt.err (!%p2443_p4)
}
 0xf35   :  { %s2447_s29 = scalar_lea.hbm %s3090_s16, 512 }
 0xf36   :  { %p2448_p5 = scmp.ne.s32.totalorder %s3090_s16, %s2447_s29  ;;  %p2451_p6 = scmp.lt.u32.totalorder %s2447_s29, %s3090_s16 }
 0xf38   :  { %p2453_p7 = pnand %p2451_p6, %p2448_p5 }
 0xf3a   :  { %2456 = shalt.err (!%p2453_p7)
}
 0xf3b   :  { %s2470_s7 = smov 128   ;;  %s2471_s17 = smov 8  }
 0xf3c   :  { %1984 = dma.vmem_to_hbm [thread:$0]  %s1979_s9, 512, %s3090_s16, [#allocation3], %s2470_s7, %s2470_s7, %s2471_s17  }
 0xf3d   :  { %2457 = dma.done.wait [#allocation3], 512  }
 0xf3e   :  { %2458 = vsyncadd [#allocation3], 4294966784 }
 0xf3f   :  { %1988 = vsyncpa [#allocation3], 1 }

// kernel: tpu_custom_call.1
= control target key start
LH: loop header
LB: loop body
LE: loop exit
PB: predicated region body
PF: predicated region fallthrough
CT: control target
= control target key end

     0   :  { %s3074_s0 = inlined_call_operand.vmem [shape: bf16[2,16,64], index: 0, kind: input, shape index: {}]   ;;  %s3075_s1 = inlined_call_operand.vmem [shape: bf16[2,8,64], index: 1, kind: input, shape index: {}]   ;;  %s3076_s2 = inlined_call_operand.vmem [shape: f32[1,64], index: 2, kind: input, shape index: {}]   ;;  %s3077_s3 = inlined_call_operand.vmem [shape: f32[1,64], index: 3, kind: input, shape index: {}]   ;;  %s3078_s4 = inlined_call_operand.vmem [shape: f32[1,64], index: 4, kind: input, shape index: {}]   ;;  %s3079_s5 = inlined_call_operand.vmem [shape: f32[1,64], index: 5, kind: input, shape index: {}]   ;;  %s3080_s6 = inlined_call_operand.vmem [shape: bf16[64,64], index: 6, kind: input, shape index: {}]   ;;  %s3081_s7 = inlined_call_operand.vmem [shape: bf16[64,128], index: 7, kind: input, shape index: {}]   ;;  %s3082_s8 = inlined_call_operand.vmem [shape: bf16[64,64], index: 8, kind: input, shape index: {}]   ;;  %s3083_s9 = inlined_call_operand.vmem [shape: f32[1,64], index: 9, kind: input, shape index: {}]   ;;  %s3084_s10 = inlined_call_operand.vmem [shape: f32[1,64], index: 10, kind: input, shape index: {}]   ;;  %s3085_s11 = inlined_call_operand.vmem [shape: f32[1,64], index: 11, kind: input, shape index: {}]   ;;  %s3086_s12 = inlined_call_operand.vmem [shape: bf16[64,256], index: 12, kind: input, shape index: {}]   ;;  %s3087_s13 = inlined_call_operand.vmem [shape: f32[1,256], index: 13, kind: input, shape index: {}]   ;;  %s3088_s14 = inlined_call_operand.vmem [shape: bf16[256,64], index: 14, kind: input, shape index: {}]   ;;  %s3089_s15 = inlined_call_operand.vmem [shape: f32[1,64], index: 15, kind: input, shape index: {}]   ;;  %s3090_s16 = inlined_call_operand.hbm [shape: f32[2,16,64], index: 16, kind: output, shape index: {}]  }
   0x1   :  { %3092 = sst [smem:[#allocation5_spill]] %s3074_s0 }
   0x2   :  { %s3093_s23 = sld [smem:[#allocation5_spill]]  ;;  %vm69_vm0 = vcmask 523264   ;;  %v2069_v2 = vld [vmem:[%s3075_s1] sm:$0xff]  }
   0x3   :  { %v2574_v7 = vunpack.c.h.bf16 %v2069_v2  ;;  %v2580_v10 = vunpack.c.l.bf16 %v2069_v2 }
   0x5   :  { %v162_v15 = vsel %vm69_vm0, %v2574_v7, 0.0  ;;  %v159_v19 = vsel %vm69_vm0, %v2580_v10, 0.0  ;;  %v168_v21 = vmul.f32 %v2574_v7, %v2574_v7  ;;  %v167_v22 = vmul.f32 %v2580_v10, %v2580_v10 }
   0x7   :  { %v172_v25 = vsel %vm69_vm0, %v168_v21, 0.0  ;;  %v169_v26 = vsel %vm69_vm0, %v167_v22, 0.0 }
   0x8   :  { %v2072_v0 = vld [vmem:[%s3093_s23 + $0x8] sm:$0xff]   ;;  %v2061_v1 = vld [vmem:[%s3093_s23] sm:$0xff]  }
   0x9   :  { %v2566_v3 = vunpack.c.l.bf16 %v2072_v0  ;;  %v2568_v4 = vunpack.c.l.bf16 %v2061_v1  ;;  %v2570_v5 = vunpack.c.h.bf16 %v2072_v0  ;;  %v2572_v6 = vunpack.c.h.bf16 %v2061_v1 }
   0xb   :  { %v76_v8 = vsel %vm69_vm0, %v2566_v3, 0.0  ;;  %v70_v9 = vsel %vm69_vm0, %v2568_v4, 0.0  ;;  %v79_v11 = vsel %vm69_vm0, %v2570_v5, 0.0  ;;  %v88_v12 = vmul.f32 %v2572_v6, %v2572_v6 }
   0xc   :  { %77 = vadd.xlane.f32.xlu1 %v76_v8  ;;  %71 = vadd.xlane.f32.xlu0 %v70_v9  ;;  %v87_v13 = vmul.f32 %v2568_v4, %v2568_v4  ;;  %v73_v14 = vsel %vm69_vm0, %v2572_v6, 0.0  ;;  %v90_v18 = vmul.f32 %v2570_v5, %v2570_v5  ;;  %v89_v20 = vmul.f32 %v2566_v3, %v2566_v3 }
   0xd   :  { %v94_v16 = vsel %vm69_vm0, %v88_v12, 0.0 }
   0xe   :  { %v91_v17 = vsel %vm69_vm0, %v87_v13, 0.0  ;;  %v100_v23 = vsel %vm69_vm0, %v90_v18, 0.0  ;;  %v97_v24 = vsel %vm69_vm0, %v89_v20, 0.0 }
  0x10   :  { %80 = vadd.xlane.f32.xlu1 %v79_v11  ;;  %74 = vadd.xlane.f32.xlu0 %v73_v14 }
  0x14   :  { %95 = vadd.xlane.f32.xlu1 %v94_v16  ;;  %92 = vadd.xlane.f32.xlu0 %v91_v17 }
  0x18   :  { %101 = vadd.xlane.f32.xlu1 %v100_v23  ;;  %98 = vadd.xlane.f32.xlu0 %v97_v24 }
  0x1c   :  { %163 = vadd.xlane.f32.xlu1 %v162_v15  ;;  %160 = vadd.xlane.f32.xlu0 %v159_v19 }
  0x1d   :  { %21 = vsyncpa [#allocation3], 0  ;;  %v2295_v27 = vld [vmem:[%s3080_s6] sm:$0xff]   ;;  %v2296_v28 = vld [vmem:[%s3080_s6 + $0x8] sm:$0xff]   ;;  %v2459_v31 = vmov 0.0   ;;  %vm2460_vm1 = vmmov 0  }
  0x1e   :  { %2150 = vmatprep.subr.bf16.mxu1 %v2295_v27  ;;  %v2297_v29 = vld [vmem:[%s3080_s6 + $0x10] sm:$0xff]   ;;  %v2298_v30 = vld [vmem:[%s3080_s6 + $0x18] sm:$0xff]   ;;  %2174 = vmatprep.subr.bf16.mxu0 %v2459_v31  ;;  %vm379_vm2 = vcmask 130048   ;;  %vm474_vm3 = vcmask 64512   ;;  %vm526_vm4 = vcmask 1043456   ;;  %s2464_s17 = smov 96  }
  0x1f   :  { %2151 = vmatpush3.bf16.msra.mxu1 %v2295_v27  ;;  %2176 = vmatprep.mubr.msk.bf16.mxu0 %vm2460_vm1, %v2459_v31  ;;  %s2465_s18 = smov 32   ;;  %s2466_s19 = smov 80   ;;  %vm1392_vm5 = vcmask 261120   ;;  %vm1397_vm6 = vcmask 392192  }
  0x20   :  { %173 = vadd.xlane.f32.xlu1 %v172_v25  ;;  %170 = vadd.xlane.f32.xlu0 %v169_v26  ;;  %v1989_v25 = vld [vmem:[%s3076_s2] ss:$0 sm:$0xff]  ;;  %s2467_s6 = smov 16  }
  0x21   :  { %2152 = vmatprep.subr.bf16.mxu1 %v2296_v28 }
  0x23   :  { %2153 = vmatpush3.bf16.msra.mxu1 %v2296_v28  ;;  %v1990_v28 = vld [vmem:[%s3077_s3] ss:$0 sm:$0xff] }
  0x24   :  { %2154 = vmatprep.subr.bf16.mxu1 %v2297_v29 }
  0x27   :  { %2155 = vmatpush3.bf16.msra.mxu1 %v2297_v29 }
  0x28   :  { %2156 = vmatprep.subr.bf16.mxu1 %v2298_v30 }
  0x2b   :  { %2157 = vmatpush3.bf16.msra.mxu1 %v2298_v30 }
  0x2c   :  { %2162 = vmatprep.subr.bf16.mxu1 %v2459_v31 }
  0x99   :  { %v78_v32 = vpop.xlane.xlu1 %77  ;;  %v72_v33 = vpop.xlane.xlu0 %71 }
  0x9a   :  { %v83_v36 = vmul.f32 0.015625, %v72_v33  ;;  %v2624_v38 = vmul.f32 0.015625, %v78_v32 }
  0x9c   :  { %v107_v42 = vmul.f32 %v83_v36, %v83_v36  ;;  %v109_v48 = vmul.f32 %v2624_v38, %v2624_v38  ;;  %v127_v22 = vsub.f32 %v2568_v4, %v83_v36 }
  0x9d   :  { %v81_v34 = vpop.xlane.xlu1 %80  ;;  %v75_v35 = vpop.xlane.xlu0 %74 }
  0x9e   :  { %v84_v37 = vmul.f32 0.015625, %v75_v35  ;;  %v2626_v39 = vmul.f32 0.015625, %v81_v34  ;;  %v129_v34 = vsub.f32 %v2566_v3, %v2624_v38 }
  0xa0   :  { %v108_v43 = vmul.f32 %v84_v37, %v84_v37  ;;  %v110_v49 = vmul.f32 %v2626_v39, %v2626_v39  ;;  %v128_v20 = vsub.f32 %v2572_v6, %v84_v37  ;;  %v130_v30 = vsub.f32 %v2570_v5, %v2626_v39  ;;  %v2299_v39 = vld [vmem:[%s3081_s7] sm:$0xff]  }
  0xa1   :  { %v96_v40 = vpop.xlane.xlu1 %95  ;;  %v93_v41 = vpop.xlane.xlu0 %92 }
  0xa2   :  { %v104_v44 = vmul.f32 0.015625, %v96_v40  ;;  %v103_v45 = vmul.f32 0.015625, %v93_v41 }
  0xa4   :  { %v112_v46 = vsub.f32 %v104_v44, %v108_v43  ;;  %v111_v47 = vsub.f32 %v103_v45, %v107_v42 }
  0xa5   :  { %v102_v50 = vpop.xlane.xlu1 %101  ;;  %v99_v51 = vpop.xlane.xlu0 %98 }
  0xa6   :  { %v116_v52 = vmax.f32 %v112_v46, 0.0  ;;  %v115_v53 = vmax.f32 %v111_v47, 0.0  ;;  %v106_v54 = vmul.f32 0.015625, %v102_v50  ;;  %v105_v55 = vmul.f32 0.015625, %v99_v51 }
  0xa8   :  { %v120_v56 = vadd.f32 1e-05, %v116_v52  ;;  %v119_v57 = vadd.f32 1e-05, %v115_v53  ;;  %v114_v58 = vsub.f32 %v106_v54, %v110_v49  ;;  %v113_v59 = vsub.f32 %v105_v55, %v109_v48  ;;  %v2300_v52 = vld [vmem:[%s3081_s7 + $0x8] sm:$0xff]  }
  0xa9   :  { %v164_v60 = vpop.xlane.xlu1 %163  ;;  %v161_v61 = vpop.xlane.xlu0 %160 }
  0xaa   :  { %2335 = vrsqrt.f32 %v120_v56  ;;  %v118_v62 = vmax.f32 %v114_v58, 0.0  ;;  %v117_v63 = vmax.f32 %v113_v59, 0.0  ;;  %v166_v0 = vmul.f32 0.015625, %v164_v60  ;;  %v2302_v58 = vld [vmem:[%s3081_s7 + $0x18] sm:$0xff]  }
  0xab   :  { %2337 = vrsqrt.f32 %v119_v57  ;;  %v165_v1 = vmul.f32 0.015625, %v161_v61  ;;  %v1992_v57 = vld [vmem:[%s3079_s5] ss:$0 sm:$0xff]  ;;  %s2462_s5 = smov 112  }
  0xac   :  { %v122_v2 = vadd.f32 1e-05, %v118_v62  ;;  %v121_v8 = vadd.f32 1e-05, %v117_v63  ;;  %v178_v9 = vmul.f32 %v166_v0, %v166_v0  ;;  %v188_v50 = vsub.f32 %v2574_v7, %v166_v0  ;;  %v1991_v7 = vld [vmem:[%s3078_s4] ss:$0 sm:$0xff] }
  0xad   :  { %v177_v11 = vmul.f32 %v165_v1, %v165_v1  ;;  %v174_v12 = vpop.xlane.xlu1 %173  ;;  %v171_v13 = vpop.xlane.xlu0 %170  ;;  %v187_v51 = vsub.f32 %v2580_v10, %v165_v1  ;;  %v2301_v10 = vld [vmem:[%s3081_s7 + $0x10] sm:$0xff]   ;;  %s2461_s4 = smov 64   ;;  %s2463_s7 = smov 48  }
  0xae   :  { %2339 = vrsqrt.f32 %v122_v2  ;;  %v176_v14 = vmul.f32 0.015625, %v174_v12  ;;  %v175_v15 = vmul.f32 0.015625, %v171_v13 }
  0xaf   :  { %2341 = vrsqrt.f32 %v121_v8 }
  0xb0   :  { %v180_v16 = vsub.f32 %v176_v14, %v178_v9  ;;  %v179_v17 = vsub.f32 %v175_v15, %v177_v11 }
  0xb2   :  { %v182_v18 = vmax.f32 %v180_v16, 0.0  ;;  %v181_v19 = vmax.f32 %v179_v17, 0.0 }
  0xb4   :  { %v2336_v21 = vpop.eup %2335  ;;  %v184_v23 = vadd.f32 1e-05, %v182_v18  ;;  %v183_v24 = vadd.f32 1e-05, %v181_v19 }
  0xb5   :  { %v2338_v26 = vpop.eup %2337  ;;  %v132_v27 = vmul.f32 %v2336_v21, %v128_v20 }
  0xb6   :  { %2343 = vrsqrt.f32 %v184_v23  ;;  %v131_v29 = vmul.f32 %v2338_v26, %v127_v22 }
  0xb7   :  { %2345 = vrsqrt.f32 %v183_v24  ;;  %v142_v32 = vmul.f32 %v1989_v25, %v132_v27 }
  0xb8   :  { %v2340_v33 = vpop.eup %2339  ;;  %v141_v35 = vmul.f32 %v1989_v25, %v131_v29 }
  0xb9   :  { %v2342_v36 = vpop.eup %2341  ;;  %v152_v37 = vadd.f32 %v1990_v28, %v142_v32  ;;  %v134_v40 = vmul.f32 %v2340_v33, %v130_v30 }
  0xba   :  { %v151_v41 = vadd.f32 %v1990_v28, %v141_v35  ;;  %v133_v42 = vmul.f32 %v2342_v36, %v129_v34 }
  0xbb   :  { %v144_v43 = vmul.f32 %v1989_v25, %v134_v40 }
  0xbc   :  { %v155_v44 = vpack.c.bf16 %v152_v37, %v151_v41  ;;  %v143_v45 = vmul.f32 %v1989_v25, %v133_v42 }
  0xbd   :  { %v154_v46 = vadd.f32 %v1990_v28, %v144_v43 }
  0xbe   :  { %2158 = vmatprep.mubr.msk.bf16.mxu1 %vm69_vm0, %v155_v44  ;;  %v153_v47 = vadd.f32 %v1990_v28, %v143_v45 }
  0xc0   :  { %v2344_v48 = vpop.eup %2343  ;;  %v156_v49 = vpack.c.bf16 %v154_v46, %v153_v47 }
  0xc1   :  { %v2346_v38 = vpop.eup %2345  ;;  %v190_v53 = vmul.f32 %v2344_v48, %v188_v50 }
  0xc2   :  { %2159 = vmatmul.mubr.msk.bf16.vlgmr.msra.gmra.mrb[0].mxu1 %vm69_vm0, %v156_v49  ;;  %v189_v54 = vmul.f32 %v2346_v38, %v187_v51 }
  0xc3   :  { %2163 = vmatpush3.bf16.msra.mxu1 %v2299_v39  ;;  %2170 = vmatprep.mubr.msk.bf16.mxu1 %vm2460_vm1, %v2459_v31  ;;  %v198_v56 = vmul.f32 %v1991_v7, %v190_v53 }
  0xc4   :  { %2164 = vmatprep.subr.bf16.mxu1 %v2459_v31  ;;  %v197_v55 = vmul.f32 %v1991_v7, %v189_v54 }
  0xc5   :  { %v206_v60 = vadd.f32 %v1992_v57, %v198_v56 }
  0xc6   :  { %v205_v59 = vadd.f32 %v1992_v57, %v197_v55 }
  0xc7   :  { %2165 = vmatpush3.bf16.msra.mxu1 %v2300_v52 }
  0xc8   :  { %2166 = vmatprep.subr.bf16.mxu1 %v2459_v31  ;;  %v207_v61 = vpack.c.bf16 %v206_v60, %v205_v59 }
  0xcb   :  { %2167 = vmatpush3.bf16.msra.mxu1 %v2301_v10 }
  0xcc   :  { %2168 = vmatprep.subr.bf16.mxu1 %v2459_v31 }
  0xcf   :  { %2169 = vmatpush3.bf16.msra.mxu1 %v2302_v58 }
  0xd0   :  { %2180 = vmatprep.subr.bf16.mxu1 %v2459_v31 }
  0xd2   :  { %2171 = vmatmul.mubr.msk.bf16.vlgmr.msra.gmra.mrb[4].mxu1 %vm69_vm0, %v207_v61 }
  0xd3   :  { %2182 = vmatprep.mubr.msk.bf16.mxu1 %vm2460_vm1, %v2459_v31 }
 0x195   :  { %v2160_v62 = vpop.f32.mrb[0].mxu1 }
 0x196   :  { %v280_v63 = vpop.f32.mrb[1].mxu1 }
 0x197   :  { %v2161_v0 = vpop.f32.mrb[2].mxu1 }
 0x198   :  { %v2675_v1 = vpack.c.bf16 %v2161_v0, %v2160_v62  ;;  %v283_v2 = vpop.f32.mrb[3].mxu1 }
 0x199   :  { %v2677_v8 = vpack.c.bf16 %v283_v2, %v280_v63 }
 0x1a5   :  { %v366_v9 = vpop.f32.mrb[4].mxu1 }
 0x1a6   :  { %v2679_v11 = vpack.c.bf16 %v366_v9, %v366_v9  ;;  %v2172_v12 = vpop.f32.mrb[5].mxu1 }
 0x1a7   :  { %v369_v13 = vpop.f32.mrb[6].mxu1 }
 0x1a8   :  { %v2681_v14 = vpack.c.bf16 %v369_v13, %v369_v13  ;;  %v2173_v15 = vpop.f32.mrb[7].mxu1  ;;  %v384_v16 = vsel %vm379_vm2, %v2679_v11, 0 }
 0x1a9   :  { %2175 = vmatpush3.bf16.xpose.msra.mxu0 %v384_v16 }
 0x1aa   :  { %v431_v17 = vsel %vm379_vm2, %v2681_v14, 0  ;;  %2186 = vmatprep.subr.bf16.mxu0 %v2459_v31 }
 0x1ab   :  { %2181 = vmatpush3.bf16.xpose.msra.mxu1 %v431_v17 }
 0x1ac   :  { %2192 = vmatprep.subr.bf16.mxu1 %v2459_v31 }
 0x1b0   :  { %2177 = vmatmul.mubr.msk.bf16.vlgmr.msra.gmra.mrb[0].mxu0 %vm379_vm2, %v2677_v8 }
 0x1b1   :  { %2188 = vmatprep.mubr.msk.bf16.mxu0 %vm2460_vm1, %v2459_v31 }
 0x1b2   :  { %2183 = vmatmul.mubr.msk.bf16.vlgmr.msra.gmra.mrb[8].mxu1 %vm379_vm2, %v2675_v1 }
 0x1b3   :  { %2194 = vmatprep.mubr.msk.bf16.mxu1 %vm2460_vm1, %v2459_v31 }
 0x283   :  { %v420_v18 = vpop.f32.mrb[0].mxu0 }
 0x284   :  { %v2178_v19 = vpop.f32.mrb[1].mxu0  ;;  %v475_v20 = vsel %vm474_vm3, %v420_v18, -inf }
 0x285   :  { %476 = vmax.xlane.f32.xlu0 %v475_v20  ;;  %v423_v21 = vpop.f32.mrb[2].mxu0  ;;  %v467_v22 = vpop.f32.mrb[8].mxu1 }
 0x286   :  { %v2179_v23 = vpop.f32.mrb[3].mxu0  ;;  %v2184_v24 = vpop.f32.mrb[9].mxu1  ;;  %v478_v25 = vsel %vm474_vm3, %v423_v21, -inf  ;;  %v481_v28 = vsel %vm474_vm3, %v467_v22, -inf }
 0x287   :  { %479 = vmax.xlane.f32.xlu1 %v478_v25  ;;  %v470_v26 = vpop.f32.mrb[10].mxu1 }
 0x288   :  { %v2185_v27 = vpop.f32.mrb[11].mxu1  ;;  %v484_v29 = vsel %vm474_vm3, %v470_v26, -inf }
 0x289   :  { %482 = vmax.xlane.f32.xlu0 %v481_v28 }
 0x28b   :  { %485 = vmax.xlane.f32.xlu1 %v484_v29 }
 0x312   :  { %v477_v30 = vpop.xlane.xlu0 %476 }
 0x313   :  { %v487_v32 = vsub.f32 %v420_v18, %v477_v30 }
 0x314   :  { %v480_v33 = vpop.xlane.xlu1 %479 }
 0x315   :  { %v491_v34 = vmul.f32 1.442695, %v487_v32  ;;  %v488_v35 = vsub.f32 %v423_v21, %v480_v33 }
 0x316   :  { %v483_v36 = vpop.xlane.xlu0 %482 }
 0x317   :  { %2347 = vpow2.f32 %v491_v34  ;;  %v493_v37 = vmul.f32 1.442695, %v488_v35  ;;  %v489_v40 = vsub.f32 %v467_v22, %v483_v36 }
 0x318   :  { %v486_v39 = vpop.xlane.xlu1 %485 }
 0x319   :  { %2349 = vpow2.f32 %v493_v37  ;;  %v495_v41 = vmul.f32 1.442695, %v489_v40  ;;  %v490_v48 = vsub.f32 %v470_v26, %v486_v39 }
 0x31b   :  { %2351 = vpow2.f32 %v495_v41  ;;  %v497_v49 = vmul.f32 1.442695, %v490_v48 }
 0x31d   :  { %2353 = vpow2.f32 %v497_v49 }
 0x321   :  { %v2348_v42 = vpop.eup %2347 }
 0x322   :  { %v499_v43 = vsel %vm474_vm3, %v2348_v42, 0.0 }
 0x323   :  { %v2350_v44 = vpop.eup %2349  ;;  %500 = vadd.xlane.f32.xlu0 %v499_v43 }
 0x324   :  { %v502_v45 = vsel %vm474_vm3, %v2350_v44, 0.0 }
 0x325   :  { %v2352_v46 = vpop.eup %2351  ;;  %503 = vadd.xlane.f32.xlu1 %v502_v45 }
 0x326   :  { %v505_v47 = vsel %vm474_vm3, %v2352_v46, 0.0 }
 0x327   :  { %506 = vadd.xlane.f32.xlu0 %v505_v47  ;;  %v2354_v38 = vpop.eup %2353 }
 0x328   :  { %v508_v50 = vsel %vm474_vm3, %v2354_v38, 0.0 }
 0x336   :  { %571 = vrot.lane.b32.xlu1 %v2681_v14, %s2461_s4 }
 0x33a   :  { %625 = vrot.lane.b32.xlu1 %v2679_v11, %s2462_s5 }
 0x33d   :  { %521 = vrot.lane.b32.xlu0 %v2679_v11, %s2461_s4 }
 0x341   :  { %623 = vrot.lane.b32.xlu0 %v2677_v8, %s2462_s5 }
 0x35e   :  { %509 = vadd.xlane.f32.xlu1 %v508_v50 }
 0x36f   :  { %677 = vrot.lane.b32.xlu1 %v2681_v14, %s2462_s5 }
 0x373   :  { %675 = vrot.lane.b32.xlu1 %v2675_v1, %s2462_s5 }
 0x3b0   :  { %v501_v51 = vpop.xlane.xlu0 %500 }
 0x3b1   :  { %2355 = vrcp.f32 %v501_v51 }
 0x3b2   :  { %v504_v52 = vpop.xlane.xlu1 %503 }
 0x3b3   :  { %2357 = vrcp.f32 %v504_v52 }
 0x3b4   :  { %v507_v53 = vpop.xlane.xlu0 %506 }
 0x3b5   :  { %2359 = vrcp.f32 %v507_v53 }
 0x3b6   :  { %v572_v54 = vpop.permute.xlu1 %571 }
 0x3b7   :  { %v577_v7 = vsel %vm526_vm4, %v572_v54, 0 }
 0x3b8   :  { %v522_v10 = vpop.permute.xlu0 %521  ;;  %2193 = vmatpush3.bf16.msra.mxu1 %v577_v7 }
 0x3b9   :  { %v528_v55 = vsel %vm526_vm4, %v522_v10, 0  ;;  %2204 = vmatprep.subr.bf16.mxu1 %v2459_v31 }
 0x3ba   :  { %2187 = vmatpush3.bf16.msra.mxu0 %v528_v55  ;;  %v626_v60 = vpop.permute.xlu1 %625 }
 0x3bb   :  { %v2356_v56 = vpop.eup %2355  ;;  %2198 = vmatprep.subr.bf16.mxu0 %v2459_v31  ;;  %v631_v62 = vsel %vm379_vm2, %v626_v60, 0 }
 0x3bc   :  { %v515_v58 = vmul.f32 %v2356_v56, %v2348_v42  ;;  %v624_v63 = vpop.permute.xlu0 %623 }
 0x3bd   :  { %v2358_v57 = vpop.eup %2357 }
 0x3be   :  { %v516_v59 = vmul.f32 %v2358_v57, %v2350_v44 }
 0x3bf   :  { %v2360_v2 = vpop.eup %2359 }
 0x3c0   :  { %v519_v61 = vpack.c.bf16 %v516_v59, %v515_v58  ;;  %v517_v12 = vmul.f32 %v2360_v2, %v2352_v46 }
 0x3c2   :  { %2189 = vmatmul.mubr.msk.bf16.vlgmr.msra.gmra.mrb[4].mxu0 %vm474_vm3, %v519_v61 }
 0x3c3   :  { %2199 = vmatpush3.bf16.xpose.msra.mxu0 %v631_v62  ;;  %2200 = vmatprep.mubr.msk.bf16.mxu0 %vm2460_vm1, %v2459_v31 }
 0x3c4   :  { %2210 = vmatprep.subr.bf16.mxu0 %v2459_v31 }
 0x3ca   :  { %2201 = vmatmul.mubr.msk.bf16.vlgmr.msra.gmra.mrb[8].mxu0 %vm379_vm2, %v624_v63 }
 0x3cb   :  { %2212 = vmatprep.mubr.msk.bf16.mxu0 %vm2460_vm1, %v2459_v31 }
 0x3eb   :  { %v510_v0 = vpop.xlane.xlu1 %509 }
 0x3ec   :  { %2361 = vrcp.f32 %v510_v0 }
 0x3ef   :  { %v678_v15 = vpop.permute.xlu1 %677 }
 0x3f0   :  { %v683_v17 = vsel %vm379_vm2, %v678_v15, 0 }
 0x3f3   :  { %v676_v18 = vpop.permute.xlu1 %675 }
 0x3f6   :  { %v2362_v9 = vpop.eup %2361 }
 0x3f7   :  { %v518_v13 = vmul.f32 %v2362_v9, %v2354_v38 }
 0x3f9   :  { %v520_v16 = vpack.c.bf16 %v518_v13, %v517_v12 }
 0x3fb   :  { %2195 = vmatmul.mubr.msk.bf16.vlgmr.msra.gmra.mrb[12].mxu1 %vm474_vm3, %v520_v16 }
 0x3fc   :  { %2205 = vmatpush3.bf16.xpose.msra.mxu1 %v683_v17  ;;  %2206 = vmatprep.mubr.msk.bf16.mxu1 %vm2460_vm1, %v2459_v31 }
 0x3fd   :  { %2216 = vmatprep.subr.bf16.mxu1 %v2459_v31 }
 0x403   :  { %2207 = vmatmul.mubr.msk.bf16.vlgmr.msra.gmra.mrb[16].mxu1 %vm379_vm2, %v676_v18 }
 0x404   :  { %2218 = vmatprep.mubr.msk.bf16.mxu1 %vm2460_vm1, %v2459_v31 }
 0x495   :  { %v2731_v19 = vpop.f32.mrb[4].mxu0 }
 0x496   :  { %v2190_v20 = vpop.f32.mrb[5].mxu0 }
 0x497   :  { %v2733_v21 = vpop.f32.mrb[6].mxu0 }
 0x498   :  { %v620_v22 = vpack.c.bf16 %v2733_v21, %v2731_v19  ;;  %v2191_v23 = vpop.f32.mrb[7].mxu0  ;;  %v2022_v19 = vld [vmem:[%s3083_s9] ss:$0 sm:$0xff] }
 0x49d   :  { %v667_v24 = vpop.f32.mrb[8].mxu0 }
 0x49e   :  { %v2202_v25 = vpop.f32.mrb[9].mxu0  ;;  %v726_v26 = vsel %vm474_vm3, %v667_v24, -inf }
 0x49f   :  { %727 = vmax.xlane.f32.xlu0 %v726_v26  ;;  %v670_v27 = vpop.f32.mrb[10].mxu0 }
 0x4a0   :  { %v2203_v28 = vpop.f32.mrb[11].mxu0  ;;  %v729_v29 = vsel %vm474_vm3, %v670_v27, -inf }
 0x4a1   :  { %730 = vmax.xlane.f32.xlu1 %v729_v29 }
 0x4ce   :  { %v2739_v30 = vpop.f32.mrb[12].mxu1 }
 0x4cf   :  { %v2196_v32 = vpop.f32.mrb[13].mxu1 }
 0x4d0   :  { %v2741_v33 = vpop.f32.mrb[14].mxu1 }
 0x4d1   :  { %v621_v34 = vpack.c.bf16 %v2741_v33, %v2739_v30  ;;  %v2197_v35 = vpop.f32.mrb[15].mxu1 }
 0x4d6   :  { %v719_v36 = vpop.f32.mrb[16].mxu1 }
 0x4d7   :  { %v2208_v37 = vpop.f32.mrb[17].mxu1  ;;  %v732_v40 = vsel %vm474_vm3, %v719_v36, -inf }
 0x4d8   :  { %733 = vmax.xlane.f32.xlu0 %v732_v40  ;;  %v722_v41 = vpop.f32.mrb[18].mxu1 }
 0x4d9   :  { %v2209_v42 = vpop.f32.mrb[19].mxu1  ;;  %v735_v43 = vsel %vm474_vm3, %v722_v41, -inf }
 0x4dc   :  { %736 = vmax.xlane.f32.xlu0 %v735_v43 }
 0x52c   :  { %v728_v44 = vpop.xlane.xlu0 %727 }
 0x52d   :  { %v738_v45 = vsub.f32 %v667_v24, %v728_v44 }
 0x52e   :  { %v731_v46 = vpop.xlane.xlu1 %730 }
 0x52f   :  { %v742_v47 = vmul.f32 1.442695, %v738_v45  ;;  %v739_v39 = vsub.f32 %v670_v27, %v731_v46 }
 0x531   :  { %2363 = vpow2.f32 %v742_v47  ;;  %v744_v48 = vmul.f32 1.442695, %v739_v39 }
 0x533   :  { %2365 = vpow2.f32 %v744_v48 }
 0x53b   :  { %v2364_v49 = vpop.eup %2363 }
 0x53c   :  { %v750_v38 = vsel %vm474_vm3, %v2364_v49, 0.0 }
 0x53d   :  { %v2366_v50 = vpop.eup %2365  ;;  %751 = vadd.xlane.f32.xlu0 %v750_v38 }
 0x53e   :  { %v753_v51 = vsel %vm474_vm3, %v2366_v50, 0.0 }
 0x53f   :  { %754 = vadd.xlane.f32.xlu1 %v753_v51 }
 0x550   :  { %821 = vrot.lane.b32.xlu1 %v2681_v14, %s2463_s7 }
 0x554   :  { %874 = vrot.lane.b32.xlu1 %v2679_v11, %s2464_s17 }
 0x565   :  { %v734_v52 = vpop.xlane.xlu0 %733 }
 0x566   :  { %v740_v53 = vsub.f32 %v719_v36, %v734_v52 }
 0x568   :  { %v746_v54 = vmul.f32 1.442695, %v740_v53 }
 0x569   :  { %v737_v7 = vpop.xlane.xlu0 %736 }
 0x56a   :  { %2367 = vpow2.f32 %v746_v54  ;;  %v741_v10 = vsub.f32 %v722_v41, %v737_v7 }
 0x56c   :  { %v748_v55 = vmul.f32 1.442695, %v741_v10 }
 0x56e   :  { %2369 = vpow2.f32 %v748_v55 }
 0x574   :  { %v2368_v56 = vpop.eup %2367 }
 0x575   :  { %v756_v57 = vsel %vm474_vm3, %v2368_v56, 0.0 }
 0x576   :  { %757 = vadd.xlane.f32.xlu0 %v756_v57 }
 0x578   :  { %v2370_v58 = vpop.eup %2369 }
 0x579   :  { %v759_v59 = vsel %vm474_vm3, %v2370_v58, 0.0 }
 0x57a   :  { %760 = vadd.xlane.f32.xlu1 %v759_v59 }
 0x58b   :  { %925 = vrot.lane.b32.xlu1 %v2681_v14, %s2464_s17 }
 0x58c   :  { %772 = vrot.lane.b32.xlu0 %v2679_v11, %s2463_s7 }
 0x58f   :  { %923 = vrot.lane.b32.xlu1 %v2675_v1, %s2464_s17 }
 0x590   :  { %872 = vrot.lane.b32.xlu0 %v2677_v8, %s2464_s17 }
 0x5ca   :  { %v752_v63 = vpop.xlane.xlu0 %751 }
 0x5cc   :  { %v755_v60 = vpop.xlane.xlu1 %754 }
 0x5cd   :  { %2371 = vrcp.f32 %v755_v60 }
 0x5ce   :  { %2373 = vrcp.f32 %v752_v63 }
 0x5d0   :  { %v822_v61 = vpop.permute.xlu1 %821 }
 0x5d1   :  { %v827_v62 = vsel %vm526_vm4, %v822_v61, 0 }
 0x5d2   :  { %2217 = vmatpush3.bf16.msra.mxu1 %v827_v62 }
 0x5d3   :  { %2228 = vmatprep.subr.bf16.mxu1 %v2459_v31 }
 0x5d4   :  { %v875_v2 = vpop.permute.xlu1 %874 }
 0x5d5   :  { %v880_v24 = vsel %vm379_vm2, %v875_v2, 0 }
 0x5d7   :  { %v2372_v0 = vpop.eup %2371 }
 0x5d8   :  { %v2374_v12 = vpop.eup %2373  ;;  %v767_v13 = vmul.f32 %v2372_v0, %v2366_v50 }
 0x5d9   :  { %v766_v17 = vmul.f32 %v2374_v12, %v2364_v49 }
 0x5db   :  { %v770_v20 = vpack.c.bf16 %v767_v13, %v766_v17 }
 0x603   :  { %v758_v9 = vpop.xlane.xlu0 %757 }
 0x604   :  { %2375 = vrcp.f32 %v758_v9 }
 0x607   :  { %v761_v15 = vpop.xlane.xlu1 %760  ;;  %v773_v16 = vpop.permute.xlu0 %772 }
 0x608   :  { %2377 = vrcp.f32 %v761_v15  ;;  %v778_v18 = vsel %vm526_vm4, %v773_v16, 0 }
 0x609   :  { %2211 = vmatpush3.bf16.msra.mxu0 %v778_v18 }
 0x60a   :  { %2222 = vmatprep.subr.bf16.mxu0 %v2459_v31 }
 0x60b   :  { %v926_v28 = vpop.permute.xlu1 %925  ;;  %v873_v35 = vpop.permute.xlu0 %872 }
 0x60c   :  { %2213 = vmatmul.mubr.msk.bf16.vlgmr.msra.gmra.mrb[12].mxu0 %vm474_vm3, %v770_v20  ;;  %v931_v32 = vsel %vm379_vm2, %v926_v28, 0 }
 0x60d   :  { %2224 = vmatprep.mubr.msk.bf16.mxu0 %vm2460_vm1, %v2459_v31 }
 0x60e   :  { %v2376_v23 = vpop.eup %2375 }
 0x60f   :  { %v768_v26 = vmul.f32 %v2376_v23, %v2368_v56  ;;  %v924_v36 = vpop.permute.xlu1 %923 }
 0x612   :  { %v2378_v25 = vpop.eup %2377  ;;  %2223 = vmatpush3.bf16.xpose.msra.mxu0 %v880_v24 }
 0x613   :  { %v769_v27 = vmul.f32 %v2378_v25, %v2370_v58  ;;  %2234 = vmatprep.subr.bf16.mxu0 %v2459_v31 }
 0x615   :  { %v771_v29 = vpack.c.bf16 %v769_v27, %v768_v26 }
 0x617   :  { %2219 = vmatmul.mubr.msk.bf16.vlgmr.msra.gmra.mrb[20].mxu1 %vm474_vm3, %v771_v29 }
 0x618   :  { %2229 = vmatpush3.bf16.xpose.msra.mxu1 %v931_v32  ;;  %2230 = vmatprep.mubr.msk.bf16.mxu1 %vm2460_vm1, %v2459_v31 }
 0x619   :  { %2225 = vmatmul.mubr.msk.bf16.vlgmr.msra.gmra.mrb[16].mxu0 %vm379_vm2, %v873_v35  ;;  %2240 = vmatprep.subr.bf16.mxu1 %v2459_v31 }
 0x61a   :  { %2236 = vmatprep.mubr.msk.bf16.mxu0 %vm2460_vm1, %v2459_v31 }
 0x61f   :  { %2231 = vmatmul.mubr.msk.bf16.vlgmr.msra.gmra.mrb[24].mxu1 %vm379_vm2, %v924_v36 }
 0x620   :  { %2242 = vmatprep.mubr.msk.bf16.mxu1 %vm2460_vm1, %v2459_v31 }
 0x6df   :  { %v2779_v37 = vpop.f32.mrb[12].mxu0 }
 0x6e0   :  { %v2214_v40 = vpop.f32.mrb[13].mxu0 }
 0x6e1   :  { %v2781_v41 = vpop.f32.mrb[14].mxu0 }
 0x6e2   :  { %v870_v42 = vpack.c.bf16 %v2781_v41, %v2779_v37  ;;  %v2215_v43 = vpop.f32.mrb[15].mxu0 }
 0x6ea   :  { %v2785_v44 = vpop.f32.mrb[20].mxu1 }
 0x6eb   :  { %v2220_v45 = vpop.f32.mrb[21].mxu1 }
 0x6ec   :  { %v2787_v46 = vpop.f32.mrb[22].mxu1  ;;  %v916_v47 = vpop.f32.mrb[16].mxu0 }
 0x6ed   :  { %v871_v39 = vpack.c.bf16 %v2787_v46, %v2785_v44  ;;  %v2221_v48 = vpop.f32.mrb[23].mxu1  ;;  %v2226_v49 = vpop.f32.mrb[17].mxu0  ;;  %v974_v38 = vsel %vm474_vm3, %v916_v47, -inf }
 0x6ee   :  { %975 = vmax.xlane.f32.xlu0 %v974_v38  ;;  %v919_v50 = vpop.f32.mrb[18].mxu0 }
 0x6ef   :  { %v2227_v51 = vpop.f32.mrb[19].mxu0  ;;  %v977_v52 = vsel %vm474_vm3, %v919_v50, -inf }
 0x6f0   :  { %978 = vmax.xlane.f32.xlu1 %v977_v52 }
 0x6f2   :  { %v967_v53 = vpop.f32.mrb[24].mxu1 }
 0x6f3   :  { %v2232_v54 = vpop.f32.mrb[25].mxu1  ;;  %v980_v7 = vsel %vm474_vm3, %v967_v53, -inf }
 0x6f4   :  { %981 = vmax.xlane.f32.xlu0 %v980_v7  ;;  %v970_v10 = vpop.f32.mrb[26].mxu1 }
 0x6f5   :  { %v2233_v55 = vpop.f32.mrb[27].mxu1  ;;  %v983_v56 = vsel %vm474_vm3, %v970_v10, -inf }
 0x6f8   :  { %984 = vmax.xlane.f32.xlu0 %v983_v56 }
 0x77b   :  { %v976_v57 = vpop.xlane.xlu0 %975 }
 0x77c   :  { %v986_v58 = vsub.f32 %v916_v47, %v976_v57 }
 0x77d   :  { %v979_v59 = vpop.xlane.xlu1 %978 }
 0x77e   :  { %v990_v60 = vmul.f32 1.442695, %v986_v58  ;;  %v987_v61 = vsub.f32 %v919_v50, %v979_v59 }
 0x780   :  { %2379 = vpow2.f32 %v990_v60  ;;  %v992_v62 = vmul.f32 1.442695, %v987_v61 }
 0x781   :  { %v982_v63 = vpop.xlane.xlu0 %981 }
 0x782   :  { %2381 = vpow2.f32 %v992_v62  ;;  %v988_v0 = vsub.f32 %v967_v53, %v982_v63 }
 0x784   :  { %v994_v2 = vmul.f32 1.442695, %v988_v0 }
 0x785   :  { %v985_v18 = vpop.xlane.xlu0 %984 }
 0x786   :  { %2383 = vpow2.f32 %v994_v2  ;;  %v989_v20 = vsub.f32 %v970_v10, %v985_v18 }
 0x788   :  { %v996_v23 = vmul.f32 1.442695, %v989_v20 }
 0x78a   :  { %v2380_v9 = vpop.eup %2379  ;;  %2385 = vpow2.f32 %v996_v23 }
 0x78b   :  { %v998_v12 = vsel %vm474_vm3, %v2380_v9, 0.0 }
 0x78c   :  { %v2382_v13 = vpop.eup %2381  ;;  %999 = vadd.xlane.f32.xlu0 %v998_v12 }
 0x78d   :  { %v1001_v15 = vsel %vm474_vm3, %v2382_v13, 0.0 }
 0x78e   :  { %1002 = vadd.xlane.f32.xlu1 %v1001_v15 }
 0x790   :  { %v2384_v16 = vpop.eup %2383 }
 0x791   :  { %v1004_v17 = vsel %vm474_vm3, %v2384_v16, 0.0 }
 0x792   :  { %1005 = vadd.xlane.f32.xlu0 %v1004_v17 }
 0x794   :  { %v2386_v24 = vpop.eup %2385 }
 0x795   :  { %v1007_v25 = vsel %vm474_vm3, %v2386_v24, 0.0 }
 0x79f   :  { %1069 = vrot.lane.b32.xlu1 %v2681_v14, %s2465_s18 }
 0x7a3   :  { %1122 = vrot.lane.b32.xlu1 %v2679_v11, %s2466_s19 }
 0x7a8   :  { %1020 = vrot.lane.b32.xlu0 %v2679_v11, %s2465_s18 }
 0x7ac   :  { %1120 = vrot.lane.b32.xlu0 %v2677_v8, %s2466_s19 }
 0x7c7   :  { %1008 = vadd.xlane.f32.xlu1 %v1007_v25 }
 0x7d8   :  { %1173 = vrot.lane.b32.xlu1 %v2681_v14, %s2466_s19 }
 0x7dc   :  { %1171 = vrot.lane.b32.xlu1 %v2675_v1, %s2466_s19 }
 0x819   :  { %v1000_v26 = vpop.xlane.xlu0 %999 }
 0x81a   :  { %2387 = vrcp.f32 %v1000_v26 }
 0x81b   :  { %v1003_v27 = vpop.xlane.xlu1 %1002 }
 0x81c   :  { %2389 = vrcp.f32 %v1003_v27 }
 0x81f   :  { %v1070_v28 = vpop.permute.xlu1 %1069  ;;  %v1006_v29 = vpop.xlane.xlu0 %1005 }
 0x820   :  { %v1075_v8 = vsel %vm526_vm4, %v1070_v28, 0  ;;  %2391 = vrcp.f32 %v1006_v29 }
 0x821   :  { %2241 = vmatpush3.bf16.msra.mxu1 %v1075_v8 }
 0x822   :  { %2252 = vmatprep.subr.bf16.mxu1 %v2459_v31 }
 0x823   :  { %v1021_v32 = vpop.permute.xlu0 %1020  ;;  %v1123_v47 = vpop.permute.xlu1 %1122 }
 0x824   :  { %v2388_v35 = vpop.eup %2387  ;;  %v1026_v36 = vsel %vm526_vm4, %v1021_v32, 0  ;;  %v1128_v48 = vsel %vm379_vm2, %v1123_v47, 0 }
 0x825   :  { %2235 = vmatpush3.bf16.msra.mxu0 %v1026_v36  ;;  %v1014_v1 = vmul.f32 %v2388_v35, %v2380_v9 }
 0x826   :  { %v2390_v40 = vpop.eup %2389  ;;  %2246 = vmatprep.subr.bf16.mxu0 %v2459_v31 }
 0x827   :  { %v1015_v43 = vmul.f32 %v2390_v40, %v2382_v13  ;;  %v1121_v49 = vpop.permute.xlu0 %1120 }
 0x829   :  { %v1018_v45 = vpack.c.bf16 %v1015_v43, %v1014_v1 }
 0x82a   :  { %v2392_v50 = vpop.eup %2391 }
 0x82b   :  { %2237 = vmatmul.mubr.msk.bf16.vlgmr.msra.gmra.mrb[20].mxu0 %vm474_vm3, %v1018_v45  ;;  %v1016_v52 = vmul.f32 %v2392_v50, %v2384_v16 }
 0x82c   :  { %2248 = vmatprep.mubr.msk.bf16.mxu0 %vm2460_vm1, %v2459_v31 }
 0x82e   :  { %2247 = vmatpush3.bf16.xpose.msra.mxu0 %v1128_v48 }
 0x82f   :  { %2258 = vmatprep.subr.bf16.mxu0 %v2459_v31 }
 0x835   :  { %2249 = vmatmul.mubr.msk.bf16.vlgmr.msra.gmra.mrb[24].mxu0 %vm379_vm2, %v1121_v49 }
 0x836   :  { %2260 = vmatprep.mubr.msk.bf16.mxu0 %vm2460_vm1, %v2459_v31 }
 0x854   :  { %v1009_v38 = vpop.xlane.xlu1 %1008 }
 0x855   :  { %2393 = vrcp.f32 %v1009_v38 }
 0x858   :  { %v1174_v54 = vpop.permute.xlu1 %1173 }
 0x859   :  { %v1179_v10 = vsel %vm379_vm2, %v1174_v54, 0 }
 0x85c   :  { %v1172_v55 = vpop.permute.xlu1 %1171 }
 0x85f   :  { %v2394_v51 = vpop.eup %2393 }
 0x860   :  { %v1017_v53 = vmul.f32 %v2394_v51, %v2386_v24 }
 0x862   :  { %v1019_v7 = vpack.c.bf16 %v1017_v53, %v1016_v52 }
 0x864   :  { %2243 = vmatmul.mubr.msk.bf16.vlgmr.msra.gmra.mrb[28].mxu1 %vm474_vm3, %v1019_v7 }
 0x865   :  { %2253 = vmatpush3.bf16.xpose.msra.mxu1 %v1179_v10  ;;  %2254 = vmatprep.mubr.msk.bf16.mxu1 %vm2460_vm1, %v2459_v31 }
 0x866   :  { %2264 = vmatprep.subr.bf16.mxu1 %v2459_v31 }
 0x86c   :  { %2255 = vmatmul.mubr.msk.bf16.vlgmr.msra.gmra.mrb[32].mxu1 %vm379_vm2, %v1172_v55 }
 0x86d   :  { %2266 = vmatprep.mubr.msk.bf16.mxu1 %vm2460_vm1, %v2459_v31 }
 0x8fe   :  { %v1062_v56 = vpop.f32.mrb[20].mxu0 }
 0x8ff   :  { %v2238_v57 = vpop.f32.mrb[21].mxu0 }
 0x900   :  { %v1065_v58 = vpop.f32.mrb[22].mxu0 }
 0x901   :  { %v1118_v59 = vpack.c.bf16 %v1065_v58, %v1062_v56  ;;  %v2239_v60 = vpop.f32.mrb[23].mxu0 }
 0x908   :  { %v1164_v61 = vpop.f32.mrb[24].mxu0 }
 0x909   :  { %v2250_v62 = vpop.f32.mrb[25].mxu0  ;;  %v1222_v63 = vsel %vm474_vm3, %v1164_v61, -inf }
 0x90a   :  { %1223 = vmax.xlane.f32.xlu0 %v1222_v63  ;;  %v1167_v0 = vpop.f32.mrb[26].mxu0  ;;  %v2303_v62 = vld [vmem:[%s3082_s8] sm:$0xff]   ;;  %v2304_v63 = vld [vmem:[%s3082_s8 + $0x8] sm:$0xff]  }
 0x90b   :  { %v2251_v2 = vpop.f32.mrb[27].mxu0  ;;  %v1225_v9 = vsel %vm474_vm3, %v1167_v0, -inf }
 0x90c   :  { %1226 = vmax.xlane.f32.xlu1 %v1225_v9  ;;  %v2306_v2 = vld [vmem:[%s3082_s8 + $0x18] sm:$0xff]  }
 0x937   :  { %v1111_v12 = vpop.f32.mrb[28].mxu1 }
 0x938   :  { %v2244_v13 = vpop.f32.mrb[29].mxu1 }
 0x939   :  { %v1114_v15 = vpop.f32.mrb[30].mxu1 }
 0x93a   :  { %v1119_v16 = vpack.c.bf16 %v1114_v15, %v1111_v12  ;;  %v2245_v31 = vpop.f32.mrb[31].mxu1 }
 0x93f   :  { %v1215_v17 = vpop.f32.mrb[32].mxu1 }
 0x940   :  { %v2256_v18 = vpop.f32.mrb[33].mxu1  ;;  %v1228_v20 = vsel %vm474_vm3, %v1215_v17, -inf }
 0x941   :  { %1229 = vmax.xlane.f32.xlu0 %v1228_v20  ;;  %v1218_v23 = vpop.f32.mrb[34].mxu1 }
 0x942   :  { %v2257_v24 = vpop.f32.mrb[35].mxu1  ;;  %v1231_v25 = vsel %vm474_vm3, %v1218_v23, -inf }
 0x945   :  { %1232 = vmax.xlane.f32.xlu0 %v1231_v25 }
 0x997   :  { %v1224_v26 = vpop.xlane.xlu0 %1223 }
 0x998   :  { %v1234_v27 = vsub.f32 %v1164_v61, %v1224_v26 }
 0x999   :  { %v1227_v28 = vpop.xlane.xlu1 %1226 }
 0x99a   :  { %v1238_v29 = vmul.f32 1.442695, %v1234_v27  ;;  %v1235_v8 = vsub.f32 %v1167_v0, %v1227_v28  ;;  %v2305_v0 = vld [vmem:[%s3082_s8 + $0x10] sm:$0xff]  }
 0x99c   :  { %2395 = vpow2.f32 %v1238_v29  ;;  %v1240_v32 = vmul.f32 1.442695, %v1235_v8 }
 0x99e   :  { %2397 = vpow2.f32 %v1240_v32 }
 0x9a6   :  { %v2396_v35 = vpop.eup %2395 }
 0x9a7   :  { %v1246_v36 = vsel %vm474_vm3, %v2396_v35, 0.0 }
 0x9a8   :  { %v2398_v40 = vpop.eup %2397  ;;  %1247 = vadd.xlane.f32.xlu0 %v1246_v36 }
 0x9a9   :  { %v1249_v1 = vsel %vm474_vm3, %v2398_v40, 0.0 }
 0x9aa   :  { %1250 = vadd.xlane.f32.xlu1 %v1249_v1 }
 0x9ce   :  { %v1230_v43 = vpop.xlane.xlu0 %1229 }
 0x9cf   :  { %v1236_v45 = vsub.f32 %v1215_v17, %v1230_v43 }
 0x9d1   :  { %v1242_v47 = vmul.f32 1.442695, %v1236_v45 }
 0x9d2   :  { %v1233_v48 = vpop.xlane.xlu0 %1232 }
 0x9d3   :  { %2399 = vpow2.f32 %v1242_v47  ;;  %v1237_v49 = vsub.f32 %v1218_v23, %v1233_v48 }
 0x9d5   :  { %v1244_v38 = vmul.f32 1.442695, %v1237_v49 }
 0x9d7   :  { %2401 = vpow2.f32 %v1244_v38 }
 0x9dd   :  { %v2400_v50 = vpop.eup %2399 }
 0x9de   :  { %v1252_v51 = vsel %vm474_vm3, %v2400_v50, 0.0 }
 0x9df   :  { %1253 = vadd.xlane.f32.xlu0 %v1252_v51 }
 0x9e1   :  { %v2402_v52 = vpop.eup %2401 }
 0x9e2   :  { %v1255_v53 = vsel %vm474_vm3, %v2402_v52, 0.0 }
 0x9e3   :  { %1256 = vadd.xlane.f32.xlu1 %v1255_v53 }
 0x9f4   :  { %1317 = vrot.lane.b32.xlu1 %v2681_v14, %s2467_s6 }
 0x9f5   :  { %1268 = vrot.lane.b32.xlu0 %v2679_v11, %s2467_s6 }
 0x9f8   :  { %1370 = vrot.lane.b32.xlu1 %v870_v42, %s2467_s6 }
 0x9f9   :  { %1376 = vrot.lane.b32.xlu0 %v1118_v59, %s2465_s18 }
 0x9fc   :  { %1372 = vrot.lane.b32.xlu1 %v871_v39, %s2467_s6 }
 0xa00   :  { %1378 = vrot.lane.b32.xlu1 %v1119_v16, %s2465_s18 }
 0xa35   :  { %v1248_v7 = vpop.xlane.xlu0 %1247 }
 0xa37   :  { %v1251_v54 = vpop.xlane.xlu1 %1250 }
 0xa38   :  { %2403 = vrcp.f32 %v1251_v54 }
 0xa39   :  { %2405 = vrcp.f32 %v1248_v7 }
 0xa42   :  { %v2404_v10 = vpop.eup %2403 }
 0xa43   :  { %v2406_v55 = vpop.eup %2405  ;;  %v1263_v11 = vmul.f32 %v2404_v10, %v2398_v40 }
 0xa44   :  { %v1262_v41 = vmul.f32 %v2406_v55, %v2396_v35 }
 0xa46   :  { %v1266_v44 = vpack.c.bf16 %v1263_v11, %v1262_v41  ;;  %v2310_v41 = vld [vmem:[%s3086_s12 + $0x10] ss:$8 sps:$4 sm:$0xff]  }
 0xa6c   :  { %v1254_v14 = vpop.xlane.xlu0 %1253 }
 0xa6d   :  { %2407 = vrcp.f32 %v1254_v14 }
 0xa70   :  { %v1257_v56 = vpop.xlane.xlu1 %1256  ;;  %v1269_v37 = vpop.permute.xlu0 %1268 }
 0xa71   :  { %2409 = vrcp.f32 %v1257_v56  ;;  %v1274_v42 = vsel %vm526_vm4, %v1269_v37, 0  ;;  %v2307_v56 = vld [vmem:[%s3086_s12] ss:$8 sps:$4 sm:$0xff]   ;;  %v2312_v37 = vld [vmem:[%s3086_s12 + $0x14] ss:$8 sps:$4 sm:$0xff]  }
 0xa72   :  { %2259 = vmatpush3.bf16.msra.mxu0 %v1274_v42  ;;  %v2315_v42 = vld [vmem:[%s3086_s12 + $0x24] ss:$8 sps:$4 sm:$0xff]  }
 0xa73   :  { %2270 = vmatprep.subr.bf16.mxu0 %v2303_v62 }
 0xa74   :  { %v1318_v46 = vpop.permute.xlu1 %1317  ;;  %v1377_v25 = vpop.permute.xlu0 %1376 }
 0xa75   :  { %v1323_v39 = vsel %vm526_vm4, %v1318_v46, 0  ;;  %2261 = vmatmul.mubr.msk.bf16.vlgmr.msra.gmra.mrb[28].mxu0 %vm474_vm3, %v1266_v44  ;;  %v2313_v44 = vld [vmem:[%s3086_s12 + $0x20] ss:$8 sps:$4 sm:$0xff]   ;;  %v2318_v46 = vld [vmem:[%s3086_s12 + $0x34] ss:$8 sps:$4 sm:$0xff]  }
 0xa76   :  { %2265 = vmatpush3.bf16.msra.mxu1 %v1323_v39  ;;  %2271 = vmatpush3.bf16.msra.mxu0 %v2303_v62  ;;  %v2316_v39 = vld [vmem:[%s3086_s12 + $0x30] ss:$8 sps:$4 sm:$0xff]  }
 0xa77   :  { %v2408_v57 = vpop.eup %2407  ;;  %2272 = vmatprep.subr.bf16.mxu0 %v2304_v63 }
 0xa78   :  { %v1264_v59 = vmul.f32 %v2408_v57, %v2400_v50  ;;  %v1371_v24 = vpop.permute.xlu1 %1370  ;;  %v2468_v57 = vmov 0  }
 0xa79   :  { %v1388_v26 = vsel %vm379_vm2, %v620_v22, %v1371_v24 }
 0xa7a   :  { %2273 = vmatpush3.bf16.msra.mxu0 %v2304_v63  ;;  %v1394_v27 = vsel %vm1392_vm5, %v1388_v26, %v1377_v25 }
 0xa7b   :  { %v2410_v58 = vpop.eup %2409  ;;  %2274 = vmatprep.subr.bf16.mxu0 %v2305_v0 }
 0xa7c   :  { %v1265_v60 = vmul.f32 %v2410_v58, %v2402_v52  ;;  %v1373_v29 = vpop.permute.xlu1 %1372 }
 0xa7d   :  { %v1391_v35 = vsel %vm379_vm2, %v621_v34, %v1373_v29 }
 0xa7e   :  { %v1267_v61 = vpack.c.bf16 %v1265_v60, %v1264_v59  ;;  %2275 = vmatpush3.bf16.msra.mxu0 %v2305_v0 }
 0xa7f   :  { %2276 = vmatprep.subr.bf16.mxu0 %v2306_v2 }
 0xa80   :  { %2267 = vmatmul.mubr.msk.bf16.vlgmr.msra.gmra.mrb[36].mxu1 %vm474_vm3, %v1267_v61  ;;  %v1379_v32 = vpop.permute.xlu1 %1378 }
 0xa81   :  { %v1396_v36 = vsel %vm1392_vm5, %v1391_v35, %v1379_v32  ;;  %1684 = vmatprep.mubr.bf16.mxu1 %v2468_v57 }
 0xa82   :  { %2277 = vmatpush3.bf16.msra.mxu0 %v2306_v2 }
 0xb48   :  { %v1310_v9 = vpop.f32.mrb[28].mxu0 }
 0xb49   :  { %v2262_v12 = vpop.f32.mrb[29].mxu0 }
 0xb4a   :  { %v1313_v13 = vpop.f32.mrb[30].mxu0 }
 0xb4b   :  { %v1366_v15 = vpack.c.bf16 %v1313_v13, %v1310_v9  ;;  %v2263_v16 = vpop.f32.mrb[31].mxu0 }
 0xb4d   :  { %1382 = vrot.lane.b32.xlu0 %v1366_v15, %s2463_s7 }
 0xb53   :  { %v1359_v31 = vpop.f32.mrb[36].mxu1 }
 0xb54   :  { %v2268_v17 = vpop.f32.mrb[37].mxu1 }
 0xb55   :  { %v1362_v18 = vpop.f32.mrb[38].mxu1 }
 0xb56   :  { %v1367_v20 = vpack.c.bf16 %v1362_v18, %v1359_v31  ;;  %v2269_v23 = vpop.f32.mrb[39].mxu1 }
 0xb58   :  { %1384 = vrot.lane.b32.xlu1 %v1367_v20, %s2463_s7 }
 0xbbf   :  { %v1383_v28 = vpop.permute.xlu0 %1382 }
 0xbc0   :  { %v1399_v8 = vsel %vm1397_vm6, %v1394_v27, %v1383_v28 }
 0xbc1   :  { %2278 = vmatprep.mubr.msk.bf16.mxu0 %vm69_vm0, %v1399_v8 }
 0xbca   :  { %v1385_v40 = vpop.permute.xlu1 %1384 }
 0xbcb   :  { %v1401_v1 = vsel %vm1397_vm6, %v1396_v36, %v1385_v40 }
 0xbcc   :  { %2279 = vmatmul.mubr.msk.bf16.vlgmr.msra.gmra.mrb[32].mxu0 %vm69_vm0, %v1401_v1 }
 0xc9f   :  { %v2280_v21 = vpop.f32.mrb[32].mxu0 }
 0xca0   :  { %v1479_v22 = vpop.f32.mrb[33].mxu0 }
 0xca1   :  { %v1480_v43 = vadd.f32 %v2022_v19, %v1479_v22  ;;  %v2281_v45 = vpop.f32.mrb[34].mxu0 }
 0xca2   :  { %v1482_v47 = vpop.f32.mrb[35].mxu0  ;;  %v1491_v30 = vadd.f32 %v2281_v45, %v2022_v19 }
 0xca3   :  { %v2877_v48 = vadd.f32 %v2568_v4, %v1480_v43  ;;  %v1483_v33 = vadd.f32 %v2022_v19, %v1482_v47  ;;  %v1488_v4 = vadd.f32 %v2280_v21, %v2022_v19  ;;  %v2029_v47 = vld [vmem:[%s3084_s10] ss:$0 sm:$0xff] }
 0xca4   :  { %v2887_v50 = vadd.f32 %v2570_v5, %v1491_v30 }
 0xca5   :  { %v2880_v34 = vadd.f32 %v2572_v6, %v1483_v33  ;;  %v1500_v49 = vsel %vm69_vm0, %v2877_v48, 0.0  ;;  %v1516_v38 = vmul.f32 %v2877_v48, %v2877_v48  ;;  %v2899_v5 = vadd.f32 %v2566_v3, %v1488_v4  ;;  %v2309_v3 = vld [vmem:[%s3086_s12 + $0x4] ss:$8 sps:$4 sm:$0xff]   ;;  %v2030_v4 = vld [vmem:[%s3085_s11] ss:$0 sm:$0xff] }
 0xca6   :  { %1501 = vadd.xlane.f32.xlu0 %v1500_v49  ;;  %v1509_v53 = vsel %vm69_vm0, %v2887_v50, 0.0  ;;  %v1519_v54 = vmul.f32 %v2887_v50, %v2887_v50  ;;  %1652 = vmatprep.subr.bf16.mxu1 %v2309_v3 }
 0xca7   :  { %v1503_v51 = vsel %vm69_vm0, %v2880_v34, 0.0  ;;  %v1520_v52 = vsel %vm69_vm0, %v1516_v38, 0.0  ;;  %v1517_v6 = vmul.f32 %v2880_v34, %v2880_v34  ;;  %v1506_v14 = vsel %vm69_vm0, %v2899_v5, 0.0  ;;  %1653 = vmatpush1.bf16.msra.mxu1 %v2307_v56 }
 0xca8   :  { %1504 = vadd.xlane.f32.xlu1 %v1503_v51  ;;  %v1529_v10 = vsel %vm69_vm0, %v1519_v54, 0.0  ;;  %v1518_v55 = vmul.f32 %v2899_v5, %v2899_v5  ;;  %1654 = vmatprep.subr.bf16.mxu1 %v2312_v37 }
 0xca9   :  { %v1523_v7 = vsel %vm69_vm0, %v1517_v6, 0.0 }
 0xcaa   :  { %1521 = vadd.xlane.f32.xlu0 %v1520_v52  ;;  %v1526_v11 = vsel %vm69_vm0, %v1518_v55, 0.0 }
 0xcab   :  { %1655 = vmatpush1.bf16.msra.mxu1 %v2310_v41 }
 0xcac   :  { %1510 = vadd.xlane.f32.xlu1 %v1509_v53  ;;  %1656 = vmatprep.subr.bf16.mxu1 %v2315_v42 }
 0xcae   :  { %1524 = vadd.xlane.f32.xlu0 %v1523_v7 }
 0xcaf   :  { %1657 = vmatpush1.bf16.msra.mxu1 %v2313_v44  ;;  %v2319_v44 = vld [vmem:[%s3088_s14 + $0x40] sm:$0xff]  }
 0xcb0   :  { %1530 = vadd.xlane.f32.xlu1 %v1529_v10  ;;  %1658 = vmatprep.subr.bf16.mxu1 %v2318_v46  ;;  %v2320_v46 = vld [vmem:[%s3088_s14] sm:$0xff]  }
 0xcb1   :  { %2122 = vmatprep.subr.bf16.mxu0 %v2319_v44 }
 0xcb2   :  { %1507 = vadd.xlane.f32.xlu0 %v1506_v14  ;;  %2123 = vmatpush3.bf16.msra.mxu0 %v2320_v46 }
 0xcb3   :  { %1659 = vmatpush1.bf16.msra.mxu1 %v2316_v39  ;;  %v2321_v39 = vld [vmem:[%s3088_s14 + $0x48] sm:$0xff]  }
 0xcb4   :  { %2124 = vmatprep.subr.bf16.mxu0 %v2321_v39 }
 0xcb6   :  { %1527 = vadd.xlane.f32.xlu0 %v1526_v11 }
 0xd33   :  { %v1502_v58 = vpop.xlane.xlu0 %1501 }
 0xd34   :  { %v1512_v59 = vmul.f32 0.015625, %v1502_v58  ;;  %v2323_v58 = vld [vmem:[%s3088_s14 + $0x50] sm:$0xff]  }
 0xd35   :  { %v1505_v60 = vpop.xlane.xlu1 %1504 }
 0xd36   :  { %v1536_v62 = vmul.f32 %v1512_v59, %v1512_v59  ;;  %v1513_v63 = vmul.f32 0.015625, %v1505_v60  ;;  %v1556_v21 = vsub.f32 %v2877_v48, %v1512_v59  ;;  %v2324_v59 = vld [vmem:[%s3088_s14 + $0x10] sm:$0xff]   ;;  %v2325_v60 = vld [vmem:[%s3088_s14 + $0x58] sm:$0xff]  }
 0xd37   :  { %v1522_v61 = vpop.xlane.xlu0 %1521 }
 0xd38   :  { %v1532_v0 = vmul.f32 0.015625, %v1522_v61  ;;  %v1537_v15 = vmul.f32 %v1513_v63, %v1513_v63  ;;  %v1557_v30 = vsub.f32 %v2880_v34, %v1513_v63  ;;  %v2326_v61 = vld [vmem:[%s3088_s14 + $0x18] sm:$0xff]   ;;  %v2328_v63 = vld [vmem:[%s3088_s14 + $0x20] sm:$0xff]  }
 0xd39   :  { %v1511_v2 = vpop.xlane.xlu1 %1510 }
 0xd3a   :  { %v1540_v9 = vsub.f32 %v1532_v0, %v1536_v62  ;;  %v1515_v12 = vmul.f32 0.015625, %v1511_v2  ;;  %v2327_v62 = vld [vmem:[%s3088_s14 + $0x60] sm:$0xff]   ;;  %v2329_v0 = vld [vmem:[%s3088_s14 + $0x68] sm:$0xff]  }
 0xd3b   :  { %v1525_v13 = vpop.xlane.xlu0 %1524  ;;  %v2330_v2 = vld [vmem:[%s3088_s14 + $0x28] sm:$0xff]  }
 0xd3c   :  { %v1544_v16 = vmax.f32 %v1540_v9, 0.0  ;;  %v1533_v31 = vmul.f32 0.015625, %v1525_v13  ;;  %v1539_v20 = vmul.f32 %v1515_v12, %v1515_v12  ;;  %v1559_v52 = vsub.f32 %v2887_v50, %v1515_v12  ;;  %v2331_v9 = vld [vmem:[%s3088_s14 + $0x70] sm:$0xff]   ;;  %v2333_v13 = vld [vmem:[%s3088_s14 + $0x78] sm:$0xff]  }
 0xd3d   :  { %v1531_v17 = vpop.xlane.xlu1 %1530  ;;  %v2332_v12 = vld [vmem:[%s3088_s14 + $0x30] sm:$0xff]  }
 0xd3e   :  { %v1548_v18 = vadd.f32 1e-05, %v1544_v16  ;;  %v1541_v23 = vsub.f32 %v1533_v31, %v1537_v15  ;;  %v1535_v24 = vmul.f32 0.015625, %v1531_v17  ;;  %v2334_v15 = vld [vmem:[%s3088_s14 + $0x38] sm:$0xff]   ;;  %v1596_v16 = vlaneseq }
 0xd3f   :  { %v1508_v25 = vpop.xlane.xlu0 %1507 }
 0xd40   :  { %2411 = vrsqrt.f32 %v1548_v18  ;;  %v1545_v26 = vmax.f32 %v1541_v23, 0.0  ;;  %v1543_v27 = vsub.f32 %v1535_v24, %v1539_v20  ;;  %v1514_v28 = vmul.f32 0.015625, %v1508_v25  ;;  %v1594_v18 = vld [vmem:[%s3087_s13] sm:$0x3] }
 0xd41   :  { %v1597_v31 = vshrl.u32 %v1596_v16, 7 }
 0xd42   :  { %v1549_v29 = vadd.f32 1e-05, %v1545_v26  ;;  %v1547_v8 = vmax.f32 %v1543_v27, 0.0  ;;  %v1538_v36 = vmul.f32 %v1514_v28, %v1514_v28  ;;  %v1558_v10 = vsub.f32 %v2899_v5, %v1514_v28 }
 0xd43   :  { %v1528_v32 = vpop.xlane.xlu0 %1527  ;;  %v1598_v17 = vsub.s32 0, %v1597_v31  ;;  %v1602_v20 = vsub.s32 1, %v1597_v31 }
 0xd44   :  { %2413 = vrsqrt.f32 %v1549_v29  ;;  %v1551_v35 = vadd.f32 1e-05, %v1547_v8  ;;  %v1534_v40 = vmul.f32 0.015625, %v1528_v32 }
 0xd45   :  { %v1599_v23 = vrot.slane %v1594_v18, %v1598_v17  ;;  %v1603_v24 = vrot.slane %v1594_v18, %v1602_v20 }
 0xd46   :  { %2415 = vrsqrt.f32 %v1551_v35  ;;  %v1542_v1 = vsub.f32 %v1534_v40, %v1538_v36 }
 0xd48   :  { %v1546_v19 = vmax.f32 %v1542_v1, 0.0 }
 0xd4a   :  { %v2412_v22 = vpop.eup %2411  ;;  %v1550_v43 = vadd.f32 1e-05, %v1546_v19 }
 0xd4b   :  { %v1560_v45 = vmul.f32 %v2412_v22, %v1556_v21 }
 0xd4c   :  { %2417 = vrsqrt.f32 %v1550_v43 }
 0xd4d   :  { %v1570_v38 = vmul.f32 %v2029_v47, %v1560_v45 }
 0xd4e   :  { %v2414_v33 = vpop.eup %2413 }
 0xd4f   :  { %v1561_v49 = vmul.f32 %v2414_v33, %v1557_v30  ;;  %v1580_v53 = vadd.f32 %v2030_v4, %v1570_v38 }
 0xd50   :  { %v2416_v51 = vpop.eup %2415 }
 0xd51   :  { %v1571_v6 = vmul.f32 %v2029_v47, %v1561_v49  ;;  %v1563_v7 = vmul.f32 %v2416_v51, %v1559_v52 }
 0xd53   :  { %v1581_v54 = vadd.f32 %v2030_v4, %v1571_v6  ;;  %v1573_v3 = vmul.f32 %v2029_v47, %v1563_v7 }
 0xd55   :  { %v1584_v14 = vpack.c.bf16 %v1581_v54, %v1580_v53  ;;  %v1583_v41 = vadd.f32 %v2030_v4, %v1573_v3 }
 0xd56   :  { %v2418_v55 = vpop.eup %2417 }
 0xd57   :  { %2039 = vmatmul.mubr.msk.bf16.vlgmr.msra.gmra.mrb[40].mxu1 %vm69_vm0, %v1584_v14  ;;  %v1562_v11 = vmul.f32 %v2418_v55, %v1558_v10 }
 0xd58   :  { %1694 = vmatprep.mubr.bf16.mxu1 %v2468_v57  ;;  %v2322_v57 = vld [vmem:[%s3088_s14 + $0x8] sm:$0xff]  }
 0xd59   :  { %v1572_v56 = vmul.f32 %v2029_v47, %v1562_v11  ;;  %2125 = vmatpush3.bf16.msra.mxu0 %v2322_v57 }
 0xd5a   :  { %2126 = vmatprep.subr.bf16.mxu0 %v2323_v58 }
 0xd5b   :  { %v1582_v37 = vadd.f32 %v2030_v4, %v1572_v56 }
 0xd5d   :  { %v1585_v42 = vpack.c.bf16 %v1583_v41, %v1582_v37  ;;  %2127 = vmatpush3.bf16.msra.mxu0 %v2324_v59 }
 0xd5e   :  { %2128 = vmatprep.subr.bf16.mxu0 %v2325_v60 }
 0xd5f   :  { %2040 = vmatmul.mubr.msk.bf16.gmra.mrb[44].mxu1 %vm69_vm0, %v1585_v42 }
 0xd61   :  { %2129 = vmatpush3.bf16.msra.mxu0 %v2326_v61 }
 0xd62   :  { %2130 = vmatprep.subr.bf16.mxu0 %v2327_v62 }
 0xd65   :  { %2131 = vmatpush3.bf16.msra.mxu0 %v2328_v63 }
 0xd66   :  { %2132 = vmatprep.subr.bf16.mxu0 %v2329_v0 }
 0xd69   :  { %2133 = vmatpush3.bf16.msra.mxu0 %v2330_v2 }
 0xd6a   :  { %2134 = vmatprep.subr.bf16.mxu0 %v2331_v9 }
 0xd6d   :  { %2135 = vmatpush3.bf16.msra.mxu0 %v2332_v12 }
 0xd6e   :  { %2136 = vmatprep.subr.bf16.mxu0 %v2333_v13 }
 0xd71   :  { %2137 = vmatpush3.bf16.msra.mxu0 %v2334_v15 }
 0xe2a   :  { %v1686_v25 = vpop.f32.mrb[40].mxu1 }
 0xe2b   :  { %v2995_v26 = vadd.f32 %v1686_v25, %v1599_v23  ;;  %v1688_v27 = vpop.f32.mrb[41].mxu1 }
 0xe2c   :  { %v2997_v28 = vadd.f32 %v1688_v27, %v1603_v24  ;;  %v1690_v29 = vpop.f32.mrb[42].mxu1 }
 0xe2d   :  { %v1705_v8 = vmul.f32 %v2995_v26, %v2995_v26  ;;  %v3001_v32 = vadd.f32 %v1690_v29, %v1599_v23  ;;  %v1692_v35 = vpop.f32.mrb[43].mxu1 }
 0xe2e   :  { %v1706_v36 = vmul.f32 %v2997_v28, %v2997_v28  ;;  %v3005_v40 = vadd.f32 %v1692_v35, %v1603_v24 }
 0xe2f   :  { %v1713_v1 = vmul.f32 %v1705_v8, %v2995_v26  ;;  %v1707_v19 = vmul.f32 %v3001_v32, %v3001_v32 }
 0xe30   :  { %v1714_v21 = vmul.f32 %v1706_v36, %v2997_v28  ;;  %v1708_v22 = vmul.f32 %v3005_v40, %v3005_v40 }
 0xe31   :  { %v1721_v43 = vmul.f32 0.044715, %v1713_v1  ;;  %v1715_v45 = vmul.f32 %v1707_v19, %v3001_v32 }
 0xe32   :  { %v1722_v47 = vmul.f32 0.044715, %v1714_v21  ;;  %v1716_v30 = vmul.f32 %v1708_v22, %v3005_v40  ;;  %v1696_v33 = vpop.f32.mrb[44].mxu1 }
 0xe33   :  { %v1729_v49 = vadd.f32 %v1721_v43, %v2995_v26  ;;  %v1723_v38 = vmul.f32 0.044715, %v1715_v45  ;;  %v3016_v51 = vadd.f32 %v1696_v33, %v1599_v23  ;;  %v1698_v4 = vpop.f32.mrb[45].mxu1 }
 0xe34   :  { %v1730_v52 = vadd.f32 %v1722_v47, %v2997_v28  ;;  %v1724_v6 = vmul.f32 0.044715, %v1716_v30  ;;  %v3019_v53 = vadd.f32 %v1698_v4, %v1603_v24  ;;  %v1700_v54 = vpop.f32.mrb[46].mxu1 }
 0xe35   :  { %v1737_v7 = vmul.f32 0.7978846, %v1729_v49  ;;  %v1731_v10 = vadd.f32 %v1723_v38, %v3001_v32  ;;  %v1709_v14 = vmul.f32 %v3016_v51, %v3016_v51  ;;  %v3024_v55 = vadd.f32 %v1700_v54, %v1599_v23  ;;  %v1702_v11 = vpop.f32.mrb[47].mxu1 }
 0xe36   :  { %v1738_v3 = vmul.f32 0.7978846, %v1730_v52  ;;  %v1732_v56 = vadd.f32 %v1724_v6, %v3005_v40  ;;  %v1710_v37 = vmul.f32 %v3019_v53, %v3019_v53  ;;  %v3029_v41 = vadd.f32 %v1702_v11, %v1603_v24 }
 0xe37   :  { %2419 = vtanh.f32 %v1737_v7  ;;  %v1739_v42 = vmul.f32 0.7978846, %v1731_v10  ;;  %v1717_v44 = vmul.f32 %v1709_v14, %v3016_v51  ;;  %v1711_v46 = vmul.f32 %v3024_v55, %v3024_v55 }
 0xe38   :  { %2421 = vtanh.f32 %v1738_v3  ;;  %v1740_v39 = vmul.f32 0.7978846, %v1732_v56  ;;  %v1718_v57 = vmul.f32 %v1710_v37, %v3019_v53  ;;  %v1712_v58 = vmul.f32 %v3029_v41, %v3029_v41 }
 0xe39   :  { %2423 = vtanh.f32 %v1739_v42  ;;  %v1725_v59 = vmul.f32 0.044715, %v1717_v44  ;;  %v1719_v60 = vmul.f32 %v1711_v46, %v3024_v55  ;;  %v2041_v44 = vld [vmem:[%s3089_s15] ss:$0 sm:$0xff]  ;;  %s2469_s15 = smov [#allocation2]  }
 0xe3a   :  { %2425 = vtanh.f32 %v1740_v39  ;;  %v1726_v61 = vmul.f32 0.044715, %v1718_v57  ;;  %v1720_v62 = vmul.f32 %v1712_v58, %v3029_v41  ;;  %s1978_s9 = sshll.u32 %s2469_s15, 4  ;;  %s1979_s9 = int_to_ptr.vmem [resolvable:$true] %s1978_s9 }
 0xe3b   :  { %v1733_v63 = vadd.f32 %v1725_v59, %v3016_v51  ;;  %v1727_v0 = vmul.f32 0.044715, %v1719_v60  ;;  %s2435_s27 = scalar_lea.vmem %s1979_s9, 512  ;;  %p2440_p1 = scmp.lt.s32.totalorder %s1979_s9, %s1979_s9 }
 0xe3c   :  { %v1734_v2 = vadd.f32 %v1726_v61, %v3019_v53  ;;  %v1728_v9 = vmul.f32 0.044715, %v1720_v62  ;;  %p2436_p0 = scmp.ne.s32.totalorder %s1979_s9, %s2435_s27  ;;  %p2441_p2 = scmp.lt.s32.totalorder %s2435_s27, %s2435_s27 }
 0xe3d   :  { %v1741_v12 = vmul.f32 0.7978846, %v1733_v63  ;;  %v1735_v13 = vadd.f32 %v1727_v0, %v3024_v55 }
 0xe3e   :  { %v1742_v15 = vmul.f32 0.7978846, %v1734_v2  ;;  %v1736_v16 = vadd.f32 %v1728_v9, %v3029_v41  ;;  %p2442_p3 = por %p2441_p2, %p2440_p1 }
 0xe3f   :  { %2427 = vtanh.f32 %v1741_v12  ;;  %v1743_v31 = vmul.f32 0.7978846, %v1735_v13 }
 0xe40   :  { %2429 = vtanh.f32 %v1742_v15  ;;  %v1744_v17 = vmul.f32 0.7978846, %v1736_v16  ;;  %p2443_p4 = pnand %p2442_p3, %p2436_p0 }
 0xe41   :  { %v2420_v18 = vpop.eup %2419  ;;  %2431 = vtanh.f32 %v1743_v31 }
 0xe42   :  { %v2422_v20 = vpop.eup %2421  ;;  %v1753_v23 = vadd.f32 1.0, %v2420_v18  ;;  %2433 = vtanh.f32 %v1744_v17 }
 0xe43   :  { %v2424_v24 = vpop.eup %2423  ;;  %v1754_v25 = vadd.f32 1.0, %v2422_v20 }
 0xe44   :  { %v2426_v27 = vpop.eup %2425  ;;  %v1761_v29 = vmul.f32 0.5, %v1753_v23  ;;  %v1755_v8 = vadd.f32 1.0, %v2424_v24 }
 0xe45   :  { %v1756_v35 = vadd.f32 1.0, %v2426_v27  ;;  %v1762_v36 = vmul.f32 0.5, %v1754_v25 }
 0xe46   :  { %v1763_v1 = vmul.f32 0.5, %v1755_v8  ;;  %v1769_v21 = vmul.f32 %v1761_v29, %v2995_v26 }
 0xe47   :  { %v1764_v19 = vmul.f32 0.5, %v1756_v35  ;;  %v1770_v45 = vmul.f32 %v1762_v36, %v2997_v28 }
 0xe48   :  { %v1771_v22 = vmul.f32 %v1763_v1, %v3001_v32 }
 0xe49   :  { %v2428_v43 = vpop.eup %2427  ;;  %v1772_v47 = vmul.f32 %v1764_v19, %v3005_v40 }
 0xe4a   :  { %v2430_v30 = vpop.eup %2429  ;;  %v1777_v33 = vpack.c.bf16 %v1771_v22, %v1769_v21  ;;  %v1757_v49 = vadd.f32 1.0, %v2428_v43 }
 0xe4b   :  { %v2432_v38 = vpop.eup %2431  ;;  %v1778_v4 = vpack.c.bf16 %v1772_v47, %v1770_v45  ;;  %v1758_v52 = vadd.f32 1.0, %v2430_v30 }
 0xe4c   :  { %v2434_v6 = vpop.eup %2433  ;;  %v1759_v54 = vadd.f32 1.0, %v2432_v38  ;;  %v1765_v7 = vmul.f32 0.5, %v1757_v49 }
 0xe4d   :  { %1948 = vmatprep.mubr.bf16.mxu0 %v1778_v4  ;;  %v1760_v10 = vadd.f32 1.0, %v2434_v6  ;;  %v1766_v14 = vmul.f32 0.5, %v1758_v52 }
 0xe4e   :  { %1949 = vmatmul.mubr.bf16.vlgmr.msra.gmra.mrb[36].mxu0 %v1777_v33  ;;  %v1767_v26 = vmul.f32 0.5, %v1759_v54  ;;  %v1773_v11 = vmul.f32 %v1765_v7, %v3016_v51 }
 0xe4f   :  { %v1768_v32 = vmul.f32 0.5, %v1760_v10  ;;  %v1774_v40 = vmul.f32 %v1766_v14, %v3019_v53 }
 0xe50   :  { %v1775_v28 = vmul.f32 %v1767_v26, %v3024_v55 }
 0xe51   :  { %v1776_v3 = vmul.f32 %v1768_v32, %v3029_v41 }
 0xe52   :  { %v1779_v56 = vpack.c.bf16 %v1775_v28, %v1773_v11 }
 0xe53   :  { %v1780_v37 = vpack.c.bf16 %v1776_v3, %v1774_v40 }
 0xe55   :  { %1956 = vmatprep.mubr.bf16.mxu0 %v1780_v37 }
 0xe56   :  { %1957 = vmatmul.mubr.bf16.gmra.mrb[40].mxu0 %v1779_v56 }
 0xf21   :  { %v2138_v42 = vpop.f32.mrb[36].mxu0 }
 0xf22   :  { %v2139_v46 = vpop.f32.mrb[37].mxu0 }
 0xf23   :  { %v2140_v39 = vadd.f32 %v2139_v46, %v2138_v42  ;;  %v2141_v57 = vpop.f32.mrb[38].mxu0 }
 0xf24   :  { %v2142_v58 = vpop.f32.mrb[39].mxu0 }
 0xf25   :  { %v1951_v51 = vadd.f32 %v2140_v39, %v2041_v44  ;;  %v2143_v59 = vadd.f32 %v2142_v58, %v2141_v57 }
 0xf27   :  { %v1965_v55 = vadd.f32 %v1951_v51, %v2877_v48  ;;  %v1954_v53 = vadd.f32 %v2143_v59, %v2041_v44 }
 0xf29   :  { %1969 = vst.msk [vmem:[#allocation2] sm:$0xff] %vm69_vm0, %v1965_v55  ;;  %v1966_v41 = vadd.f32 %v1954_v53, %v2880_v34  ;;  %v2144_v60 = vpop.f32.mrb[40].mxu0 }
 0xf2a   :  { %v2145_v61 = vpop.f32.mrb[41].mxu0 }
 0xf2b   :  { %1970 = vst.msk [vmem:[#allocation2 + $0x8] sm:$0xff] %vm69_vm0, %v1966_v41  ;;  %v2146_v62 = vadd.f32 %v2145_v61, %v2144_v60  ;;  %v2147_v63 = vpop.f32.mrb[42].mxu0 }
 0xf2c   :  { %v2148_v0 = vpop.f32.mrb[43].mxu0 }
 0xf2d   :  { %v1959_v2 = vadd.f32 %v2146_v62, %v2041_v44  ;;  %v2149_v9 = vadd.f32 %v2148_v0, %v2147_v63 }
 0xf2f   :  { %v1967_v12 = vadd.f32 %v1959_v2, %v2899_v5  ;;  %v1962_v13 = vadd.f32 %v2149_v9, %v2041_v44 }
 0xf31   :  { %1971 = vst.msk [vmem:[#allocation2 + $0x10] sm:$0xff] %vm69_vm0, %v1967_v12  ;;  %v1968_v48 = vadd.f32 %v1962_v13, %v2887_v50 }
 0xf33   :  { %1972 = vst.msk [vmem:[#allocation2 + $0x18] sm:$0xff] %vm69_vm0, %v1968_v48 }
 0xf34   :  { %2446 = shalt.err (!%p2443_p4)
}
 0xf35   :  { %s2447_s29 = scalar_lea.hbm %s3090_s16, 512 }
 0xf36   :  { %p2448_p5 = scmp.ne.s32.totalorder %s3090_s16, %s2447_s29  ;;  %p2451_p6 = scmp.lt.u32.totalorder %s2447_s29, %s3090_s16 }
 0xf38   :  { %p2453_p7 = pnand %p2451_p6, %p2448_p5 }
 0xf3a   :  { %2456 = shalt.err (!%p2453_p7)
}
 0xf3b   :  { %s2470_s7 = smov 128   ;;  %s2471_s17 = smov 8  }
 0xf3c   :  { %1984 = dma.vmem_to_hbm [thread:$0]  %s1979_s9, 512, %s3090_s16, [#allocation3], %s2470_s7, %s2470_s7, %s2471_s17  }
 0xf3d   :  { %2457 = dma.done.wait [#allocation3], 512  }
 0xf3e   :  { %2458 = vsyncadd [#allocation3], 4294966784 }
 0xf3f   :  { %1988 = vsyncpa [#allocation3], 1 }

</bundles_post_ra>
